<compile_context>
chip_gen: v5e
topology: v5e:2x2
jax: 0.10.0
libtpu: 0.0.40
codegen_flags: <defaults>
</compile_context>

<pallas_src>
import functools

import jax
import jax.numpy as jnp
from jax.experimental import pallas as pl
from jax.experimental.pallas import tpu as pltpu


# ----------------------------- Fused LSTMNet kernel -----------------------------

def _lstm_net_kernel(*refs, hidden, n_layers, T, B):
    """Whole network in one kernel invocation (grid=(1,), everything VMEM-resident).

    refs layout:
      refs[0]                      : x2d     (T*B, D)   bf16, time-major flattened input
      refs[1 + 3*l + {0,1,2}]      : w_ih_t (bf16), w_hh_t (bf16), b (f32)  for layer l
                                     (columns in [i,f,o,g] order, i/f/o columns pre-scaled 0.5)
      refs[1 + 3*n_layers]         : w_fc_t  (H, out)  bf16
      refs[2 + 3*n_layers]         : b_fc    (1, out)  f32
      refs[3 + 3*n_layers]         : out_ref (B, out)  f32
    """
    H = hidden
    x_ref = refs[0]
    w = refs[1:1 + 3 * n_layers]
    wfc_ref = refs[1 + 3 * n_layers]
    bfc_ref = refs[2 + 3 * n_layers]
    out_ref = refs[3 + 3 * n_layers]

    layer_in = x_ref[...]                                   # (T*B, D) bf16
    h = jnp.zeros((B, H), jnp.float32)

    for l in range(n_layers):
        wih_ref, whh_ref, b_ref = w[3 * l], w[3 * l + 1], w[3 * l + 2]

        # Input projection hoisted off the recurrence: one big bf16 MXU matmul, f32 accum,
        # bias added once for the whole sequence.
        gates_in = (
            jnp.dot(layer_in.astype(jnp.bfloat16), wih_ref[...],
                    preferred_element_type=jnp.float32)
            + b_ref[...]                                     # (T*B, 4H) f32
        )
        whh = whh_ref[...]                                   # (H, 4H) bf16, loaded once

        h = jnp.zeros((B, H), jnp.float32)
        c = jnp.zeros((B, H), jnp.float32)
        hs = []
        # Statically unrolled time loop (T small); only h @ W_hh + activations are serial.
        for t in range(T):
            g_all = gates_in[t * B:(t + 1) * B, :] + jnp.dot(
                h.astype(jnp.bfloat16), whh,
                preferred_element_type=jnp.float32)          # (B, 4H) f32

            # Single EUP pass for all four gates: columns are [i,f,o,g]; i/f/o pre-scaled
            # by 0.5 on the host so sigmoid(z) = 0.5 * tanh(z/2) + 0.5.
            t_all = jnp.tanh(g_all)                          # (B, 4H)
            sig = 0.5 * t_all[:, :3 * H] + 0.5               # VPU fixup, contiguous 3H slice
            i_g = sig[:, 0 * H:1 * H]
            f_g = sig[:, 1 * H:2 * H]
            o_g = sig[:, 2 * H:3 * H]
            g_g = t_all[:, 3 * H:]

            c = f_g * c + i_g * g_g
            h = o_g * jnp.tanh(c)

            if l < n_layers - 1:
                hs.append(h)                                 # stays in vregs

        if l < n_layers - 1:
            # Next layer's input assembled in-register (time-major), no VMEM round-trip.
            layer_in = jnp.concatenate(hs, axis=0)           # (T*B, H) f32

    # Final FC on the last timestep's hidden state of the last layer (out[:, -1, :]).
    out_ref[...] = (
        jnp.dot(h.astype(jnp.bfloat16), wfc_ref[...],
                preferred_element_type=jnp.float32)
        + bfc_ref[...]
    ).astype(out_ref.dtype)


# ------------------------- Host-side parameter preparation ----------------------

def _prep_kernel_params(params, hidden):
    """PyTorch-layout f32 params -> kernel layout.

    * columns reordered [i,f,g,o] -> [i,f,o,g]
    * i/f/o columns (first 3H after reorder) of W_ih, W_hh and b scaled by 0.5
      (sigmoid-as-tanh trick; exact power-of-two scaling)
    * weights cast to bf16 (MXU operands), biases kept f32.
    """
    H = hidden
    perm = jnp.concatenate([
        jnp.arange(0 * H, 1 * H),      # i
        jnp.arange(1 * H, 2 * H),      # f
        jnp.arange(3 * H, 4 * H),      # o
        jnp.arange(2 * H, 3 * H),      # g
    ])
    scale = jnp.concatenate([jnp.full((3 * H,), 0.5, jnp.float32),
                             jnp.ones((H,), jnp.float32)])

    layers = []
    for lp in params["layers"]:
        w_ih_t = (lp["w_ih_t"][:, perm] * scale).astype(jnp.bfloat16)   # (d_in, 4H)
        w_hh_t = (lp["w_hh_t"][:, perm] * scale).astype(jnp.bfloat16)   # (H, 4H)
        b = (lp["b"][:, perm] * scale).astype(jnp.float32)              # (1, 4H)
        layers.append((w_ih_t, w_hh_t, b))

    w_fc_t = params["w_fc_t"].astype(jnp.bfloat16)                      # (H, out)
    b_fc = params["b_fc"].astype(jnp.float32)                           # (1, out)
    return layers, w_fc_t, b_fc


def lstm_net_forward(params, x_btd, hidden):
    """x_btd: (B, T, in_size) batch-first float32, as in the PyTorch module."""
    B, T, D = x_btd.shape
    n_layers = len(params["layers"])
    out_size = params["w_fc_t"].shape[1]

    # Time-major flatten (row t*B + b): one cheap XLA transpose outside the kernel.
    x2d = jnp.transpose(x_btd, (1, 0, 2)).reshape(T * B, D).astype(jnp.bfloat16)

    layers, w_fc_t, b_fc = _prep_kernel_params(params, hidden)
    flat_inputs = [x2d]
    for (w_ih_t, w_hh_t, b) in layers:
        flat_inputs += [w_ih_t, w_hh_t, b]
    flat_inputs += [w_fc_t, b_fc]

    # Explicit VMEM budget: resident footprint is tiny; give generous headroom for the
    # default double-buffering of each input plus compiler scratch.
    in_bytes = sum(int(a.size) * a.dtype.itemsize for a in flat_inputs)
    vmem_limit = min(128 * 1024 * 1024, max(8 * 1024 * 1024, 4 * in_bytes))

    kernel = functools.partial(
        _lstm_net_kernel, hidden=hidden, n_layers=n_layers, T=T, B=B)

    return pl.pallas_call(
        kernel,
        out_shape=jax.ShapeDtypeStruct((B, out_size), jnp.float32),
        grid_spec=pltpu.PrefetchScalarGridSpec(
            num_scalar_prefetch=0,
            grid=(1,),  # single grid point: whole network runs with everything in VMEM
            in_specs=[pl.BlockSpec(a.shape, lambda i: (0, 0)) for a in flat_inputs],
            out_specs=pl.BlockSpec((B, out_size), lambda i: (0, 0)),
            scratch_shapes=[],
        ),
        compiler_params=pltpu.CompilerParams(
            dimension_semantics=("arbitrary",),
            vmem_limit_bytes=vmem_limit),
    )(*flat_inputs)


# ------------------------------- Parameter setup -------------------------------

def init_params(key, in_size, hidden, out_size, n_layers):
    """PyTorch-style U(-1/sqrt(H), 1/sqrt(H)) init, PyTorch gate order [i,f,g,o], f32."""
    k = 1.0 / jnp.sqrt(jnp.asarray(hidden, jnp.float32))
    params = {"layers": []}
    for layer in range(n_layers):
        d_in = in_size if layer == 0 else hidden
        key, k1, k2, k3, k4 = jax.random.split(key, 5)
        w_ih = jax.random.uniform(k1, (4 * hidden, d_in), jnp.float32, -k, k)
        w_hh = jax.random.uniform(k2, (4 * hidden, hidden), jnp.float32, -k, k)
        b_ih = jax.random.uniform(k3, (4 * hidden,), jnp.float32, -k, k)
        b_hh = jax.random.uniform(k4, (4 * hidden,), jnp.float32, -k, k)
        params["layers"].append({
            "w_ih_t": w_ih.T,                               # (d_in, 4H)
            "w_hh_t": w_hh.T,                               # (H, 4H)
            "b": (b_ih + b_hh).reshape(1, 4 * hidden),      # (1, 4H)
        })
    key, k5, k6 = jax.random.split(key, 3)
    kf = 1.0 / jnp.sqrt(jnp.asarray(hidden, jnp.float32))
    w_fc = jax.random.uniform(k5, (out_size, hidden), jnp.float32, -kf, kf)
    b_fc = jax.random.uniform(k6, (out_size,), jnp.float32, -kf, kf)
    params["w_fc_t"] = w_fc.T                    # (H, out)
    params["b_fc"] = b_fc.reshape(1, out_size)   # (1, out)
    return params


# ------------------------------- Pure-JAX reference ----------------------------

def _reference_forward(params, x_btd, hidden, matmul_dtype=jnp.float32):
    """PyTorch-order LSTM stack + FC.  matmul_dtype=bf16 mimics the kernel's MXU-operand
    quantization (bf16 operands, f32 accumulation) while keeping standard sigmoid/tanh."""
    md = matmul_dtype
    seq = jnp.transpose(x_btd, (1, 0, 2)).astype(jnp.float32)   # (T, B, D)
    B = seq.shape[1]
    for layer_p in params["layers"]:
        w_ih_t = layer_p["w_ih_t"].astype(md)
        w_hh_t = layer_p["w_hh_t"].astype(md)
        b = layer_p["b"]

        def step(carry, x_t, w_ih_t=w_ih_t, w_hh_t=w_hh_t, b=b):
            h, c = carry
            gates = (jnp.dot(x_t.astype(md), w_ih_t, preferred_element_type=jnp.float32)
                     + jnp.dot(h.astype(md), w_hh_t, preferred_element_type=jnp.float32)
                     + b)
            i = jax.nn.sigmoid(gates[:, 0 * hidden:1 * hidden])
            f = jax.nn.sigmoid(gates[:, 1 * hidden:2 * hidden])
            g = jnp.tanh(gates[:, 2 * hidden:3 * hidden])
            o = jax.nn.sigmoid(gates[:, 3 * hidden:4 * hidden])
            c = f * c + i * g
            h = o * jnp.tanh(c)
            return (h, c), h

        init = (jnp.zeros((B, hidden), jnp.float32),
                jnp.zeros((B, hidden), jnp.float32))
        _, seq = jax.lax.scan(step, init, seq)
    return (jnp.dot(seq[-1].astype(md), params["w_fc_t"].astype(md),
                    preferred_element_type=jnp.float32)
            + params["b_fc"])


# ------------------------------------- main -------------------------------------

if __name__ == "__main__":
    # Small shapes consistent with the module (LSTMNet defaults scaled down).
    batch, seq_len = 2, 8
    in_size, hidden, out_size, n_layers = 64, 32, 8, 4

    key = jax.random.PRNGKey(0)
    key, xk, pk = jax.random.split(key, 3)
    x = jax.random.normal(xk, (batch, seq_len, in_size), jnp.float32)
    params = init_params(pk, in_size, hidden, out_size, n_layers)

    out = lstm_net_forward(params, x, hidden)
    out = jax.block_until_ready(out)
    assert out.shape == (batch, out_size)

    # Tight check vs a reference that mimics the kernel's bf16 MXU-operand quantization.
    ref_bf16 = _reference_forward(params, x, hidden, matmul_dtype=jnp.bfloat16)
    assert jnp.allclose(out, ref_bf16, atol=2e-3, rtol=2e-3), "mismatch vs bf16-operand reference"

    # Looser check vs the pure-f32 PyTorch-semantics reference (bf16 operand quantization).
    ref_f32 = _reference_forward(params, x, hidden, matmul_dtype=jnp.float32)
    assert jnp.allclose(out, ref_f32, atol=5e-2, rtol=5e-2), "mismatch vs f32 reference"

    print("KERNEL_OK")
</pallas_src>

<mosaic_0001>
module attributes {stable_mosaic.version = 11 : i64} {
  func.func @_lstm_net_kernel(%arg0: i32, %arg1: memref<16x64xbf16, #tpu.memory_space<vmem>>, %arg2: memref<64x128xbf16, #tpu.memory_space<vmem>>, %arg3: memref<32x128xbf16, #tpu.memory_space<vmem>>, %arg4: memref<1x128xf32, #tpu.memory_space<vmem>>, %arg5: memref<32x128xbf16, #tpu.memory_space<vmem>>, %arg6: memref<32x128xbf16, #tpu.memory_space<vmem>>, %arg7: memref<1x128xf32, #tpu.memory_space<vmem>>, %arg8: memref<32x128xbf16, #tpu.memory_space<vmem>>, %arg9: memref<32x128xbf16, #tpu.memory_space<vmem>>, %arg10: memref<1x128xf32, #tpu.memory_space<vmem>>, %arg11: memref<32x128xbf16, #tpu.memory_space<vmem>>, %arg12: memref<32x128xbf16, #tpu.memory_space<vmem>>, %arg13: memref<1x128xf32, #tpu.memory_space<vmem>>, %arg14: memref<32x8xbf16, #tpu.memory_space<vmem>>, %arg15: memref<1x8xf32, #tpu.memory_space<vmem>>, %arg16: memref<2x8xf32, #tpu.memory_space<vmem>>) attributes {dimension_semantics = [#tpu.dimension_semantics<arbitrary>], iteration_bounds = array<i64: 1>, scalar_prefetch = 0 : i64, scratch_operands = 0 : i64, tpu.core_type = #tpu.core_type<tc>, window_params = [{pipeline_mode = #tpu.pipeline_mode<synchronous>, transform_indices = @transform_0, window_bounds = array<i64: 16, 64>}, {pipeline_mode = #tpu.pipeline_mode<synchronous>, transform_indices = @transform_1, window_bounds = array<i64: 64, 128>}, {pipeline_mode = #tpu.pipeline_mode<synchronous>, transform_indices = @transform_2, window_bounds = array<i64: 32, 128>}, {pipeline_mode = #tpu.pipeline_mode<synchronous>, transform_indices = @transform_3, window_bounds = array<i64: 1, 128>}, {pipeline_mode = #tpu.pipeline_mode<synchronous>, transform_indices = @transform_4, window_bounds = array<i64: 32, 128>}, {pipeline_mode = #tpu.pipeline_mode<synchronous>, transform_indices = @transform_5, window_bounds = array<i64: 32, 128>}, {pipeline_mode = #tpu.pipeline_mode<synchronous>, transform_indices = @transform_6, window_bounds = array<i64: 1, 128>}, {pipeline_mode = #tpu.pipeline_mode<synchronous>, transform_indices = @transform_7, window_bounds = array<i64: 32, 128>}, {pipeline_mode = #tpu.pipeline_mode<synchronous>, transform_indices = @transform_8, window_bounds = array<i64: 32, 128>}, {pipeline_mode = #tpu.pipeline_mode<synchronous>, transform_indices = @transform_9, window_bounds = array<i64: 1, 128>}, {pipeline_mode = #tpu.pipeline_mode<synchronous>, transform_indices = @transform_10, window_bounds = array<i64: 32, 128>}, {pipeline_mode = #tpu.pipeline_mode<synchronous>, transform_indices = @transform_11, window_bounds = array<i64: 32, 128>}, {pipeline_mode = #tpu.pipeline_mode<synchronous>, transform_indices = @transform_12, window_bounds = array<i64: 1, 128>}, {pipeline_mode = #tpu.pipeline_mode<synchronous>, transform_indices = @transform_13, window_bounds = array<i64: 32, 8>}, {pipeline_mode = #tpu.pipeline_mode<synchronous>, transform_indices = @transform_14, window_bounds = array<i64: 1, 8>}, {pipeline_mode = #tpu.pipeline_mode<synchronous>, transform_indices = @transform_15, window_bounds = array<i64: 2, 8>}]} {
    %c0 = arith.constant 0 : index
    %c0_0 = arith.constant 0 : index
    %0 = vector.load %arg1[%c0, %c0_0] : memref<16x64xbf16, #tpu.memory_space<vmem>>, vector<16x64xbf16>
    %c0_1 = arith.constant 0 : index
    %c0_2 = arith.constant 0 : index
    %1 = vector.load %arg2[%c0_1, %c0_2] : memref<64x128xbf16, #tpu.memory_space<vmem>>, vector<64x128xbf16>
    %cst = arith.constant dense<0.000000e+00> : vector<16x128xf32>
    %2 = tpu.matmul %0, %1, %cst {dimension_numbers = #tpu.dot_dimension_numbers<[1], [0], [0], [1], [0, 0, 1, 1], [], []>} : vector<16x64xbf16>, vector<64x128xbf16>, vector<16x128xf32> -> vector<16x128xf32>
    %c0_3 = arith.constant 0 : index
    %c0_4 = arith.constant 0 : index
    %3 = vector.load %arg4[%c0_3, %c0_4] : memref<1x128xf32, #tpu.memory_space<vmem>>, vector<1x128xf32>
    %4 = vector.broadcast %3 : vector<1x128xf32> to vector<16x128xf32>
    %5 = arith.addf %2, %4 : vector<16x128xf32>
    %c0_5 = arith.constant 0 : index
    %c0_6 = arith.constant 0 : index
    %6 = vector.load %arg3[%c0_5, %c0_6] : memref<32x128xbf16, #tpu.memory_space<vmem>>, vector<32x128xbf16>
    %cst_7 = arith.constant 0.000000e+00 : f32
    %7 = vector.broadcast %cst_7 : f32 to vector<2x32xf32>
    %cst_8 = arith.constant 0.000000e+00 : f32
    %8 = vector.broadcast %cst_8 : f32 to vector<2x32xf32>
    %9 = vector.extract_strided_slice %5 {offsets = [0, 0], sizes = [2, 128], strides = [1, 1]} : vector<16x128xf32> to vector<2x128xf32>
    %10 = arith.truncf %7 : vector<2x32xf32> to vector<2x32xbf16>
    %cst_9 = arith.constant dense<0.000000e+00> : vector<2x128xf32>
    %11 = tpu.matmul %10, %6, %cst_9 {dimension_numbers = #tpu.dot_dimension_numbers<[1], [0], [0], [1], [0, 0, 1, 1], [], []>} : vector<2x32xbf16>, vector<32x128xbf16>, vector<2x128xf32> -> vector<2x128xf32>
    %12 = arith.addf %9, %11 : vector<2x128xf32>
    %13 = math.tanh %12 : vector<2x128xf32>
    %14 = vector.extract_strided_slice %13 {offsets = [0, 0], sizes = [2, 96], strides = [1, 1]} : vector<2x128xf32> to vector<2x96xf32>
    %cst_10 = arith.constant 5.000000e-01 : f32
    %15 = vector.broadcast %cst_10 : f32 to vector<2x96xf32>
    %16 = arith.mulf %15, %14 : vector<2x96xf32>
    %cst_11 = arith.constant 5.000000e-01 : f32
    %17 = vector.broadcast %cst_11 : f32 to vector<2x96xf32>
    %18 = arith.addf %16, %17 : vector<2x96xf32>
    %19 = vector.extract_strided_slice %18 {offsets = [0, 0], sizes = [2, 32], strides = [1, 1]} : vector<2x96xf32> to vector<2x32xf32>
    %20 = vector.extract_strided_slice %18 {offsets = [0, 32], sizes = [2, 32], strides = [1, 1]} : vector<2x96xf32> to vector<2x32xf32>
    %21 = vector.extract_strided_slice %18 {offsets = [0, 64], sizes = [2, 32], strides = [1, 1]} : vector<2x96xf32> to vector<2x32xf32>
    %22 = vector.extract_strided_slice %13 {offsets = [0, 96], sizes = [2, 32], strides = [1, 1]} : vector<2x128xf32> to vector<2x32xf32>
    %23 = arith.mulf %20, %8 : vector<2x32xf32>
    %24 = arith.mulf %19, %22 : vector<2x32xf32>
    %25 = arith.addf %23, %24 : vector<2x32xf32>
    %26 = math.tanh %25 : vector<2x32xf32>
    %27 = arith.mulf %21, %26 : vector<2x32xf32>
    %28 = vector.extract_strided_slice %5 {offsets = [2, 0], sizes = [2, 128], strides = [1, 1]} : vector<16x128xf32> to vector<2x128xf32>
    %29 = arith.truncf %27 : vector<2x32xf32> to vector<2x32xbf16>
    %cst_12 = arith.constant dense<0.000000e+00> : vector<2x128xf32>
    %30 = tpu.matmul %29, %6, %cst_12 {dimension_numbers = #tpu.dot_dimension_numbers<[1], [0], [0], [1], [0, 0, 1, 1], [], []>} : vector<2x32xbf16>, vector<32x128xbf16>, vector<2x128xf32> -> vector<2x128xf32>
    %31 = arith.addf %28, %30 : vector<2x128xf32>
    %32 = math.tanh %31 : vector<2x128xf32>
    %33 = vector.extract_strided_slice %32 {offsets = [0, 0], sizes = [2, 96], strides = [1, 1]} : vector<2x128xf32> to vector<2x96xf32>
    %cst_13 = arith.constant 5.000000e-01 : f32
    %34 = vector.broadcast %cst_13 : f32 to vector<2x96xf32>
    %35 = arith.mulf %34, %33 : vector<2x96xf32>
    %cst_14 = arith.constant 5.000000e-01 : f32
    %36 = vector.broadcast %cst_14 : f32 to vector<2x96xf32>
    %37 = arith.addf %35, %36 : vector<2x96xf32>
    %38 = vector.extract_strided_slice %37 {offsets = [0, 0], sizes = [2, 32], strides = [1, 1]} : vector<2x96xf32> to vector<2x32xf32>
    %39 = vector.extract_strided_slice %37 {offsets = [0, 32], sizes = [2, 32], strides = [1, 1]} : vector<2x96xf32> to vector<2x32xf32>
    %40 = vector.extract_strided_slice %37 {offsets = [0, 64], sizes = [2, 32], strides = [1, 1]} : vector<2x96xf32> to vector<2x32xf32>
    %41 = vector.extract_strided_slice %32 {offsets = [0, 96], sizes = [2, 32], strides = [1, 1]} : vector<2x128xf32> to vector<2x32xf32>
    %42 = arith.mulf %39, %25 : vector<2x32xf32>
    %43 = arith.mulf %38, %41 : vector<2x32xf32>
    %44 = arith.addf %42, %43 : vector<2x32xf32>
    %45 = math.tanh %44 : vector<2x32xf32>
    %46 = arith.mulf %40, %45 : vector<2x32xf32>
    %47 = vector.extract_strided_slice %5 {offsets = [4, 0], sizes = [2, 128], strides = [1, 1]} : vector<16x128xf32> to vector<2x128xf32>
    %48 = arith.truncf %46 : vector<2x32xf32> to vector<2x32xbf16>
    %cst_15 = arith.constant dense<0.000000e+00> : vector<2x128xf32>
    %49 = tpu.matmul %48, %6, %cst_15 {dimension_numbers = #tpu.dot_dimension_numbers<[1], [0], [0], [1], [0, 0, 1, 1], [], []>} : vector<2x32xbf16>, vector<32x128xbf16>, vector<2x128xf32> -> vector<2x128xf32>
    %50 = arith.addf %47, %49 : vector<2x128xf32>
    %51 = math.tanh %50 : vector<2x128xf32>
    %52 = vector.extract_strided_slice %51 {offsets = [0, 0], sizes = [2, 96], strides = [1, 1]} : vector<2x128xf32> to vector<2x96xf32>
    %cst_16 = arith.constant 5.000000e-01 : f32
    %53 = vector.broadcast %cst_16 : f32 to vector<2x96xf32>
    %54 = arith.mulf %53, %52 : vector<2x96xf32>
    %cst_17 = arith.constant 5.000000e-01 : f32
    %55 = vector.broadcast %cst_17 : f32 to vector<2x96xf32>
    %56 = arith.addf %54, %55 : vector<2x96xf32>
    %57 = vector.extract_strided_slice %56 {offsets = [0, 0], sizes = [2, 32], strides = [1, 1]} : vector<2x96xf32> to vector<2x32xf32>
    %58 = vector.extract_strided_slice %56 {offsets = [0, 32], sizes = [2, 32], strides = [1, 1]} : vector<2x96xf32> to vector<2x32xf32>
    %59 = vector.extract_strided_slice %56 {offsets = [0, 64], sizes = [2, 32], strides = [1, 1]} : vector<2x96xf32> to vector<2x32xf32>
    %60 = vector.extract_strided_slice %51 {offsets = [0, 96], sizes = [2, 32], strides = [1, 1]} : vector<2x128xf32> to vector<2x32xf32>
    %61 = arith.mulf %58, %44 : vector<2x32xf32>
    %62 = arith.mulf %57, %60 : vector<2x32xf32>
    %63 = arith.addf %61, %62 : vector<2x32xf32>
    %64 = math.tanh %63 : vector<2x32xf32>
    %65 = arith.mulf %59, %64 : vector<2x32xf32>
    %66 = vector.extract_strided_slice %5 {offsets = [6, 0], sizes = [2, 128], strides = [1, 1]} : vector<16x128xf32> to vector<2x128xf32>
    %67 = arith.truncf %65 : vector<2x32xf32> to vector<2x32xbf16>
    %cst_18 = arith.constant dense<0.000000e+00> : vector<2x128xf32>
    %68 = tpu.matmul %67, %6, %cst_18 {dimension_numbers = #tpu.dot_dimension_numbers<[1], [0], [0], [1], [0, 0, 1, 1], [], []>} : vector<2x32xbf16>, vector<32x128xbf16>, vector<2x128xf32> -> vector<2x128xf32>
    %69 = arith.addf %66, %68 : vector<2x128xf32>
    %70 = math.tanh %69 : vector<2x128xf32>
    %71 = vector.extract_strided_slice %70 {offsets = [0, 0], sizes = [2, 96], strides = [1, 1]} : vector<2x128xf32> to vector<2x96xf32>
    %cst_19 = arith.constant 5.000000e-01 : f32
    %72 = vector.broadcast %cst_19 : f32 to vector<2x96xf32>
    %73 = arith.mulf %72, %71 : vector<2x96xf32>
    %cst_20 = arith.constant 5.000000e-01 : f32
    %74 = vector.broadcast %cst_20 : f32 to vector<2x96xf32>
    %75 = arith.addf %73, %74 : vector<2x96xf32>
    %76 = vector.extract_strided_slice %75 {offsets = [0, 0], sizes = [2, 32], strides = [1, 1]} : vector<2x96xf32> to vector<2x32xf32>
    %77 = vector.extract_strided_slice %75 {offsets = [0, 32], sizes = [2, 32], strides = [1, 1]} : vector<2x96xf32> to vector<2x32xf32>
    %78 = vector.extract_strided_slice %75 {offsets = [0, 64], sizes = [2, 32], strides = [1, 1]} : vector<2x96xf32> to vector<2x32xf32>
    %79 = vector.extract_strided_slice %70 {offsets = [0, 96], sizes = [2, 32], strides = [1, 1]} : vector<2x128xf32> to vector<2x32xf32>
    %80 = arith.mulf %77, %63 : vector<2x32xf32>
    %81 = arith.mulf %76, %79 : vector<2x32xf32>
    %82 = arith.addf %80, %81 : vector<2x32xf32>
    %83 = math.tanh %82 : vector<2x32xf32>
    %84 = arith.mulf %78, %83 : vector<2x32xf32>
    %85 = vector.extract_strided_slice %5 {offsets = [8, 0], sizes = [2, 128], strides = [1, 1]} : vector<16x128xf32> to vector<2x128xf32>
    %86 = arith.truncf %84 : vector<2x32xf32> to vector<2x32xbf16>
    %cst_21 = arith.constant dense<0.000000e+00> : vector<2x128xf32>
    %87 = tpu.matmul %86, %6, %cst_21 {dimension_numbers = #tpu.dot_dimension_numbers<[1], [0], [0], [1], [0, 0, 1, 1], [], []>} : vector<2x32xbf16>, vector<32x128xbf16>, vector<2x128xf32> -> vector<2x128xf32>
    %88 = arith.addf %85, %87 : vector<2x128xf32>
    %89 = math.tanh %88 : vector<2x128xf32>
    %90 = vector.extract_strided_slice %89 {offsets = [0, 0], sizes = [2, 96], strides = [1, 1]} : vector<2x128xf32> to vector<2x96xf32>
    %cst_22 = arith.constant 5.000000e-01 : f32
    %91 = vector.broadcast %cst_22 : f32 to vector<2x96xf32>
    %92 = arith.mulf %91, %90 : vector<2x96xf32>
    %cst_23 = arith.constant 5.000000e-01 : f32
    %93 = vector.broadcast %cst_23 : f32 to vector<2x96xf32>
    %94 = arith.addf %92, %93 : vector<2x96xf32>
    %95 = vector.extract_strided_slice %94 {offsets = [0, 0], sizes = [2, 32], strides = [1, 1]} : vector<2x96xf32> to vector<2x32xf32>
    %96 = vector.extract_strided_slice %94 {offsets = [0, 32], sizes = [2, 32], strides = [1, 1]} : vector<2x96xf32> to vector<2x32xf32>
    %97 = vector.extract_strided_slice %94 {offsets = [0, 64], sizes = [2, 32], strides = [1, 1]} : vector<2x96xf32> to vector<2x32xf32>
    %98 = vector.extract_strided_slice %89 {offsets = [0, 96], sizes = [2, 32], strides = [1, 1]} : vector<2x128xf32> to vector<2x32xf32>
    %99 = arith.mulf %96, %82 : vector<2x32xf32>
    %100 = arith.mulf %95, %98 : vector<2x32xf32>
    %101 = arith.addf %99, %100 : vector<2x32xf32>
    %102 = math.tanh %101 : vector<2x32xf32>
    %103 = arith.mulf %97, %102 : vector<2x32xf32>
    %104 = vector.extract_strided_slice %5 {offsets = [10, 0], sizes = [2, 128], strides = [1, 1]} : vector<16x128xf32> to vector<2x128xf32>
    %105 = arith.truncf %103 : vector<2x32xf32> to vector<2x32xbf16>
    %cst_24 = arith.constant dense<0.000000e+00> : vector<2x128xf32>
    %106 = tpu.matmul %105, %6, %cst_24 {dimension_numbers = #tpu.dot_dimension_numbers<[1], [0], [0], [1], [0, 0, 1, 1], [], []>} : vector<2x32xbf16>, vector<32x128xbf16>, vector<2x128xf32> -> vector<2x128xf32>
    %107 = arith.addf %104, %106 : vector<2x128xf32>
    %108 = math.tanh %107 : vector<2x128xf32>
    %109 = vector.extract_strided_slice %108 {offsets = [0, 0], sizes = [2, 96], strides = [1, 1]} : vector<2x128xf32> to vector<2x96xf32>
    %cst_25 = arith.constant 5.000000e-01 : f32
    %110 = vector.broadcast %cst_25 : f32 to vector<2x96xf32>
    %111 = arith.mulf %110, %109 : vector<2x96xf32>
    %cst_26 = arith.constant 5.000000e-01 : f32
    %112 = vector.broadcast %cst_26 : f32 to vector<2x96xf32>
    %113 = arith.addf %111, %112 : vector<2x96xf32>
    %114 = vector.extract_strided_slice %113 {offsets = [0, 0], sizes = [2, 32], strides = [1, 1]} : vector<2x96xf32> to vector<2x32xf32>
    %115 = vector.extract_strided_slice %113 {offsets = [0, 32], sizes = [2, 32], strides = [1, 1]} : vector<2x96xf32> to vector<2x32xf32>
    %116 = vector.extract_strided_slice %113 {offsets = [0, 64], sizes = [2, 32], strides = [1, 1]} : vector<2x96xf32> to vector<2x32xf32>
    %117 = vector.extract_strided_slice %108 {offsets = [0, 96], sizes = [2, 32], strides = [1, 1]} : vector<2x128xf32> to vector<2x32xf32>
    %118 = arith.mulf %115, %101 : vector<2x32xf32>
    %119 = arith.mulf %114, %117 : vector<2x32xf32>
    %120 = arith.addf %118, %119 : vector<2x32xf32>
    %121 = math.tanh %120 : vector<2x32xf32>
    %122 = arith.mulf %116, %121 : vector<2x32xf32>
    %123 = vector.extract_strided_slice %5 {offsets = [12, 0], sizes = [2, 128], strides = [1, 1]} : vector<16x128xf32> to vector<2x128xf32>
    %124 = arith.truncf %122 : vector<2x32xf32> to vector<2x32xbf16>
    %cst_27 = arith.constant dense<0.000000e+00> : vector<2x128xf32>
    %125 = tpu.matmul %124, %6, %cst_27 {dimension_numbers = #tpu.dot_dimension_numbers<[1], [0], [0], [1], [0, 0, 1, 1], [], []>} : vector<2x32xbf16>, vector<32x128xbf16>, vector<2x128xf32> -> vector<2x128xf32>
    %126 = arith.addf %123, %125 : vector<2x128xf32>
    %127 = math.tanh %126 : vector<2x128xf32>
    %128 = vector.extract_strided_slice %127 {offsets = [0, 0], sizes = [2, 96], strides = [1, 1]} : vector<2x128xf32> to vector<2x96xf32>
    %cst_28 = arith.constant 5.000000e-01 : f32
    %129 = vector.broadcast %cst_28 : f32 to vector<2x96xf32>
    %130 = arith.mulf %129, %128 : vector<2x96xf32>
    %cst_29 = arith.constant 5.000000e-01 : f32
    %131 = vector.broadcast %cst_29 : f32 to vector<2x96xf32>
    %132 = arith.addf %130, %131 : vector<2x96xf32>
    %133 = vector.extract_strided_slice %132 {offsets = [0, 0], sizes = [2, 32], strides = [1, 1]} : vector<2x96xf32> to vector<2x32xf32>
    %134 = vector.extract_strided_slice %132 {offsets = [0, 32], sizes = [2, 32], strides = [1, 1]} : vector<2x96xf32> to vector<2x32xf32>
    %135 = vector.extract_strided_slice %132 {offsets = [0, 64], sizes = [2, 32], strides = [1, 1]} : vector<2x96xf32> to vector<2x32xf32>
    %136 = vector.extract_strided_slice %127 {offsets = [0, 96], sizes = [2, 32], strides = [1, 1]} : vector<2x128xf32> to vector<2x32xf32>
    %137 = arith.mulf %134, %120 : vector<2x32xf32>
    %138 = arith.mulf %133, %136 : vector<2x32xf32>
    %139 = arith.addf %137, %138 : vector<2x32xf32>
    %140 = math.tanh %139 : vector<2x32xf32>
    %141 = arith.mulf %135, %140 : vector<2x32xf32>
    %142 = vector.extract_strided_slice %5 {offsets = [14, 0], sizes = [2, 128], strides = [1, 1]} : vector<16x128xf32> to vector<2x128xf32>
    %143 = arith.truncf %141 : vector<2x32xf32> to vector<2x32xbf16>
    %cst_30 = arith.constant dense<0.000000e+00> : vector<2x128xf32>
    %144 = tpu.matmul %143, %6, %cst_30 {dimension_numbers = #tpu.dot_dimension_numbers<[1], [0], [0], [1], [0, 0, 1, 1], [], []>} : vector<2x32xbf16>, vector<32x128xbf16>, vector<2x128xf32> -> vector<2x128xf32>
    %145 = arith.addf %142, %144 : vector<2x128xf32>
    %146 = math.tanh %145 : vector<2x128xf32>
    %147 = vector.extract_strided_slice %146 {offsets = [0, 0], sizes = [2, 96], strides = [1, 1]} : vector<2x128xf32> to vector<2x96xf32>
    %cst_31 = arith.constant 5.000000e-01 : f32
    %148 = vector.broadcast %cst_31 : f32 to vector<2x96xf32>
    %149 = arith.mulf %148, %147 : vector<2x96xf32>
    %cst_32 = arith.constant 5.000000e-01 : f32
    %150 = vector.broadcast %cst_32 : f32 to vector<2x96xf32>
    %151 = arith.addf %149, %150 : vector<2x96xf32>
    %152 = vector.extract_strided_slice %151 {offsets = [0, 0], sizes = [2, 32], strides = [1, 1]} : vector<2x96xf32> to vector<2x32xf32>
    %153 = vector.extract_strided_slice %151 {offsets = [0, 32], sizes = [2, 32], strides = [1, 1]} : vector<2x96xf32> to vector<2x32xf32>
    %154 = vector.extract_strided_slice %151 {offsets = [0, 64], sizes = [2, 32], strides = [1, 1]} : vector<2x96xf32> to vector<2x32xf32>
    %155 = vector.extract_strided_slice %146 {offsets = [0, 96], sizes = [2, 32], strides = [1, 1]} : vector<2x128xf32> to vector<2x32xf32>
    %156 = arith.mulf %153, %139 : vector<2x32xf32>
    %157 = arith.mulf %152, %155 : vector<2x32xf32>
    %158 = arith.addf %156, %157 : vector<2x32xf32>
    %159 = math.tanh %158 : vector<2x32xf32>
    %160 = arith.mulf %154, %159 : vector<2x32xf32>
    %161 = tpu.concatenate %27, %46, %65, %84, %103, %122, %141, %160 in 0 : vector<2x32xf32>, vector<2x32xf32>, vector<2x32xf32>, vector<2x32xf32>, vector<2x32xf32>, vector<2x32xf32>, vector<2x32xf32>, vector<2x32xf32> -> vector<16x32xf32>
    %162 = arith.truncf %161 : vector<16x32xf32> to vector<16x32xbf16>
    %c0_33 = arith.constant 0 : index
    %c0_34 = arith.constant 0 : index
    %163 = vector.load %arg5[%c0_33, %c0_34] : memref<32x128xbf16, #tpu.memory_space<vmem>>, vector<32x128xbf16>
    %cst_35 = arith.constant dense<0.000000e+00> : vector<16x128xf32>
    %164 = tpu.matmul %162, %163, %cst_35 {dimension_numbers = #tpu.dot_dimension_numbers<[1], [0], [0], [1], [0, 0, 1, 1], [], []>} : vector<16x32xbf16>, vector<32x128xbf16>, vector<16x128xf32> -> vector<16x128xf32>
    %c0_36 = arith.constant 0 : index
    %c0_37 = arith.constant 0 : index
    %165 = vector.load %arg7[%c0_36, %c0_37] : memref<1x128xf32, #tpu.memory_space<vmem>>, vector<1x128xf32>
    %166 = vector.broadcast %165 : vector<1x128xf32> to vector<16x128xf32>
    %167 = arith.addf %164, %166 : vector<16x128xf32>
    %c0_38 = arith.constant 0 : index
    %c0_39 = arith.constant 0 : index
    %168 = vector.load %arg6[%c0_38, %c0_39] : memref<32x128xbf16, #tpu.memory_space<vmem>>, vector<32x128xbf16>
    %cst_40 = arith.constant 0.000000e+00 : f32
    %169 = vector.broadcast %cst_40 : f32 to vector<2x32xf32>
    %cst_41 = arith.constant 0.000000e+00 : f32
    %170 = vector.broadcast %cst_41 : f32 to vector<2x32xf32>
    %171 = vector.extract_strided_slice %167 {offsets = [0, 0], sizes = [2, 128], strides = [1, 1]} : vector<16x128xf32> to vector<2x128xf32>
    %172 = arith.truncf %169 : vector<2x32xf32> to vector<2x32xbf16>
    %cst_42 = arith.constant dense<0.000000e+00> : vector<2x128xf32>
    %173 = tpu.matmul %172, %168, %cst_42 {dimension_numbers = #tpu.dot_dimension_numbers<[1], [0], [0], [1], [0, 0, 1, 1], [], []>} : vector<2x32xbf16>, vector<32x128xbf16>, vector<2x128xf32> -> vector<2x128xf32>
    %174 = arith.addf %171, %173 : vector<2x128xf32>
    %175 = math.tanh %174 : vector<2x128xf32>
    %176 = vector.extract_strided_slice %175 {offsets = [0, 0], sizes = [2, 96], strides = [1, 1]} : vector<2x128xf32> to vector<2x96xf32>
    %cst_43 = arith.constant 5.000000e-01 : f32
    %177 = vector.broadcast %cst_43 : f32 to vector<2x96xf32>
    %178 = arith.mulf %177, %176 : vector<2x96xf32>
    %cst_44 = arith.constant 5.000000e-01 : f32
    %179 = vector.broadcast %cst_44 : f32 to vector<2x96xf32>
    %180 = arith.addf %178, %179 : vector<2x96xf32>
    %181 = vector.extract_strided_slice %180 {offsets = [0, 0], sizes = [2, 32], strides = [1, 1]} : vector<2x96xf32> to vector<2x32xf32>
    %182 = vector.extract_strided_slice %180 {offsets = [0, 32], sizes = [2, 32], strides = [1, 1]} : vector<2x96xf32> to vector<2x32xf32>
    %183 = vector.extract_strided_slice %180 {offsets = [0, 64], sizes = [2, 32], strides = [1, 1]} : vector<2x96xf32> to vector<2x32xf32>
    %184 = vector.extract_strided_slice %175 {offsets = [0, 96], sizes = [2, 32], strides = [1, 1]} : vector<2x128xf32> to vector<2x32xf32>
    %185 = arith.mulf %182, %170 : vector<2x32xf32>
    %186 = arith.mulf %181, %184 : vector<2x32xf32>
    %187 = arith.addf %185, %186 : vector<2x32xf32>
    %188 = math.tanh %187 : vector<2x32xf32>
    %189 = arith.mulf %183, %188 : vector<2x32xf32>
    %190 = vector.extract_strided_slice %167 {offsets = [2, 0], sizes = [2, 128], strides = [1, 1]} : vector<16x128xf32> to vector<2x128xf32>
    %191 = arith.truncf %189 : vector<2x32xf32> to vector<2x32xbf16>
    %cst_45 = arith.constant dense<0.000000e+00> : vector<2x128xf32>
    %192 = tpu.matmul %191, %168, %cst_45 {dimension_numbers = #tpu.dot_dimension_numbers<[1], [0], [0], [1], [0, 0, 1, 1], [], []>} : vector<2x32xbf16>, vector<32x128xbf16>, vector<2x128xf32> -> vector<2x128xf32>
    %193 = arith.addf %190, %192 : vector<2x128xf32>
    %194 = math.tanh %193 : vector<2x128xf32>
    %195 = vector.extract_strided_slice %194 {offsets = [0, 0], sizes = [2, 96], strides = [1, 1]} : vector<2x128xf32> to vector<2x96xf32>
    %cst_46 = arith.constant 5.000000e-01 : f32
    %196 = vector.broadcast %cst_46 : f32 to vector<2x96xf32>
    %197 = arith.mulf %196, %195 : vector<2x96xf32>
    %cst_47 = arith.constant 5.000000e-01 : f32
    %198 = vector.broadcast %cst_47 : f32 to vector<2x96xf32>
    %199 = arith.addf %197, %198 : vector<2x96xf32>
    %200 = vector.extract_strided_slice %199 {offsets = [0, 0], sizes = [2, 32], strides = [1, 1]} : vector<2x96xf32> to vector<2x32xf32>
    %201 = vector.extract_strided_slice %199 {offsets = [0, 32], sizes = [2, 32], strides = [1, 1]} : vector<2x96xf32> to vector<2x32xf32>
    %202 = vector.extract_strided_slice %199 {offsets = [0, 64], sizes = [2, 32], strides = [1, 1]} : vector<2x96xf32> to vector<2x32xf32>
    %203 = vector.extract_strided_slice %194 {offsets = [0, 96], sizes = [2, 32], strides = [1, 1]} : vector<2x128xf32> to vector<2x32xf32>
    %204 = arith.mulf %201, %187 : vector<2x32xf32>
    %205 = arith.mulf %200, %203 : vector<2x32xf32>
    %206 = arith.addf %204, %205 : vector<2x32xf32>
    %207 = math.tanh %206 : vector<2x32xf32>
    %208 = arith.mulf %202, %207 : vector<2x32xf32>
    %209 = vector.extract_strided_slice %167 {offsets = [4, 0], sizes = [2, 128], strides = [1, 1]} : vector<16x128xf32> to vector<2x128xf32>
    %210 = arith.truncf %208 : vector<2x32xf32> to vector<2x32xbf16>
    %cst_48 = arith.constant dense<0.000000e+00> : vector<2x128xf32>
    %211 = tpu.matmul %210, %168, %cst_48 {dimension_numbers = #tpu.dot_dimension_numbers<[1], [0], [0], [1], [0, 0, 1, 1], [], []>} : vector<2x32xbf16>, vector<32x128xbf16>, vector<2x128xf32> -> vector<2x128xf32>
    %212 = arith.addf %209, %211 : vector<2x128xf32>
    %213 = math.tanh %212 : vector<2x128xf32>
    %214 = vector.extract_strided_slice %213 {offsets = [0, 0], sizes = [2, 96], strides = [1, 1]} : vector<2x128xf32> to vector<2x96xf32>
    %cst_49 = arith.constant 5.000000e-01 : f32
    %215 = vector.broadcast %cst_49 : f32 to vector<2x96xf32>
    %216 = arith.mulf %215, %214 : vector<2x96xf32>
    %cst_50 = arith.constant 5.000000e-01 : f32
    %217 = vector.broadcast %cst_50 : f32 to vector<2x96xf32>
    %218 = arith.addf %216, %217 : vector<2x96xf32>
    %219 = vector.extract_strided_slice %218 {offsets = [0, 0], sizes = [2, 32], strides = [1, 1]} : vector<2x96xf32> to vector<2x32xf32>
    %220 = vector.extract_strided_slice %218 {offsets = [0, 32], sizes = [2, 32], strides = [1, 1]} : vector<2x96xf32> to vector<2x32xf32>
    %221 = vector.extract_strided_slice %218 {offsets = [0, 64], sizes = [2, 32], strides = [1, 1]} : vector<2x96xf32> to vector<2x32xf32>
    %222 = vector.extract_strided_slice %213 {offsets = [0, 96], sizes = [2, 32], strides = [1, 1]} : vector<2x128xf32> to vector<2x32xf32>
    %223 = arith.mulf %220, %206 : vector<2x32xf32>
    %224 = arith.mulf %219, %222 : vector<2x32xf32>
    %225 = arith.addf %223, %224 : vector<2x32xf32>
    %226 = math.tanh %225 : vector<2x32xf32>
    %227 = arith.mulf %221, %226 : vector<2x32xf32>
    %228 = vector.extract_strided_slice %167 {offsets = [6, 0], sizes = [2, 128], strides = [1, 1]} : vector<16x128xf32> to vector<2x128xf32>
    %229 = arith.truncf %227 : vector<2x32xf32> to vector<2x32xbf16>
    %cst_51 = arith.constant dense<0.000000e+00> : vector<2x128xf32>
    %230 = tpu.matmul %229, %168, %cst_51 {dimension_numbers = #tpu.dot_dimension_numbers<[1], [0], [0], [1], [0, 0, 1, 1], [], []>} : vector<2x32xbf16>, vector<32x128xbf16>, vector<2x128xf32> -> vector<2x128xf32>
    %231 = arith.addf %228, %230 : vector<2x128xf32>
    %232 = math.tanh %231 : vector<2x128xf32>
    %233 = vector.extract_strided_slice %232 {offsets = [0, 0], sizes = [2, 96], strides = [1, 1]} : vector<2x128xf32> to vector<2x96xf32>
    %cst_52 = arith.constant 5.000000e-01 : f32
    %234 = vector.broadcast %cst_52 : f32 to vector<2x96xf32>
    %235 = arith.mulf %234, %233 : vector<2x96xf32>
    %cst_53 = arith.constant 5.000000e-01 : f32
    %236 = vector.broadcast %cst_53 : f32 to vector<2x96xf32>
    %237 = arith.addf %235, %236 : vector<2x96xf32>
    %238 = vector.extract_strided_slice %237 {offsets = [0, 0], sizes = [2, 32], strides = [1, 1]} : vector<2x96xf32> to vector<2x32xf32>
    %239 = vector.extract_strided_slice %237 {offsets = [0, 32], sizes = [2, 32], strides = [1, 1]} : vector<2x96xf32> to vector<2x32xf32>
    %240 = vector.extract_strided_slice %237 {offsets = [0, 64], sizes = [2, 32], strides = [1, 1]} : vector<2x96xf32> to vector<2x32xf32>
    %241 = vector.extract_strided_slice %232 {offsets = [0, 96], sizes = [2, 32], strides = [1, 1]} : vector<2x128xf32> to vector<2x32xf32>
    %242 = arith.mulf %239, %225 : vector<2x32xf32>
    %243 = arith.mulf %238, %241 : vector<2x32xf32>
    %244 = arith.addf %242, %243 : vector<2x32xf32>
    %245 = math.tanh %244 : vector<2x32xf32>
    %246 = arith.mulf %240, %245 : vector<2x32xf32>
    %247 = vector.extract_strided_slice %167 {offsets = [8, 0], sizes = [2, 128], strides = [1, 1]} : vector<16x128xf32> to vector<2x128xf32>
    %248 = arith.truncf %246 : vector<2x32xf32> to vector<2x32xbf16>
    %cst_54 = arith.constant dense<0.000000e+00> : vector<2x128xf32>
    %249 = tpu.matmul %248, %168, %cst_54 {dimension_numbers = #tpu.dot_dimension_numbers<[1], [0], [0], [1], [0, 0, 1, 1], [], []>} : vector<2x32xbf16>, vector<32x128xbf16>, vector<2x128xf32> -> vector<2x128xf32>
    %250 = arith.addf %247, %249 : vector<2x128xf32>
    %251 = math.tanh %250 : vector<2x128xf32>
    %252 = vector.extract_strided_slice %251 {offsets = [0, 0], sizes = [2, 96], strides = [1, 1]} : vector<2x128xf32> to vector<2x96xf32>
    %cst_55 = arith.constant 5.000000e-01 : f32
    %253 = vector.broadcast %cst_55 : f32 to vector<2x96xf32>
    %254 = arith.mulf %253, %252 : vector<2x96xf32>
    %cst_56 = arith.constant 5.000000e-01 : f32
    %255 = vector.broadcast %cst_56 : f32 to vector<2x96xf32>
    %256 = arith.addf %254, %255 : vector<2x96xf32>
    %257 = vector.extract_strided_slice %256 {offsets = [0, 0], sizes = [2, 32], strides = [1, 1]} : vector<2x96xf32> to vector<2x32xf32>
    %258 = vector.extract_strided_slice %256 {offsets = [0, 32], sizes = [2, 32], strides = [1, 1]} : vector<2x96xf32> to vector<2x32xf32>
    %259 = vector.extract_strided_slice %256 {offsets = [0, 64], sizes = [2, 32], strides = [1, 1]} : vector<2x96xf32> to vector<2x32xf32>
    %260 = vector.extract_strided_slice %251 {offsets = [0, 96], sizes = [2, 32], strides = [1, 1]} : vector<2x128xf32> to vector<2x32xf32>
    %261 = arith.mulf %258, %244 : vector<2x32xf32>
    %262 = arith.mulf %257, %260 : vector<2x32xf32>
    %263 = arith.addf %261, %262 : vector<2x32xf32>
    %264 = math.tanh %263 : vector<2x32xf32>
    %265 = arith.mulf %259, %264 : vector<2x32xf32>
    %266 = vector.extract_strided_slice %167 {offsets = [10, 0], sizes = [2, 128], strides = [1, 1]} : vector<16x128xf32> to vector<2x128xf32>
    %267 = arith.truncf %265 : vector<2x32xf32> to vector<2x32xbf16>
    %cst_57 = arith.constant dense<0.000000e+00> : vector<2x128xf32>
    %268 = tpu.matmul %267, %168, %cst_57 {dimension_numbers = #tpu.dot_dimension_numbers<[1], [0], [0], [1], [0, 0, 1, 1], [], []>} : vector<2x32xbf16>, vector<32x128xbf16>, vector<2x128xf32> -> vector<2x128xf32>
    %269 = arith.addf %266, %268 : vector<2x128xf32>
    %270 = math.tanh %269 : vector<2x128xf32>
    %271 = vector.extract_strided_slice %270 {offsets = [0, 0], sizes = [2, 96], strides = [1, 1]} : vector<2x128xf32> to vector<2x96xf32>
    %cst_58 = arith.constant 5.000000e-01 : f32
    %272 = vector.broadcast %cst_58 : f32 to vector<2x96xf32>
    %273 = arith.mulf %272, %271 : vector<2x96xf32>
    %cst_59 = arith.constant 5.000000e-01 : f32
    %274 = vector.broadcast %cst_59 : f32 to vector<2x96xf32>
    %275 = arith.addf %273, %274 : vector<2x96xf32>
    %276 = vector.extract_strided_slice %275 {offsets = [0, 0], sizes = [2, 32], strides = [1, 1]} : vector<2x96xf32> to vector<2x32xf32>
    %277 = vector.extract_strided_slice %275 {offsets = [0, 32], sizes = [2, 32], strides = [1, 1]} : vector<2x96xf32> to vector<2x32xf32>
    %278 = vector.extract_strided_slice %275 {offsets = [0, 64], sizes = [2, 32], strides = [1, 1]} : vector<2x96xf32> to vector<2x32xf32>
    %279 = vector.extract_strided_slice %270 {offsets = [0, 96], sizes = [2, 32], strides = [1, 1]} : vector<2x128xf32> to vector<2x32xf32>
    %280 = arith.mulf %277, %263 : vector<2x32xf32>
    %281 = arith.mulf %276, %279 : vector<2x32xf32>
    %282 = arith.addf %280, %281 : vector<2x32xf32>
    %283 = math.tanh %282 : vector<2x32xf32>
    %284 = arith.mulf %278, %283 : vector<2x32xf32>
    %285 = vector.extract_strided_slice %167 {offsets = [12, 0], sizes = [2, 128], strides = [1, 1]} : vector<16x128xf32> to vector<2x128xf32>
    %286 = arith.truncf %284 : vector<2x32xf32> to vector<2x32xbf16>
    %cst_60 = arith.constant dense<0.000000e+00> : vector<2x128xf32>
    %287 = tpu.matmul %286, %168, %cst_60 {dimension_numbers = #tpu.dot_dimension_numbers<[1], [0], [0], [1], [0, 0, 1, 1], [], []>} : vector<2x32xbf16>, vector<32x128xbf16>, vector<2x128xf32> -> vector<2x128xf32>
    %288 = arith.addf %285, %287 : vector<2x128xf32>
    %289 = math.tanh %288 : vector<2x128xf32>
    %290 = vector.extract_strided_slice %289 {offsets = [0, 0], sizes = [2, 96], strides = [1, 1]} : vector<2x128xf32> to vector<2x96xf32>
    %cst_61 = arith.constant 5.000000e-01 : f32
    %291 = vector.broadcast %cst_61 : f32 to vector<2x96xf32>
    %292 = arith.mulf %291, %290 : vector<2x96xf32>
    %cst_62 = arith.constant 5.000000e-01 : f32
    %293 = vector.broadcast %cst_62 : f32 to vector<2x96xf32>
    %294 = arith.addf %292, %293 : vector<2x96xf32>
    %295 = vector.extract_strided_slice %294 {offsets = [0, 0], sizes = [2, 32], strides = [1, 1]} : vector<2x96xf32> to vector<2x32xf32>
    %296 = vector.extract_strided_slice %294 {offsets = [0, 32], sizes = [2, 32], strides = [1, 1]} : vector<2x96xf32> to vector<2x32xf32>
    %297 = vector.extract_strided_slice %294 {offsets = [0, 64], sizes = [2, 32], strides = [1, 1]} : vector<2x96xf32> to vector<2x32xf32>
    %298 = vector.extract_strided_slice %289 {offsets = [0, 96], sizes = [2, 32], strides = [1, 1]} : vector<2x128xf32> to vector<2x32xf32>
    %299 = arith.mulf %296, %282 : vector<2x32xf32>
    %300 = arith.mulf %295, %298 : vector<2x32xf32>
    %301 = arith.addf %299, %300 : vector<2x32xf32>
    %302 = math.tanh %301 : vector<2x32xf32>
    %303 = arith.mulf %297, %302 : vector<2x32xf32>
    %304 = vector.extract_strided_slice %167 {offsets = [14, 0], sizes = [2, 128], strides = [1, 1]} : vector<16x128xf32> to vector<2x128xf32>
    %305 = arith.truncf %303 : vector<2x32xf32> to vector<2x32xbf16>
    %cst_63 = arith.constant dense<0.000000e+00> : vector<2x128xf32>
    %306 = tpu.matmul %305, %168, %cst_63 {dimension_numbers = #tpu.dot_dimension_numbers<[1], [0], [0], [1], [0, 0, 1, 1], [], []>} : vector<2x32xbf16>, vector<32x128xbf16>, vector<2x128xf32> -> vector<2x128xf32>
    %307 = arith.addf %304, %306 : vector<2x128xf32>
    %308 = math.tanh %307 : vector<2x128xf32>
    %309 = vector.extract_strided_slice %308 {offsets = [0, 0], sizes = [2, 96], strides = [1, 1]} : vector<2x128xf32> to vector<2x96xf32>
    %cst_64 = arith.constant 5.000000e-01 : f32
    %310 = vector.broadcast %cst_64 : f32 to vector<2x96xf32>
    %311 = arith.mulf %310, %309 : vector<2x96xf32>
    %cst_65 = arith.constant 5.000000e-01 : f32
    %312 = vector.broadcast %cst_65 : f32 to vector<2x96xf32>
    %313 = arith.addf %311, %312 : vector<2x96xf32>
    %314 = vector.extract_strided_slice %313 {offsets = [0, 0], sizes = [2, 32], strides = [1, 1]} : vector<2x96xf32> to vector<2x32xf32>
    %315 = vector.extract_strided_slice %313 {offsets = [0, 32], sizes = [2, 32], strides = [1, 1]} : vector<2x96xf32> to vector<2x32xf32>
    %316 = vector.extract_strided_slice %313 {offsets = [0, 64], sizes = [2, 32], strides = [1, 1]} : vector<2x96xf32> to vector<2x32xf32>
    %317 = vector.extract_strided_slice %308 {offsets = [0, 96], sizes = [2, 32], strides = [1, 1]} : vector<2x128xf32> to vector<2x32xf32>
    %318 = arith.mulf %315, %301 : vector<2x32xf32>
    %319 = arith.mulf %314, %317 : vector<2x32xf32>
    %320 = arith.addf %318, %319 : vector<2x32xf32>
    %321 = math.tanh %320 : vector<2x32xf32>
    %322 = arith.mulf %316, %321 : vector<2x32xf32>
    %323 = tpu.concatenate %189, %208, %227, %246, %265, %284, %303, %322 in 0 : vector<2x32xf32>, vector<2x32xf32>, vector<2x32xf32>, vector<2x32xf32>, vector<2x32xf32>, vector<2x32xf32>, vector<2x32xf32>, vector<2x32xf32> -> vector<16x32xf32>
    %324 = arith.truncf %323 : vector<16x32xf32> to vector<16x32xbf16>
    %c0_66 = arith.constant 0 : index
    %c0_67 = arith.constant 0 : index
    %325 = vector.load %arg8[%c0_66, %c0_67] : memref<32x128xbf16, #tpu.memory_space<vmem>>, vector<32x128xbf16>
    %cst_68 = arith.constant dense<0.000000e+00> : vector<16x128xf32>
    %326 = tpu.matmul %324, %325, %cst_68 {dimension_numbers = #tpu.dot_dimension_numbers<[1], [0], [0], [1], [0, 0, 1, 1], [], []>} : vector<16x32xbf16>, vector<32x128xbf16>, vector<16x128xf32> -> vector<16x128xf32>
    %c0_69 = arith.constant 0 : index
    %c0_70 = arith.constant 0 : index
    %327 = vector.load %arg10[%c0_69, %c0_70] : memref<1x128xf32, #tpu.memory_space<vmem>>, vector<1x128xf32>
    %328 = vector.broadcast %327 : vector<1x128xf32> to vector<16x128xf32>
    %329 = arith.addf %326, %328 : vector<16x128xf32>
    %c0_71 = arith.constant 0 : index
    %c0_72 = arith.constant 0 : index
    %330 = vector.load %arg9[%c0_71, %c0_72] : memref<32x128xbf16, #tpu.memory_space<vmem>>, vector<32x128xbf16>
    %cst_73 = arith.constant 0.000000e+00 : f32
    %331 = vector.broadcast %cst_73 : f32 to vector<2x32xf32>
    %cst_74 = arith.constant 0.000000e+00 : f32
    %332 = vector.broadcast %cst_74 : f32 to vector<2x32xf32>
    %333 = vector.extract_strided_slice %329 {offsets = [0, 0], sizes = [2, 128], strides = [1, 1]} : vector<16x128xf32> to vector<2x128xf32>
    %334 = arith.truncf %331 : vector<2x32xf32> to vector<2x32xbf16>
    %cst_75 = arith.constant dense<0.000000e+00> : vector<2x128xf32>
    %335 = tpu.matmul %334, %330, %cst_75 {dimension_numbers = #tpu.dot_dimension_numbers<[1], [0], [0], [1], [0, 0, 1, 1], [], []>} : vector<2x32xbf16>, vector<32x128xbf16>, vector<2x128xf32> -> vector<2x128xf32>
    %336 = arith.addf %333, %335 : vector<2x128xf32>
    %337 = math.tanh %336 : vector<2x128xf32>
    %338 = vector.extract_strided_slice %337 {offsets = [0, 0], sizes = [2, 96], strides = [1, 1]} : vector<2x128xf32> to vector<2x96xf32>
    %cst_76 = arith.constant 5.000000e-01 : f32
    %339 = vector.broadcast %cst_76 : f32 to vector<2x96xf32>
    %340 = arith.mulf %339, %338 : vector<2x96xf32>
    %cst_77 = arith.constant 5.000000e-01 : f32
    %341 = vector.broadcast %cst_77 : f32 to vector<2x96xf32>
    %342 = arith.addf %340, %341 : vector<2x96xf32>
    %343 = vector.extract_strided_slice %342 {offsets = [0, 0], sizes = [2, 32], strides = [1, 1]} : vector<2x96xf32> to vector<2x32xf32>
    %344 = vector.extract_strided_slice %342 {offsets = [0, 32], sizes = [2, 32], strides = [1, 1]} : vector<2x96xf32> to vector<2x32xf32>
    %345 = vector.extract_strided_slice %342 {offsets = [0, 64], sizes = [2, 32], strides = [1, 1]} : vector<2x96xf32> to vector<2x32xf32>
    %346 = vector.extract_strided_slice %337 {offsets = [0, 96], sizes = [2, 32], strides = [1, 1]} : vector<2x128xf32> to vector<2x32xf32>
    %347 = arith.mulf %344, %332 : vector<2x32xf32>
    %348 = arith.mulf %343, %346 : vector<2x32xf32>
    %349 = arith.addf %347, %348 : vector<2x32xf32>
    %350 = math.tanh %349 : vector<2x32xf32>
    %351 = arith.mulf %345, %350 : vector<2x32xf32>
    %352 = vector.extract_strided_slice %329 {offsets = [2, 0], sizes = [2, 128], strides = [1, 1]} : vector<16x128xf32> to vector<2x128xf32>
    %353 = arith.truncf %351 : vector<2x32xf32> to vector<2x32xbf16>
    %cst_78 = arith.constant dense<0.000000e+00> : vector<2x128xf32>
    %354 = tpu.matmul %353, %330, %cst_78 {dimension_numbers = #tpu.dot_dimension_numbers<[1], [0], [0], [1], [0, 0, 1, 1], [], []>} : vector<2x32xbf16>, vector<32x128xbf16>, vector<2x128xf32> -> vector<2x128xf32>
    %355 = arith.addf %352, %354 : vector<2x128xf32>
    %356 = math.tanh %355 : vector<2x128xf32>
    %357 = vector.extract_strided_slice %356 {offsets = [0, 0], sizes = [2, 96], strides = [1, 1]} : vector<2x128xf32> to vector<2x96xf32>
    %cst_79 = arith.constant 5.000000e-01 : f32
    %358 = vector.broadcast %cst_79 : f32 to vector<2x96xf32>
    %359 = arith.mulf %358, %357 : vector<2x96xf32>
    %cst_80 = arith.constant 5.000000e-01 : f32
    %360 = vector.broadcast %cst_80 : f32 to vector<2x96xf32>
    %361 = arith.addf %359, %360 : vector<2x96xf32>
    %362 = vector.extract_strided_slice %361 {offsets = [0, 0], sizes = [2, 32], strides = [1, 1]} : vector<2x96xf32> to vector<2x32xf32>
    %363 = vector.extract_strided_slice %361 {offsets = [0, 32], sizes = [2, 32], strides = [1, 1]} : vector<2x96xf32> to vector<2x32xf32>
    %364 = vector.extract_strided_slice %361 {offsets = [0, 64], sizes = [2, 32], strides = [1, 1]} : vector<2x96xf32> to vector<2x32xf32>
    %365 = vector.extract_strided_slice %356 {offsets = [0, 96], sizes = [2, 32], strides = [1, 1]} : vector<2x128xf32> to vector<2x32xf32>
    %366 = arith.mulf %363, %349 : vector<2x32xf32>
    %367 = arith.mulf %362, %365 : vector<2x32xf32>
    %368 = arith.addf %366, %367 : vector<2x32xf32>
    %369 = math.tanh %368 : vector<2x32xf32>
    %370 = arith.mulf %364, %369 : vector<2x32xf32>
    %371 = vector.extract_strided_slice %329 {offsets = [4, 0], sizes = [2, 128], strides = [1, 1]} : vector<16x128xf32> to vector<2x128xf32>
    %372 = arith.truncf %370 : vector<2x32xf32> to vector<2x32xbf16>
    %cst_81 = arith.constant dense<0.000000e+00> : vector<2x128xf32>
    %373 = tpu.matmul %372, %330, %cst_81 {dimension_numbers = #tpu.dot_dimension_numbers<[1], [0], [0], [1], [0, 0, 1, 1], [], []>} : vector<2x32xbf16>, vector<32x128xbf16>, vector<2x128xf32> -> vector<2x128xf32>
    %374 = arith.addf %371, %373 : vector<2x128xf32>
    %375 = math.tanh %374 : vector<2x128xf32>
    %376 = vector.extract_strided_slice %375 {offsets = [0, 0], sizes = [2, 96], strides = [1, 1]} : vector<2x128xf32> to vector<2x96xf32>
    %cst_82 = arith.constant 5.000000e-01 : f32
    %377 = vector.broadcast %cst_82 : f32 to vector<2x96xf32>
    %378 = arith.mulf %377, %376 : vector<2x96xf32>
    %cst_83 = arith.constant 5.000000e-01 : f32
    %379 = vector.broadcast %cst_83 : f32 to vector<2x96xf32>
    %380 = arith.addf %378, %379 : vector<2x96xf32>
    %381 = vector.extract_strided_slice %380 {offsets = [0, 0], sizes = [2, 32], strides = [1, 1]} : vector<2x96xf32> to vector<2x32xf32>
    %382 = vector.extract_strided_slice %380 {offsets = [0, 32], sizes = [2, 32], strides = [1, 1]} : vector<2x96xf32> to vector<2x32xf32>
    %383 = vector.extract_strided_slice %380 {offsets = [0, 64], sizes = [2, 32], strides = [1, 1]} : vector<2x96xf32> to vector<2x32xf32>
    %384 = vector.extract_strided_slice %375 {offsets = [0, 96], sizes = [2, 32], strides = [1, 1]} : vector<2x128xf32> to vector<2x32xf32>
    %385 = arith.mulf %382, %368 : vector<2x32xf32>
    %386 = arith.mulf %381, %384 : vector<2x32xf32>
    %387 = arith.addf %385, %386 : vector<2x32xf32>
    %388 = math.tanh %387 : vector<2x32xf32>
    %389 = arith.mulf %383, %388 : vector<2x32xf32>
    %390 = vector.extract_strided_slice %329 {offsets = [6, 0], sizes = [2, 128], strides = [1, 1]} : vector<16x128xf32> to vector<2x128xf32>
    %391 = arith.truncf %389 : vector<2x32xf32> to vector<2x32xbf16>
    %cst_84 = arith.constant dense<0.000000e+00> : vector<2x128xf32>
    %392 = tpu.matmul %391, %330, %cst_84 {dimension_numbers = #tpu.dot_dimension_numbers<[1], [0], [0], [1], [0, 0, 1, 1], [], []>} : vector<2x32xbf16>, vector<32x128xbf16>, vector<2x128xf32> -> vector<2x128xf32>
    %393 = arith.addf %390, %392 : vector<2x128xf32>
    %394 = math.tanh %393 : vector<2x128xf32>
    %395 = vector.extract_strided_slice %394 {offsets = [0, 0], sizes = [2, 96], strides = [1, 1]} : vector<2x128xf32> to vector<2x96xf32>
    %cst_85 = arith.constant 5.000000e-01 : f32
    %396 = vector.broadcast %cst_85 : f32 to vector<2x96xf32>
    %397 = arith.mulf %396, %395 : vector<2x96xf32>
    %cst_86 = arith.constant 5.000000e-01 : f32
    %398 = vector.broadcast %cst_86 : f32 to vector<2x96xf32>
    %399 = arith.addf %397, %398 : vector<2x96xf32>
    %400 = vector.extract_strided_slice %399 {offsets = [0, 0], sizes = [2, 32], strides = [1, 1]} : vector<2x96xf32> to vector<2x32xf32>
    %401 = vector.extract_strided_slice %399 {offsets = [0, 32], sizes = [2, 32], strides = [1, 1]} : vector<2x96xf32> to vector<2x32xf32>
    %402 = vector.extract_strided_slice %399 {offsets = [0, 64], sizes = [2, 32], strides = [1, 1]} : vector<2x96xf32> to vector<2x32xf32>
    %403 = vector.extract_strided_slice %394 {offsets = [0, 96], sizes = [2, 32], strides = [1, 1]} : vector<2x128xf32> to vector<2x32xf32>
    %404 = arith.mulf %401, %387 : vector<2x32xf32>
    %405 = arith.mulf %400, %403 : vector<2x32xf32>
    %406 = arith.addf %404, %405 : vector<2x32xf32>
    %407 = math.tanh %406 : vector<2x32xf32>
    %408 = arith.mulf %402, %407 : vector<2x32xf32>
    %409 = vector.extract_strided_slice %329 {offsets = [8, 0], sizes = [2, 128], strides = [1, 1]} : vector<16x128xf32> to vector<2x128xf32>
    %410 = arith.truncf %408 : vector<2x32xf32> to vector<2x32xbf16>
    %cst_87 = arith.constant dense<0.000000e+00> : vector<2x128xf32>
    %411 = tpu.matmul %410, %330, %cst_87 {dimension_numbers = #tpu.dot_dimension_numbers<[1], [0], [0], [1], [0, 0, 1, 1], [], []>} : vector<2x32xbf16>, vector<32x128xbf16>, vector<2x128xf32> -> vector<2x128xf32>
    %412 = arith.addf %409, %411 : vector<2x128xf32>
    %413 = math.tanh %412 : vector<2x128xf32>
    %414 = vector.extract_strided_slice %413 {offsets = [0, 0], sizes = [2, 96], strides = [1, 1]} : vector<2x128xf32> to vector<2x96xf32>
    %cst_88 = arith.constant 5.000000e-01 : f32
    %415 = vector.broadcast %cst_88 : f32 to vector<2x96xf32>
    %416 = arith.mulf %415, %414 : vector<2x96xf32>
    %cst_89 = arith.constant 5.000000e-01 : f32
    %417 = vector.broadcast %cst_89 : f32 to vector<2x96xf32>
    %418 = arith.addf %416, %417 : vector<2x96xf32>
    %419 = vector.extract_strided_slice %418 {offsets = [0, 0], sizes = [2, 32], strides = [1, 1]} : vector<2x96xf32> to vector<2x32xf32>
    %420 = vector.extract_strided_slice %418 {offsets = [0, 32], sizes = [2, 32], strides = [1, 1]} : vector<2x96xf32> to vector<2x32xf32>
    %421 = vector.extract_strided_slice %418 {offsets = [0, 64], sizes = [2, 32], strides = [1, 1]} : vector<2x96xf32> to vector<2x32xf32>
    %422 = vector.extract_strided_slice %413 {offsets = [0, 96], sizes = [2, 32], strides = [1, 1]} : vector<2x128xf32> to vector<2x32xf32>
    %423 = arith.mulf %420, %406 : vector<2x32xf32>
    %424 = arith.mulf %419, %422 : vector<2x32xf32>
    %425 = arith.addf %423, %424 : vector<2x32xf32>
    %426 = math.tanh %425 : vector<2x32xf32>
    %427 = arith.mulf %421, %426 : vector<2x32xf32>
    %428 = vector.extract_strided_slice %329 {offsets = [10, 0], sizes = [2, 128], strides = [1, 1]} : vector<16x128xf32> to vector<2x128xf32>
    %429 = arith.truncf %427 : vector<2x32xf32> to vector<2x32xbf16>
    %cst_90 = arith.constant dense<0.000000e+00> : vector<2x128xf32>
    %430 = tpu.matmul %429, %330, %cst_90 {dimension_numbers = #tpu.dot_dimension_numbers<[1], [0], [0], [1], [0, 0, 1, 1], [], []>} : vector<2x32xbf16>, vector<32x128xbf16>, vector<2x128xf32> -> vector<2x128xf32>
    %431 = arith.addf %428, %430 : vector<2x128xf32>
    %432 = math.tanh %431 : vector<2x128xf32>
    %433 = vector.extract_strided_slice %432 {offsets = [0, 0], sizes = [2, 96], strides = [1, 1]} : vector<2x128xf32> to vector<2x96xf32>
    %cst_91 = arith.constant 5.000000e-01 : f32
    %434 = vector.broadcast %cst_91 : f32 to vector<2x96xf32>
    %435 = arith.mulf %434, %433 : vector<2x96xf32>
    %cst_92 = arith.constant 5.000000e-01 : f32
    %436 = vector.broadcast %cst_92 : f32 to vector<2x96xf32>
    %437 = arith.addf %435, %436 : vector<2x96xf32>
    %438 = vector.extract_strided_slice %437 {offsets = [0, 0], sizes = [2, 32], strides = [1, 1]} : vector<2x96xf32> to vector<2x32xf32>
    %439 = vector.extract_strided_slice %437 {offsets = [0, 32], sizes = [2, 32], strides = [1, 1]} : vector<2x96xf32> to vector<2x32xf32>
    %440 = vector.extract_strided_slice %437 {offsets = [0, 64], sizes = [2, 32], strides = [1, 1]} : vector<2x96xf32> to vector<2x32xf32>
    %441 = vector.extract_strided_slice %432 {offsets = [0, 96], sizes = [2, 32], strides = [1, 1]} : vector<2x128xf32> to vector<2x32xf32>
    %442 = arith.mulf %439, %425 : vector<2x32xf32>
    %443 = arith.mulf %438, %441 : vector<2x32xf32>
    %444 = arith.addf %442, %443 : vector<2x32xf32>
    %445 = math.tanh %444 : vector<2x32xf32>
    %446 = arith.mulf %440, %445 : vector<2x32xf32>
    %447 = vector.extract_strided_slice %329 {offsets = [12, 0], sizes = [2, 128], strides = [1, 1]} : vector<16x128xf32> to vector<2x128xf32>
    %448 = arith.truncf %446 : vector<2x32xf32> to vector<2x32xbf16>
    %cst_93 = arith.constant dense<0.000000e+00> : vector<2x128xf32>
    %449 = tpu.matmul %448, %330, %cst_93 {dimension_numbers = #tpu.dot_dimension_numbers<[1], [0], [0], [1], [0, 0, 1, 1], [], []>} : vector<2x32xbf16>, vector<32x128xbf16>, vector<2x128xf32> -> vector<2x128xf32>
    %450 = arith.addf %447, %449 : vector<2x128xf32>
    %451 = math.tanh %450 : vector<2x128xf32>
    %452 = vector.extract_strided_slice %451 {offsets = [0, 0], sizes = [2, 96], strides = [1, 1]} : vector<2x128xf32> to vector<2x96xf32>
    %cst_94 = arith.constant 5.000000e-01 : f32
    %453 = vector.broadcast %cst_94 : f32 to vector<2x96xf32>
    %454 = arith.mulf %453, %452 : vector<2x96xf32>
    %cst_95 = arith.constant 5.000000e-01 : f32
    %455 = vector.broadcast %cst_95 : f32 to vector<2x96xf32>
    %456 = arith.addf %454, %455 : vector<2x96xf32>
    %457 = vector.extract_strided_slice %456 {offsets = [0, 0], sizes = [2, 32], strides = [1, 1]} : vector<2x96xf32> to vector<2x32xf32>
    %458 = vector.extract_strided_slice %456 {offsets = [0, 32], sizes = [2, 32], strides = [1, 1]} : vector<2x96xf32> to vector<2x32xf32>
    %459 = vector.extract_strided_slice %456 {offsets = [0, 64], sizes = [2, 32], strides = [1, 1]} : vector<2x96xf32> to vector<2x32xf32>
    %460 = vector.extract_strided_slice %451 {offsets = [0, 96], sizes = [2, 32], strides = [1, 1]} : vector<2x128xf32> to vector<2x32xf32>
    %461 = arith.mulf %458, %444 : vector<2x32xf32>
    %462 = arith.mulf %457, %460 : vector<2x32xf32>
    %463 = arith.addf %461, %462 : vector<2x32xf32>
    %464 = math.tanh %463 : vector<2x32xf32>
    %465 = arith.mulf %459, %464 : vector<2x32xf32>
    %466 = vector.extract_strided_slice %329 {offsets = [14, 0], sizes = [2, 128], strides = [1, 1]} : vector<16x128xf32> to vector<2x128xf32>
    %467 = arith.truncf %465 : vector<2x32xf32> to vector<2x32xbf16>
    %cst_96 = arith.constant dense<0.000000e+00> : vector<2x128xf32>
    %468 = tpu.matmul %467, %330, %cst_96 {dimension_numbers = #tpu.dot_dimension_numbers<[1], [0], [0], [1], [0, 0, 1, 1], [], []>} : vector<2x32xbf16>, vector<32x128xbf16>, vector<2x128xf32> -> vector<2x128xf32>
    %469 = arith.addf %466, %468 : vector<2x128xf32>
    %470 = math.tanh %469 : vector<2x128xf32>
    %471 = vector.extract_strided_slice %470 {offsets = [0, 0], sizes = [2, 96], strides = [1, 1]} : vector<2x128xf32> to vector<2x96xf32>
    %cst_97 = arith.constant 5.000000e-01 : f32
    %472 = vector.broadcast %cst_97 : f32 to vector<2x96xf32>
    %473 = arith.mulf %472, %471 : vector<2x96xf32>
    %cst_98 = arith.constant 5.000000e-01 : f32
    %474 = vector.broadcast %cst_98 : f32 to vector<2x96xf32>
    %475 = arith.addf %473, %474 : vector<2x96xf32>
    %476 = vector.extract_strided_slice %475 {offsets = [0, 0], sizes = [2, 32], strides = [1, 1]} : vector<2x96xf32> to vector<2x32xf32>
    %477 = vector.extract_strided_slice %475 {offsets = [0, 32], sizes = [2, 32], strides = [1, 1]} : vector<2x96xf32> to vector<2x32xf32>
    %478 = vector.extract_strided_slice %475 {offsets = [0, 64], sizes = [2, 32], strides = [1, 1]} : vector<2x96xf32> to vector<2x32xf32>
    %479 = vector.extract_strided_slice %470 {offsets = [0, 96], sizes = [2, 32], strides = [1, 1]} : vector<2x128xf32> to vector<2x32xf32>
    %480 = arith.mulf %477, %463 : vector<2x32xf32>
    %481 = arith.mulf %476, %479 : vector<2x32xf32>
    %482 = arith.addf %480, %481 : vector<2x32xf32>
    %483 = math.tanh %482 : vector<2x32xf32>
    %484 = arith.mulf %478, %483 : vector<2x32xf32>
    %485 = tpu.concatenate %351, %370, %389, %408, %427, %446, %465, %484 in 0 : vector<2x32xf32>, vector<2x32xf32>, vector<2x32xf32>, vector<2x32xf32>, vector<2x32xf32>, vector<2x32xf32>, vector<2x32xf32>, vector<2x32xf32> -> vector<16x32xf32>
    %486 = arith.truncf %485 : vector<16x32xf32> to vector<16x32xbf16>
    %c0_99 = arith.constant 0 : index
    %c0_100 = arith.constant 0 : index
    %487 = vector.load %arg11[%c0_99, %c0_100] : memref<32x128xbf16, #tpu.memory_space<vmem>>, vector<32x128xbf16>
    %cst_101 = arith.constant dense<0.000000e+00> : vector<16x128xf32>
    %488 = tpu.matmul %486, %487, %cst_101 {dimension_numbers = #tpu.dot_dimension_numbers<[1], [0], [0], [1], [0, 0, 1, 1], [], []>} : vector<16x32xbf16>, vector<32x128xbf16>, vector<16x128xf32> -> vector<16x128xf32>
    %c0_102 = arith.constant 0 : index
    %c0_103 = arith.constant 0 : index
    %489 = vector.load %arg13[%c0_102, %c0_103] : memref<1x128xf32, #tpu.memory_space<vmem>>, vector<1x128xf32>
    %490 = vector.broadcast %489 : vector<1x128xf32> to vector<16x128xf32>
    %491 = arith.addf %488, %490 : vector<16x128xf32>
    %c0_104 = arith.constant 0 : index
    %c0_105 = arith.constant 0 : index
    %492 = vector.load %arg12[%c0_104, %c0_105] : memref<32x128xbf16, #tpu.memory_space<vmem>>, vector<32x128xbf16>
    %cst_106 = arith.constant 0.000000e+00 : f32
    %493 = vector.broadcast %cst_106 : f32 to vector<2x32xf32>
    %cst_107 = arith.constant 0.000000e+00 : f32
    %494 = vector.broadcast %cst_107 : f32 to vector<2x32xf32>
    %495 = vector.extract_strided_slice %491 {offsets = [0, 0], sizes = [2, 128], strides = [1, 1]} : vector<16x128xf32> to vector<2x128xf32>
    %496 = arith.truncf %493 : vector<2x32xf32> to vector<2x32xbf16>
    %cst_108 = arith.constant dense<0.000000e+00> : vector<2x128xf32>
    %497 = tpu.matmul %496, %492, %cst_108 {dimension_numbers = #tpu.dot_dimension_numbers<[1], [0], [0], [1], [0, 0, 1, 1], [], []>} : vector<2x32xbf16>, vector<32x128xbf16>, vector<2x128xf32> -> vector<2x128xf32>
    %498 = arith.addf %495, %497 : vector<2x128xf32>
    %499 = math.tanh %498 : vector<2x128xf32>
    %500 = vector.extract_strided_slice %499 {offsets = [0, 0], sizes = [2, 96], strides = [1, 1]} : vector<2x128xf32> to vector<2x96xf32>
    %cst_109 = arith.constant 5.000000e-01 : f32
    %501 = vector.broadcast %cst_109 : f32 to vector<2x96xf32>
    %502 = arith.mulf %501, %500 : vector<2x96xf32>
    %cst_110 = arith.constant 5.000000e-01 : f32
    %503 = vector.broadcast %cst_110 : f32 to vector<2x96xf32>
    %504 = arith.addf %502, %503 : vector<2x96xf32>
    %505 = vector.extract_strided_slice %504 {offsets = [0, 0], sizes = [2, 32], strides = [1, 1]} : vector<2x96xf32> to vector<2x32xf32>
    %506 = vector.extract_strided_slice %504 {offsets = [0, 32], sizes = [2, 32], strides = [1, 1]} : vector<2x96xf32> to vector<2x32xf32>
    %507 = vector.extract_strided_slice %504 {offsets = [0, 64], sizes = [2, 32], strides = [1, 1]} : vector<2x96xf32> to vector<2x32xf32>
    %508 = vector.extract_strided_slice %499 {offsets = [0, 96], sizes = [2, 32], strides = [1, 1]} : vector<2x128xf32> to vector<2x32xf32>
    %509 = arith.mulf %506, %494 : vector<2x32xf32>
    %510 = arith.mulf %505, %508 : vector<2x32xf32>
    %511 = arith.addf %509, %510 : vector<2x32xf32>
    %512 = math.tanh %511 : vector<2x32xf32>
    %513 = arith.mulf %507, %512 : vector<2x32xf32>
    %514 = vector.extract_strided_slice %491 {offsets = [2, 0], sizes = [2, 128], strides = [1, 1]} : vector<16x128xf32> to vector<2x128xf32>
    %515 = arith.truncf %513 : vector<2x32xf32> to vector<2x32xbf16>
    %cst_111 = arith.constant dense<0.000000e+00> : vector<2x128xf32>
    %516 = tpu.matmul %515, %492, %cst_111 {dimension_numbers = #tpu.dot_dimension_numbers<[1], [0], [0], [1], [0, 0, 1, 1], [], []>} : vector<2x32xbf16>, vector<32x128xbf16>, vector<2x128xf32> -> vector<2x128xf32>
    %517 = arith.addf %514, %516 : vector<2x128xf32>
    %518 = math.tanh %517 : vector<2x128xf32>
    %519 = vector.extract_strided_slice %518 {offsets = [0, 0], sizes = [2, 96], strides = [1, 1]} : vector<2x128xf32> to vector<2x96xf32>
    %cst_112 = arith.constant 5.000000e-01 : f32
    %520 = vector.broadcast %cst_112 : f32 to vector<2x96xf32>
    %521 = arith.mulf %520, %519 : vector<2x96xf32>
    %cst_113 = arith.constant 5.000000e-01 : f32
    %522 = vector.broadcast %cst_113 : f32 to vector<2x96xf32>
    %523 = arith.addf %521, %522 : vector<2x96xf32>
    %524 = vector.extract_strided_slice %523 {offsets = [0, 0], sizes = [2, 32], strides = [1, 1]} : vector<2x96xf32> to vector<2x32xf32>
    %525 = vector.extract_strided_slice %523 {offsets = [0, 32], sizes = [2, 32], strides = [1, 1]} : vector<2x96xf32> to vector<2x32xf32>
    %526 = vector.extract_strided_slice %523 {offsets = [0, 64], sizes = [2, 32], strides = [1, 1]} : vector<2x96xf32> to vector<2x32xf32>
    %527 = vector.extract_strided_slice %518 {offsets = [0, 96], sizes = [2, 32], strides = [1, 1]} : vector<2x128xf32> to vector<2x32xf32>
    %528 = arith.mulf %525, %511 : vector<2x32xf32>
    %529 = arith.mulf %524, %527 : vector<2x32xf32>
    %530 = arith.addf %528, %529 : vector<2x32xf32>
    %531 = math.tanh %530 : vector<2x32xf32>
    %532 = arith.mulf %526, %531 : vector<2x32xf32>
    %533 = vector.extract_strided_slice %491 {offsets = [4, 0], sizes = [2, 128], strides = [1, 1]} : vector<16x128xf32> to vector<2x128xf32>
    %534 = arith.truncf %532 : vector<2x32xf32> to vector<2x32xbf16>
    %cst_114 = arith.constant dense<0.000000e+00> : vector<2x128xf32>
    %535 = tpu.matmul %534, %492, %cst_114 {dimension_numbers = #tpu.dot_dimension_numbers<[1], [0], [0], [1], [0, 0, 1, 1], [], []>} : vector<2x32xbf16>, vector<32x128xbf16>, vector<2x128xf32> -> vector<2x128xf32>
    %536 = arith.addf %533, %535 : vector<2x128xf32>
    %537 = math.tanh %536 : vector<2x128xf32>
    %538 = vector.extract_strided_slice %537 {offsets = [0, 0], sizes = [2, 96], strides = [1, 1]} : vector<2x128xf32> to vector<2x96xf32>
    %cst_115 = arith.constant 5.000000e-01 : f32
    %539 = vector.broadcast %cst_115 : f32 to vector<2x96xf32>
    %540 = arith.mulf %539, %538 : vector<2x96xf32>
    %cst_116 = arith.constant 5.000000e-01 : f32
    %541 = vector.broadcast %cst_116 : f32 to vector<2x96xf32>
    %542 = arith.addf %540, %541 : vector<2x96xf32>
    %543 = vector.extract_strided_slice %542 {offsets = [0, 0], sizes = [2, 32], strides = [1, 1]} : vector<2x96xf32> to vector<2x32xf32>
    %544 = vector.extract_strided_slice %542 {offsets = [0, 32], sizes = [2, 32], strides = [1, 1]} : vector<2x96xf32> to vector<2x32xf32>
    %545 = vector.extract_strided_slice %542 {offsets = [0, 64], sizes = [2, 32], strides = [1, 1]} : vector<2x96xf32> to vector<2x32xf32>
    %546 = vector.extract_strided_slice %537 {offsets = [0, 96], sizes = [2, 32], strides = [1, 1]} : vector<2x128xf32> to vector<2x32xf32>
    %547 = arith.mulf %544, %530 : vector<2x32xf32>
    %548 = arith.mulf %543, %546 : vector<2x32xf32>
    %549 = arith.addf %547, %548 : vector<2x32xf32>
    %550 = math.tanh %549 : vector<2x32xf32>
    %551 = arith.mulf %545, %550 : vector<2x32xf32>
    %552 = vector.extract_strided_slice %491 {offsets = [6, 0], sizes = [2, 128], strides = [1, 1]} : vector<16x128xf32> to vector<2x128xf32>
    %553 = arith.truncf %551 : vector<2x32xf32> to vector<2x32xbf16>
    %cst_117 = arith.constant dense<0.000000e+00> : vector<2x128xf32>
    %554 = tpu.matmul %553, %492, %cst_117 {dimension_numbers = #tpu.dot_dimension_numbers<[1], [0], [0], [1], [0, 0, 1, 1], [], []>} : vector<2x32xbf16>, vector<32x128xbf16>, vector<2x128xf32> -> vector<2x128xf32>
    %555 = arith.addf %552, %554 : vector<2x128xf32>
    %556 = math.tanh %555 : vector<2x128xf32>
    %557 = vector.extract_strided_slice %556 {offsets = [0, 0], sizes = [2, 96], strides = [1, 1]} : vector<2x128xf32> to vector<2x96xf32>
    %cst_118 = arith.constant 5.000000e-01 : f32
    %558 = vector.broadcast %cst_118 : f32 to vector<2x96xf32>
    %559 = arith.mulf %558, %557 : vector<2x96xf32>
    %cst_119 = arith.constant 5.000000e-01 : f32
    %560 = vector.broadcast %cst_119 : f32 to vector<2x96xf32>
    %561 = arith.addf %559, %560 : vector<2x96xf32>
    %562 = vector.extract_strided_slice %561 {offsets = [0, 0], sizes = [2, 32], strides = [1, 1]} : vector<2x96xf32> to vector<2x32xf32>
    %563 = vector.extract_strided_slice %561 {offsets = [0, 32], sizes = [2, 32], strides = [1, 1]} : vector<2x96xf32> to vector<2x32xf32>
    %564 = vector.extract_strided_slice %561 {offsets = [0, 64], sizes = [2, 32], strides = [1, 1]} : vector<2x96xf32> to vector<2x32xf32>
    %565 = vector.extract_strided_slice %556 {offsets = [0, 96], sizes = [2, 32], strides = [1, 1]} : vector<2x128xf32> to vector<2x32xf32>
    %566 = arith.mulf %563, %549 : vector<2x32xf32>
    %567 = arith.mulf %562, %565 : vector<2x32xf32>
    %568 = arith.addf %566, %567 : vector<2x32xf32>
    %569 = math.tanh %568 : vector<2x32xf32>
    %570 = arith.mulf %564, %569 : vector<2x32xf32>
    %571 = vector.extract_strided_slice %491 {offsets = [8, 0], sizes = [2, 128], strides = [1, 1]} : vector<16x128xf32> to vector<2x128xf32>
    %572 = arith.truncf %570 : vector<2x32xf32> to vector<2x32xbf16>
    %cst_120 = arith.constant dense<0.000000e+00> : vector<2x128xf32>
    %573 = tpu.matmul %572, %492, %cst_120 {dimension_numbers = #tpu.dot_dimension_numbers<[1], [0], [0], [1], [0, 0, 1, 1], [], []>} : vector<2x32xbf16>, vector<32x128xbf16>, vector<2x128xf32> -> vector<2x128xf32>
    %574 = arith.addf %571, %573 : vector<2x128xf32>
    %575 = math.tanh %574 : vector<2x128xf32>
    %576 = vector.extract_strided_slice %575 {offsets = [0, 0], sizes = [2, 96], strides = [1, 1]} : vector<2x128xf32> to vector<2x96xf32>
    %cst_121 = arith.constant 5.000000e-01 : f32
    %577 = vector.broadcast %cst_121 : f32 to vector<2x96xf32>
    %578 = arith.mulf %577, %576 : vector<2x96xf32>
    %cst_122 = arith.constant 5.000000e-01 : f32
    %579 = vector.broadcast %cst_122 : f32 to vector<2x96xf32>
    %580 = arith.addf %578, %579 : vector<2x96xf32>
    %581 = vector.extract_strided_slice %580 {offsets = [0, 0], sizes = [2, 32], strides = [1, 1]} : vector<2x96xf32> to vector<2x32xf32>
    %582 = vector.extract_strided_slice %580 {offsets = [0, 32], sizes = [2, 32], strides = [1, 1]} : vector<2x96xf32> to vector<2x32xf32>
    %583 = vector.extract_strided_slice %580 {offsets = [0, 64], sizes = [2, 32], strides = [1, 1]} : vector<2x96xf32> to vector<2x32xf32>
    %584 = vector.extract_strided_slice %575 {offsets = [0, 96], sizes = [2, 32], strides = [1, 1]} : vector<2x128xf32> to vector<2x32xf32>
    %585 = arith.mulf %582, %568 : vector<2x32xf32>
    %586 = arith.mulf %581, %584 : vector<2x32xf32>
    %587 = arith.addf %585, %586 : vector<2x32xf32>
    %588 = math.tanh %587 : vector<2x32xf32>
    %589 = arith.mulf %583, %588 : vector<2x32xf32>
    %590 = vector.extract_strided_slice %491 {offsets = [10, 0], sizes = [2, 128], strides = [1, 1]} : vector<16x128xf32> to vector<2x128xf32>
    %591 = arith.truncf %589 : vector<2x32xf32> to vector<2x32xbf16>
    %cst_123 = arith.constant dense<0.000000e+00> : vector<2x128xf32>
    %592 = tpu.matmul %591, %492, %cst_123 {dimension_numbers = #tpu.dot_dimension_numbers<[1], [0], [0], [1], [0, 0, 1, 1], [], []>} : vector<2x32xbf16>, vector<32x128xbf16>, vector<2x128xf32> -> vector<2x128xf32>
    %593 = arith.addf %590, %592 : vector<2x128xf32>
    %594 = math.tanh %593 : vector<2x128xf32>
    %595 = vector.extract_strided_slice %594 {offsets = [0, 0], sizes = [2, 96], strides = [1, 1]} : vector<2x128xf32> to vector<2x96xf32>
    %cst_124 = arith.constant 5.000000e-01 : f32
    %596 = vector.broadcast %cst_124 : f32 to vector<2x96xf32>
    %597 = arith.mulf %596, %595 : vector<2x96xf32>
    %cst_125 = arith.constant 5.000000e-01 : f32
    %598 = vector.broadcast %cst_125 : f32 to vector<2x96xf32>
    %599 = arith.addf %597, %598 : vector<2x96xf32>
    %600 = vector.extract_strided_slice %599 {offsets = [0, 0], sizes = [2, 32], strides = [1, 1]} : vector<2x96xf32> to vector<2x32xf32>
    %601 = vector.extract_strided_slice %599 {offsets = [0, 32], sizes = [2, 32], strides = [1, 1]} : vector<2x96xf32> to vector<2x32xf32>
    %602 = vector.extract_strided_slice %599 {offsets = [0, 64], sizes = [2, 32], strides = [1, 1]} : vector<2x96xf32> to vector<2x32xf32>
    %603 = vector.extract_strided_slice %594 {offsets = [0, 96], sizes = [2, 32], strides = [1, 1]} : vector<2x128xf32> to vector<2x32xf32>
    %604 = arith.mulf %601, %587 : vector<2x32xf32>
    %605 = arith.mulf %600, %603 : vector<2x32xf32>
    %606 = arith.addf %604, %605 : vector<2x32xf32>
    %607 = math.tanh %606 : vector<2x32xf32>
    %608 = arith.mulf %602, %607 : vector<2x32xf32>
    %609 = vector.extract_strided_slice %491 {offsets = [12, 0], sizes = [2, 128], strides = [1, 1]} : vector<16x128xf32> to vector<2x128xf32>
    %610 = arith.truncf %608 : vector<2x32xf32> to vector<2x32xbf16>
    %cst_126 = arith.constant dense<0.000000e+00> : vector<2x128xf32>
    %611 = tpu.matmul %610, %492, %cst_126 {dimension_numbers = #tpu.dot_dimension_numbers<[1], [0], [0], [1], [0, 0, 1, 1], [], []>} : vector<2x32xbf16>, vector<32x128xbf16>, vector<2x128xf32> -> vector<2x128xf32>
    %612 = arith.addf %609, %611 : vector<2x128xf32>
    %613 = math.tanh %612 : vector<2x128xf32>
    %614 = vector.extract_strided_slice %613 {offsets = [0, 0], sizes = [2, 96], strides = [1, 1]} : vector<2x128xf32> to vector<2x96xf32>
    %cst_127 = arith.constant 5.000000e-01 : f32
    %615 = vector.broadcast %cst_127 : f32 to vector<2x96xf32>
    %616 = arith.mulf %615, %614 : vector<2x96xf32>
    %cst_128 = arith.constant 5.000000e-01 : f32
    %617 = vector.broadcast %cst_128 : f32 to vector<2x96xf32>
    %618 = arith.addf %616, %617 : vector<2x96xf32>
    %619 = vector.extract_strided_slice %618 {offsets = [0, 0], sizes = [2, 32], strides = [1, 1]} : vector<2x96xf32> to vector<2x32xf32>
    %620 = vector.extract_strided_slice %618 {offsets = [0, 32], sizes = [2, 32], strides = [1, 1]} : vector<2x96xf32> to vector<2x32xf32>
    %621 = vector.extract_strided_slice %618 {offsets = [0, 64], sizes = [2, 32], strides = [1, 1]} : vector<2x96xf32> to vector<2x32xf32>
    %622 = vector.extract_strided_slice %613 {offsets = [0, 96], sizes = [2, 32], strides = [1, 1]} : vector<2x128xf32> to vector<2x32xf32>
    %623 = arith.mulf %620, %606 : vector<2x32xf32>
    %624 = arith.mulf %619, %622 : vector<2x32xf32>
    %625 = arith.addf %623, %624 : vector<2x32xf32>
    %626 = math.tanh %625 : vector<2x32xf32>
    %627 = arith.mulf %621, %626 : vector<2x32xf32>
    %628 = vector.extract_strided_slice %491 {offsets = [14, 0], sizes = [2, 128], strides = [1, 1]} : vector<16x128xf32> to vector<2x128xf32>
    %629 = arith.truncf %627 : vector<2x32xf32> to vector<2x32xbf16>
    %cst_129 = arith.constant dense<0.000000e+00> : vector<2x128xf32>
    %630 = tpu.matmul %629, %492, %cst_129 {dimension_numbers = #tpu.dot_dimension_numbers<[1], [0], [0], [1], [0, 0, 1, 1], [], []>} : vector<2x32xbf16>, vector<32x128xbf16>, vector<2x128xf32> -> vector<2x128xf32>
    %631 = arith.addf %628, %630 : vector<2x128xf32>
    %632 = math.tanh %631 : vector<2x128xf32>
    %633 = vector.extract_strided_slice %632 {offsets = [0, 0], sizes = [2, 96], strides = [1, 1]} : vector<2x128xf32> to vector<2x96xf32>
    %cst_130 = arith.constant 5.000000e-01 : f32
    %634 = vector.broadcast %cst_130 : f32 to vector<2x96xf32>
    %635 = arith.mulf %634, %633 : vector<2x96xf32>
    %cst_131 = arith.constant 5.000000e-01 : f32
    %636 = vector.broadcast %cst_131 : f32 to vector<2x96xf32>
    %637 = arith.addf %635, %636 : vector<2x96xf32>
    %638 = vector.extract_strided_slice %637 {offsets = [0, 0], sizes = [2, 32], strides = [1, 1]} : vector<2x96xf32> to vector<2x32xf32>
    %639 = vector.extract_strided_slice %637 {offsets = [0, 32], sizes = [2, 32], strides = [1, 1]} : vector<2x96xf32> to vector<2x32xf32>
    %640 = vector.extract_strided_slice %637 {offsets = [0, 64], sizes = [2, 32], strides = [1, 1]} : vector<2x96xf32> to vector<2x32xf32>
    %641 = vector.extract_strided_slice %632 {offsets = [0, 96], sizes = [2, 32], strides = [1, 1]} : vector<2x128xf32> to vector<2x32xf32>
    %642 = arith.mulf %639, %625 : vector<2x32xf32>
    %643 = arith.mulf %638, %641 : vector<2x32xf32>
    %644 = arith.addf %642, %643 : vector<2x32xf32>
    %645 = math.tanh %644 : vector<2x32xf32>
    %646 = arith.mulf %640, %645 : vector<2x32xf32>
    %647 = arith.truncf %646 : vector<2x32xf32> to vector<2x32xbf16>
    %c0_132 = arith.constant 0 : index
    %c0_133 = arith.constant 0 : index
    %648 = vector.load %arg14[%c0_132, %c0_133] : memref<32x8xbf16, #tpu.memory_space<vmem>>, vector<32x8xbf16>
    %cst_134 = arith.constant dense<0.000000e+00> : vector<2x8xf32>
    %649 = tpu.matmul %647, %648, %cst_134 {dimension_numbers = #tpu.dot_dimension_numbers<[1], [0], [0], [1], [0, 0, 1, 1], [], []>} : vector<2x32xbf16>, vector<32x8xbf16>, vector<2x8xf32> -> vector<2x8xf32>
    %c0_135 = arith.constant 0 : index
    %c0_136 = arith.constant 0 : index
    %650 = vector.load %arg15[%c0_135, %c0_136] : memref<1x8xf32, #tpu.memory_space<vmem>>, vector<1x8xf32>
    %651 = vector.broadcast %650 : vector<1x8xf32> to vector<2x8xf32>
    %652 = arith.addf %649, %651 : vector<2x8xf32>
    %c0_137 = arith.constant 0 : index
    %c0_138 = arith.constant 0 : index
    %653 = vector.load %arg16[%c0_137, %c0_138] : memref<2x8xf32, #tpu.memory_space<vmem>>, vector<2x8xf32>
    tpu.vector_store %arg16[%c0_137, %c0_138], %652 {strides = array<i32>} : memref<2x8xf32, #tpu.memory_space<vmem>>, vector<2x8xf32>,
    return
  }
  func.func @transform_0(%arg0: i32) -> (i32, i32) {
    %c0_i32 = arith.constant 0 : i32
    %c0_i32_0 = arith.constant 0 : i32
    %c0_i32_1 = arith.constant 0 : i32
    return %c0_i32, %c0_i32_0 : i32, i32
  }
  func.func @transform_1(%arg0: i32) -> (i32, i32) {
    %c0_i32 = arith.constant 0 : i32
    %c0_i32_0 = arith.constant 0 : i32
    %c0_i32_1 = arith.constant 0 : i32
    return %c0_i32, %c0_i32_0 : i32, i32
  }
  func.func @transform_2(%arg0: i32) -> (i32, i32) {
    %c0_i32 = arith.constant 0 : i32
    %c0_i32_0 = arith.constant 0 : i32
    %c0_i32_1 = arith.constant 0 : i32
    return %c0_i32, %c0_i32_0 : i32, i32
  }
  func.func @transform_3(%arg0: i32) -> (i32, i32) {
    %c0_i32 = arith.constant 0 : i32
    %c0_i32_0 = arith.constant 0 : i32
    %c0_i32_1 = arith.constant 0 : i32
    return %c0_i32, %c0_i32_0 : i32, i32
  }
  func.func @transform_4(%arg0: i32) -> (i32, i32) {
    %c0_i32 = arith.constant 0 : i32
    %c0_i32_0 = arith.constant 0 : i32
    %c0_i32_1 = arith.constant 0 : i32
    return %c0_i32, %c0_i32_0 : i32, i32
  }
  func.func @transform_5(%arg0: i32) -> (i32, i32) {
    %c0_i32 = arith.constant 0 : i32
    %c0_i32_0 = arith.constant 0 : i32
    %c0_i32_1 = arith.constant 0 : i32
    return %c0_i32, %c0_i32_0 : i32, i32
  }
  func.func @transform_6(%arg0: i32) -> (i32, i32) {
    %c0_i32 = arith.constant 0 : i32
    %c0_i32_0 = arith.constant 0 : i32
    %c0_i32_1 = arith.constant 0 : i32
    return %c0_i32, %c0_i32_0 : i32, i32
  }
  func.func @transform_7(%arg0: i32) -> (i32, i32) {
    %c0_i32 = arith.constant 0 : i32
    %c0_i32_0 = arith.constant 0 : i32
    %c0_i32_1 = arith.constant 0 : i32
    return %c0_i32, %c0_i32_0 : i32, i32
  }
  func.func @transform_8(%arg0: i32) -> (i32, i32) {
    %c0_i32 = arith.constant 0 : i32
    %c0_i32_0 = arith.constant 0 : i32
    %c0_i32_1 = arith.constant 0 : i32
    return %c0_i32, %c0_i32_0 : i32, i32
  }
  func.func @transform_9(%arg0: i32) -> (i32, i32) {
    %c0_i32 = arith.constant 0 : i32
    %c0_i32_0 = arith.constant 0 : i32
    %c0_i32_1 = arith.constant 0 : i32
    return %c0_i32, %c0_i32_0 : i32, i32
  }
  func.func @transform_10(%arg0: i32) -> (i32, i32) {
    %c0_i32 = arith.constant 0 : i32
    %c0_i32_0 = arith.constant 0 : i32
    %c0_i32_1 = arith.constant 0 : i32
    return %c0_i32, %c0_i32_0 : i32, i32
  }
  func.func @transform_11(%arg0: i32) -> (i32, i32) {
    %c0_i32 = arith.constant 0 : i32
    %c0_i32_0 = arith.constant 0 : i32
    %c0_i32_1 = arith.constant 0 : i32
    return %c0_i32, %c0_i32_0 : i32, i32
  }
  func.func @transform_12(%arg0: i32) -> (i32, i32) {
    %c0_i32 = arith.constant 0 : i32
    %c0_i32_0 = arith.constant 0 : i32
    %c0_i32_1 = arith.constant 0 : i32
    return %c0_i32, %c0_i32_0 : i32, i32
  }
  func.func @transform_13(%arg0: i32) -> (i32, i32) {
    %c0_i32 = arith.constant 0 : i32
    %c0_i32_0 = arith.constant 0 : i32
    %c0_i32_1 = arith.constant 0 : i32
    return %c0_i32, %c0_i32_0 : i32, i32
  }
  func.func @transform_14(%arg0: i32) -> (i32, i32) {
    %c0_i32 = arith.constant 0 : i32
    %c0_i32_0 = arith.constant 0 : i32
    %c0_i32_1 = arith.constant 0 : i32
    return %c0_i32, %c0_i32_0 : i32, i32
  }
  func.func @transform_15(%arg0: i32) -> (i32, i32) {
    %c0_i32 = arith.constant 0 : i32
    %c0_i32_0 = arith.constant 0 : i32
    %c0_i32_1 = arith.constant 0 : i32
    return %c0_i32, %c0_i32_0 : i32, i32
  }
}

</mosaic_0001>

<bundles_post_ra>
// kernel: tpu_custom_call.1
= control target key start
LH: loop header
LB: loop body
LE: loop exit
PB: predicated region body
PF: predicated region fallthrough
CT: control target
= control target key end

     0   :  { %20 = vsyncpa [#allocation3], 0  ;;  %s2912_s0 = inlined_call_operand.hbm [shape: bf16[16,64], index: 0, kind: input, shape index: {}]   ;;  %s2913_s1 = inlined_call_operand.hbm [shape: bf16[64,128], index: 1, kind: input, shape index: {}]   ;;  %s2914_s2 = inlined_call_operand.vmem [shape: bf16[32,128], index: 2, kind: input, shape index: {}]   ;;  %s2915_s3 = inlined_call_operand.vmem [shape: f32[1,128], index: 3, kind: input, shape index: {}]   ;;  %s2916_s4 = inlined_call_operand.hbm [shape: bf16[32,128], index: 4, kind: input, shape index: {}]   ;;  %s2917_s5 = inlined_call_operand.hbm [shape: bf16[32,128], index: 5, kind: input, shape index: {}]   ;;  %s2918_s6 = inlined_call_operand.vmem [shape: f32[1,128], index: 6, kind: input, shape index: {}]   ;;  %s2919_s7 = inlined_call_operand.hbm [shape: bf16[32,128], index: 7, kind: input, shape index: {}]   ;;  %s2920_s8 = inlined_call_operand.hbm [shape: bf16[32,128], index: 8, kind: input, shape index: {}]   ;;  %s2921_s9 = inlined_call_operand.vmem [shape: f32[1,128], index: 9, kind: input, shape index: {}]   ;;  %s2922_s10 = inlined_call_operand.hbm [shape: bf16[32,128], index: 10, kind: input, shape index: {}]   ;;  %s2923_s11 = inlined_call_operand.hbm [shape: bf16[32,128], index: 11, kind: input, shape index: {}]   ;;  %s2924_s12 = inlined_call_operand.vmem [shape: f32[1,128], index: 12, kind: input, shape index: {}]   ;;  %s2925_s13 = inlined_call_operand.vmem [shape: bf16[32,8], index: 13, kind: input, shape index: {}]   ;;  %s2926_s14 = inlined_call_operand.vmem [shape: f32[1,8], index: 14, kind: input, shape index: {}]   ;;  %s2927_s15 = inlined_call_operand.hbm [shape: f32[2,8], index: 15, kind: output, shape index: {}]  }
   0x1   :  { %21 = vsyncpa [#allocation6], 0 }
   0x2   :  { %22 = vsyncpa [#allocation9], 0 }
   0x3   :  { %23 = vsyncpa [#allocation12], 0 }
   0x4   :  { %24 = vsyncpa [#allocation15], 0 }
   0x5   :  { %25 = vsyncpa [#allocation4], 0  ;;  %s43_s20 = sshll.u32 %s2913_s1, 4  ;;  %s2486_s21 = smov [#allocation5]   ;;  %s44_s20 = int_to_ptr.hbm [resolvable:$true] %s43_s20 }
   0x6   :  { %s45_s22 = sshll.u32 %s2486_s21, 4  ;;  %s73_s25 = sshll.u32 %s2917_s5, 4  ;;  %s46_s22 = int_to_ptr.vmem [resolvable:$true] %s45_s22  ;;  %s74_s25 = int_to_ptr.hbm [resolvable:$true] %s73_s25 }
   0x7   :  { %s2487_s26 = smov 64   ;;  %s2488_s27 = smov 4  }
   0x8   :  { %51 = dma.hbm_to_vmem [thread:$0]  %s44_s20, 512, %s46_s22, [#allocation6], %s2487_s26, %s2487_s26, %s2488_s27  }
   0x9   :  { %s2489_s28 = smov [#allocation8]   ;;  %s101_s1 = sshll.u32 %s2920_s8, 4  ;;  %s102_s1 = int_to_ptr.hbm [resolvable:$true] %s101_s1 }
   0xa   :  { %s75_s29 = sshll.u32 %s2489_s28, 4  ;;  %s30_s18 = sshll.u32 %s2912_s0, 4  ;;  %s76_s29 = int_to_ptr.vmem [resolvable:$true] %s75_s29  ;;  %s31_s18 = int_to_ptr.hbm [resolvable:$true] %s30_s18 }
   0xb   :  { %81 = dma.hbm_to_vmem [thread:$0]  %s74_s25, 256, %s76_s29, [#allocation9], %s2487_s26, %s2487_s26, %s2488_s27  }
   0xc   :  { %s2490_s19 = smov [#allocation11]   ;;  %s2491_s20 = smov [#allocation2]  }
   0xd   :  { %s103_s21 = sshll.u32 %s2490_s19, 4  ;;  %s32_s8 = sshll.u32 %s2491_s20, 4  ;;  %s104_s21 = int_to_ptr.vmem [resolvable:$true] %s103_s21  ;;  %s33_s8 = int_to_ptr.vmem [resolvable:$true] %s32_s8 }
   0xe   :  { %109 = dma.hbm_to_vmem [thread:$0]  %s102_s1, 256, %s104_s21, [#allocation12], %s2487_s26, %s2487_s26, %s2488_s27  }
   0xf   :  { %s60_s24 = sshll.u32 %s2916_s4, 4  ;;  %s88_s28 = sshll.u32 %s2919_s7, 4  ;;  %s61_s24 = int_to_ptr.hbm [resolvable:$true] %s60_s24  ;;  %s89_s28 = int_to_ptr.hbm [resolvable:$true] %s88_s28 }
  0x10   :  { %38 = dma.hbm_to_vmem [thread:$0]  %s31_s18, 128, %s33_s8, [#allocation3], %s2487_s26, %s2487_s26, %s2488_s27  }
  0x11   :  { %s2492_s29 = smov [#allocation7]   ;;  %s2493_s16 = smov [#allocation10]  }
  0x12   :  { %s62_s30 = sshll.u32 %s2492_s29, 4  ;;  %s90_s4 = sshll.u32 %s2493_s16, 4  ;;  %s63_s30 = int_to_ptr.vmem [resolvable:$true] %s62_s30  ;;  %s91_s4 = int_to_ptr.vmem [resolvable:$true] %s90_s4 }
  0x13   :  { %68 = dma.hbm_to_vmem [thread:$0]  %s61_s24, 256, %s63_s30, [#allocation6], %s2487_s26, %s2487_s26, %s2488_s27  }
  0x14   :  { %s116_s17 = sshll.u32 %s2922_s10, 4  ;;  %s129_s19 = sshll.u32 %s2923_s11, 4  ;;  %s117_s17 = int_to_ptr.hbm [resolvable:$true] %s116_s17  ;;  %s130_s19 = int_to_ptr.hbm [resolvable:$true] %s129_s19 }
  0x15   :  { %96 = dma.hbm_to_vmem [thread:$0]  %s89_s28, 256, %s91_s4, [#allocation9], %s2487_s26, %s2487_s26, %s2488_s27  }
  0x16   :  { %s2494_s21 = smov [#allocation13]   ;;  %s2495_s8 = smov [#allocation14]  }
  0x17   :  { %s118_s20 = sshll.u32 %s2494_s21, 4  ;;  %s131_s10 = sshll.u32 %s2495_s8, 4  ;;  %s119_s20 = int_to_ptr.vmem [resolvable:$true] %s118_s20  ;;  %s132_s10 = int_to_ptr.vmem [resolvable:$true] %s131_s10 }
  0x18   :  { %124 = dma.hbm_to_vmem [thread:$0]  %s117_s17, 256, %s119_s20, [#allocation12], %s2487_s26, %s2487_s26, %s2488_s27  }
  0x19   :  { %137 = dma.hbm_to_vmem [thread:$0]  %s130_s19, 256, %s132_s10, [#allocation15], %s2487_s26, %s2487_s26, %s2488_s27  }
  0x1a   :  { %2474 = dma.done.wait [#allocation3], 128  }
  0x1b   :  { %2475 = vsyncadd [#allocation3], 4294967168 }
  0x1c   :  { %2476 = dma.done.wait [#allocation6], 768  }
  0x1d   :  { %2477 = vsyncadd [#allocation6], 4294966528 }
  0x1e   :  { %2478 = dma.done.wait [#allocation9], 512  }
  0x1f   :  { %2479 = vsyncadd [#allocation9], 4294966784 }
  0x20   :  { %2480 = dma.done.wait [#allocation12], 512  }
  0x21   :  { %2481 = vsyncadd [#allocation12], 4294966784 }
  0x22   :  { %2482 = dma.done.wait [#allocation15], 256  }
  0x23   :  { %2483 = vsyncadd [#allocation15], 4294967040  ;;  %v2095_v0 = vld [vmem:[#allocation5 + $0x18] sm:$0xff]  ;;  %v2097_v1 = vld [vmem:[%s2914_s2 + $0x8] sm:$0xff]  ;;  %v2496_v5 = vmov 0   ;;  %vm220_vm0 = vcmask 523264  }
  0x24   :  { %v2094_v2 = vld [vmem:[#allocation5 + $0x10] sm:$0xff]  ;;  %228 = vmatpush.bf16.msra.mxu0 %v2095_v0  ;;  %264 = vmatpush.bf16.msra.mxu1 %v2097_v1  ;;  %v2096_v3 = vld [vmem:[%s2914_s2] sm:$0xff]  ;;  %v2093_v4 = vld [vmem:[#allocation5 + $0x8] sm:$0xff]  ;;  %s2497_s0 = smov 32   ;;  %vm254_vm1 = vcmask 261120   ;;  %vm623_vm2 = vcmask 1041408  }
  0x25   :  { %305 = vmatpush.bf16.msra.mxu2 %v2097_v1  ;;  %353 = vmatpush.bf16.msra.mxu3 %v2097_v1  ;;  %v2092_v6 = vld [vmem:[#allocation5] sm:$0xff]  ;;  %v2091_v7 = vld [vmem:[#allocation2] sm:$0xff]  ;;  %vm625_vm3 = vcmask 1043456   ;;  %vm627_vm4 = vcmask 1045504   ;;  %s2498_s17 = smov [#allocation16]   ;;  %vm1951_vm5 = vcmask 58368  }
  0x26   :  { %v2637_v9 = vld [vmem:[%s2915_s3] ss:$0 sm:$0xff]  ;;  %s1958_s7 = sshll.u32 %s2498_s17, 4  ;;  %s1959_s7 = int_to_ptr.vmem [resolvable:$true] %s1958_s7 }
  0x28   :  { %229 = vmatpush.bf16.msra.mxu0 %v2094_v2  ;;  %265 = vmatpush.bf16.msra.mxu1 %v2096_v3 }
  0x29   :  { %306 = vmatpush.bf16.msra.mxu2 %v2096_v3  ;;  %354 = vmatpush.bf16.msra.mxu3 %v2096_v3 }
  0x2b   :  { %266 = vmatmul.bf16.vlgmr.msra.gmra.mxu1 %v2496_v5 }
  0x2c   :  { %401 = vmatpush.bf16.msrb.mxu1 %v2097_v1  ;;  %230 = vmatpush.bf16.msra.mxu0 %v2093_v4 }
  0x2d   :  { %449 = vmatpush.bf16.msrb.mxu2 %v2097_v1  ;;  %493 = vmatpush.bf16.msrb.mxu3 %v2097_v1 }
  0x30   :  { %402 = vmatpush.bf16.msrb.mxu1 %v2096_v3  ;;  %231 = vmatpush.bf16.msra.mxu0 %v2092_v6 }
  0x31   :  { %450 = vmatpush.bf16.msrb.mxu2 %v2096_v3  ;;  %494 = vmatpush.bf16.msrb.mxu3 %v2096_v3 }
  0x33   :  { %1994 = vmatmul.msk.bf16.vlgmr.msra.gmra.mxu0 %vm220_vm0, %v2091_v7 }
  0x34   :  { %589 = vmatpush.bf16.msra.mxu1 %v2097_v1  ;;  %541 = vmatpush.bf16.msrb.mxu0 %v2097_v1 }
  0x38   :  { %590 = vmatpush.bf16.msra.mxu1 %v2096_v3  ;;  %542 = vmatpush.bf16.msrb.mxu0 %v2096_v3 }
  0xa8   :  { %v267_v8 = vpop.f32.mrf.mxu1 }
  0xb0   :  { %v233_v10 = vpop.f32.mrf.mxu0  ;;  %v269_v11 = vpop.f32.mrf.mxu1 }
  0xb1   :  { %v2640_v12 = vadd.f32 %v2637_v9, %v233_v10 }
  0xb3   :  { %v271_v13 = vadd.f32 %v267_v8, %v2640_v12 }
  0xb5   :  { %2130 = vtanh.f32 %v271_v13 }
  0xbb   :  { %v2131_v14 = vpop.eup %2130 }
  0xbc   :  { %277 = vrot.lane.b32.xlu0 %v2131_v14, %s2497_s0  ;;  %v273_v15 = vmul.f32 0.5, %v2131_v14 }
  0xbe   :  { %v274_v16 = vadd.f32 0.5, %v273_v15 }
  0xc0   :  { %v275_v19 = vmul.f32 0.0, %v274_v16 }
 0x12e   :  { %v278_v17 = vpop.permute.xlu0 %277 }
 0x12f   :  { %v280_v18 = vmul.f32 %v278_v17, %v274_v16 }
 0x131   :  { %282 = vrot.lane.b32.xlu0 %v280_v18, %s2497_s0 }
 0x1a3   :  { %v283_v20 = vpop.permute.xlu0 %282 }
 0x1a4   :  { %v285_v21 = vadd.f32 %v283_v20, %v275_v19 }
 0x1a6   :  { %2132 = vtanh.f32 %v285_v21  ;;  %v320_v36 = vrot.slane %v285_v21, 6 }
 0x1ac   :  { %v2133_v22 = vpop.eup %2132 }
 0x1ad   :  { %288 = vrot.lane.b32.xlu1 %v2133_v22, %s2497_s0 }
 0x21f   :  { %v289_v23 = vpop.permute.xlu1 %288 }
 0x220   :  { %v291_v24 = vmul.f32 %v289_v23, %v274_v16 }
 0x222   :  { %v292_v25 = vpack.c.bf16 %v291_v24, %v291_v24 }
 0x224   :  { %294 = vrot.lane.b32.xlu1 %v292_v25, %s2487_s26  ;;  %v235_v25 = vpop.f32.mrf.mxu0 }
 0x296   :  { %v295_v26 = vpop.permute.xlu1 %294 }
 0x297   :  { %2003 = vmatmul.msk.bf16.vlgmr.msra.gmra.mxu2 %vm254_vm1, %v295_v26  ;;  %v2672_v26 = vadd.f32 %v2637_v9, %v235_v25 }
 0x31a   :  { %v308_v27 = vpop.f32.mrf.mxu2 }
 0x31b   :  { %v313_v28 = vrot.slane %v308_v27, 6 }
 0x31d   :  { %v315_v29 = vadd.f32 %v313_v28, %v2640_v12 }
 0x31f   :  { %2134 = vtanh.f32 %v315_v29 }
 0x322   :  { %v310_v30 = vpop.f32.mrf.mxu2 }
 0x325   :  { %v2135_v31 = vpop.eup %2134 }
 0x326   :  { %324 = vrot.lane.b32.xlu2 %v2135_v31, %s2497_s0  ;;  %v317_v32 = vmul.f32 0.5, %v2135_v31 }
 0x328   :  { %v318_v33 = vadd.f32 0.5, %v317_v32 }
 0x32a   :  { %v322_v37 = vmul.f32 %v320_v36, %v318_v33 }
 0x380   :  { %v325_v34 = vpop.permute.xlu2 %324 }
 0x381   :  { %v327_v35 = vmul.f32 %v325_v34, %v318_v33 }
 0x383   :  { %329 = vrot.lane.b32.xlu2 %v327_v35, %s2497_s0 }
 0x3dd   :  { %v330_v38 = vpop.permute.xlu2 %329 }
 0x3de   :  { %v332_v39 = vadd.f32 %v330_v38, %v322_v37 }
 0x3e0   :  { %2136 = vtanh.f32 %v332_v39  ;;  %v368_v55 = vrot.slane %v332_v39, 6 }
 0x3e6   :  { %v2137_v40 = vpop.eup %2136 }
 0x3e7   :  { %335 = vrot.lane.b32.xlu0 %v2137_v40, %s2497_s0 }
 0x459   :  { %v336_v41 = vpop.permute.xlu0 %335 }
 0x45a   :  { %v338_v42 = vmul.f32 %v336_v41, %v318_v33 }
 0x45c   :  { %v339_v43 = vpack.c.bf16 %v338_v42, %v338_v42  ;;  %v624_v62 = vsel %vm623_vm2, %v291_v24, %v338_v42 }
 0x45e   :  { %v341_v44 = vrot.slane %v339_v43, 1 }
 0x460   :  { %342 = vrot.lane.b32.xlu1 %v341_v44, %s2487_s26 }
 0x4d2   :  { %v343_v45 = vpop.permute.xlu1 %342 }
 0x4d3   :  { %2004 = vmatmul.msk.bf16.vlgmr.msra.gmra.mxu3 %vm254_vm1, %v343_v45 }
 0x556   :  { %v356_v46 = vpop.f32.mrf.mxu3 }
 0x557   :  { %v361_v47 = vrot.slane %v356_v46, 4 }
 0x559   :  { %v363_v48 = vadd.f32 %v361_v47, %v2640_v12 }
 0x55b   :  { %2138 = vtanh.f32 %v363_v48 }
 0x55e   :  { %v358_v49 = vpop.f32.mrf.mxu3 }
 0x561   :  { %v2139_v50 = vpop.eup %2138 }
 0x562   :  { %372 = vrot.lane.b32.xlu2 %v2139_v50, %s2497_s0  ;;  %v365_v51 = vmul.f32 0.5, %v2139_v50 }
 0x564   :  { %v366_v52 = vadd.f32 0.5, %v365_v51 }
 0x566   :  { %v370_v56 = vmul.f32 %v368_v55, %v366_v52 }
 0x5bc   :  { %v373_v53 = vpop.permute.xlu2 %372 }
 0x5bd   :  { %v375_v54 = vmul.f32 %v373_v53, %v366_v52 }
 0x5bf   :  { %377 = vrot.lane.b32.xlu0 %v375_v54, %s2497_s0 }
 0x631   :  { %v378_v57 = vpop.permute.xlu0 %377 }
 0x632   :  { %v380_v58 = vadd.f32 %v378_v57, %v370_v56 }
 0x634   :  { %2140 = vtanh.f32 %v380_v58  ;;  %v416_v15 = vrot.slane %v380_v58, 6 }
 0x63a   :  { %v2141_v59 = vpop.eup %2140 }
 0x63b   :  { %383 = vrot.lane.b32.xlu1 %v2141_v59, %s2497_s0 }
 0x6ad   :  { %v384_v60 = vpop.permute.xlu1 %383 }
 0x6ae   :  { %v386_v61 = vmul.f32 %v384_v60, %v366_v52 }
 0x6b0   :  { %v387_v63 = vpack.c.bf16 %v386_v61, %v386_v61  ;;  %v626_v0 = vsel %vm625_vm3, %v624_v62, %v386_v61 }
 0x6b2   :  { %v389_v1 = vrot.slane %v387_v63, 2 }
 0x6b4   :  { %390 = vrot.lane.b32.xlu2 %v389_v1, %s2487_s26 }
 0x70e   :  { %v391_v2 = vpop.permute.xlu2 %390 }
 0x70f   :  { %2005 = vmatmul.msk.bf16.vlgmr.msrb.gmra.mxu1 %vm254_vm1, %v391_v2 }
 0x78c   :  { %v404_v3 = vpop.f32.mrf.mxu1 }
 0x78d   :  { %v409_v4 = vrot.slane %v404_v3, 2 }
 0x78f   :  { %v411_v6 = vadd.f32 %v409_v4, %v2640_v12 }
 0x791   :  { %2142 = vtanh.f32 %v411_v6 }
 0x794   :  { %v406_v7 = vpop.f32.mrf.mxu1 }
 0x797   :  { %v2143_v8 = vpop.eup %2142 }
 0x798   :  { %420 = vrot.lane.b32.xlu0 %v2143_v8, %s2497_s0  ;;  %v413_v10 = vmul.f32 0.5, %v2143_v8 }
 0x79a   :  { %v414_v11 = vadd.f32 0.5, %v413_v10 }
 0x79c   :  { %v418_v16 = vmul.f32 %v416_v15, %v414_v11 }
 0x80a   :  { %v421_v13 = vpop.permute.xlu0 %420 }
 0x80b   :  { %v423_v14 = vmul.f32 %v421_v13, %v414_v11 }
 0x80d   :  { %425 = vrot.lane.b32.xlu1 %v423_v14, %s2497_s0 }
 0x87f   :  { %v426_v17 = vpop.permute.xlu1 %425 }
 0x880   :  { %v428_v18 = vadd.f32 %v426_v17, %v418_v16 }
 0x882   :  { %2144 = vtanh.f32 %v428_v18  ;;  %v461_v35 = vrot.slane %v428_v18, 6 }
 0x888   :  { %v2145_v19 = vpop.eup %2144 }
 0x889   :  { %431 = vrot.lane.b32.xlu2 %v2145_v19, %s2497_s0 }
 0x8e3   :  { %v432_v12 = vpop.permute.xlu2 %431 }
 0x8e4   :  { %v434_v20 = vmul.f32 %v432_v12, %v414_v11 }
 0x8e6   :  { %v435_v21 = vpack.c.bf16 %v434_v20, %v434_v20  ;;  %v2667_v22 = vsel %vm627_vm4, %v626_v0, %v434_v20 }
 0x8e8   :  { %v437_v23 = vrot.slane %v435_v21, 3 }
 0x8ea   :  { %438 = vrot.lane.b32.xlu0 %v437_v23, %s2487_s26 }
 0x95c   :  { %v439_v24 = vpop.permute.xlu0 %438 }
 0x95d   :  { %2006 = vmatmul.msk.bf16.vlgmr.msrb.gmra.mxu2 %vm254_vm1, %v439_v24 }
 0x9e0   :  { %v452_v27 = vpop.f32.mrf.mxu2 }
 0x9e1   :  { %v456_v28 = vadd.f32 %v452_v27, %v2672_v26 }
 0x9e3   :  { %2146 = vtanh.f32 %v456_v28 }
 0x9e8   :  { %v454_v29 = vpop.f32.mrf.mxu2 }
 0x9e9   :  { %v2147_v30 = vpop.eup %2146 }
 0x9ea   :  { %465 = vrot.lane.b32.xlu1 %v2147_v30, %s2497_s0  ;;  %v458_v31 = vmul.f32 0.5, %v2147_v30 }
 0x9ec   :  { %v459_v32 = vadd.f32 0.5, %v458_v31 }
 0x9ee   :  { %v463_v36 = vmul.f32 %v461_v35, %v459_v32 }
 0xa5c   :  { %v466_v33 = vpop.permute.xlu1 %465 }
 0xa5d   :  { %v468_v34 = vmul.f32 %v466_v33, %v459_v32 }
 0xa5f   :  { %470 = vrot.lane.b32.xlu2 %v468_v34, %s2497_s0 }
 0xab9   :  { %v471_v37 = vpop.permute.xlu2 %470 }
 0xaba   :  { %v473_v38 = vadd.f32 %v471_v37, %v463_v36  ;;  %v2101_v37 = vld [vmem:[#allocation8 + $0x8] sm:$0xff] }
 0xabb   :  { %695 = vmatpush.bf16.msra.mxu3 %v2101_v37  ;;  %736 = vmatpush.bf16.msra.mxu0 %v2101_v37 }
 0xabc   :  { %2148 = vtanh.f32 %v473_v38  ;;  %v508_v52 = vrot.slane %v473_v38, 6  ;;  %v2100_v38 = vld [vmem:[#allocation8] sm:$0xff]  ;;  %784 = vmatpush.bf16.msrb.mxu1 %v2101_v37 }
 0xabf   :  { %696 = vmatpush.bf16.msra.mxu3 %v2100_v38  ;;  %737 = vmatpush.bf16.msra.mxu0 %v2100_v38 }
 0xac0   :  { %785 = vmatpush.bf16.msrb.mxu1 %v2100_v38 }
 0xac2   :  { %v2149_v9 = vpop.eup %2148 }
 0xac3   :  { %476 = vrot.lane.b32.xlu0 %v2149_v9, %s2497_s0  ;;  %v2098_v9 = vld [vmem:[#allocation7] sm:$0xff] }
 0xb35   :  { %v477_v39 = vpop.permute.xlu0 %476 }
 0xb36   :  { %v479_v40 = vmul.f32 %v477_v39, %v459_v32 }
 0xb38   :  { %v480_v41 = vpack.c.bf16 %v479_v40, %v479_v40 }
 0xb3a   :  { %482 = vrot.lane.b32.xlu1 %v480_v41, %s2487_s26 }
 0xbac   :  { %v483_v42 = vpop.permute.xlu1 %482 }
 0xbad   :  { %2007 = vmatmul.msk.bf16.vlgmr.msrb.gmra.mxu3 %vm254_vm1, %v483_v42 }
 0xbae   :  { %880 = vmatpush.bf16.msrb.mxu3 %v2101_v37 }
 0xbb2   :  { %881 = vmatpush.bf16.msrb.mxu3 %v2100_v38 }
 0xbbd   :  { %697 = vmatmul.bf16.vlgmr.msra.gmra.mxu3 %v2496_v5 }
 0xc30   :  { %v496_v43 = vpop.f32.mrf.mxu3 }
 0xc31   :  { %v501_v44 = vrot.slane %v496_v43, 6 }
 0xc33   :  { %v503_v45 = vadd.f32 %v501_v44, %v2672_v26 }
 0xc35   :  { %2150 = vtanh.f32 %v503_v45 }
 0xc38   :  { %v498_v46 = vpop.f32.mrf.mxu3 }
 0xc39   :  { %v2706_v46 = vld [vmem:[%s2918_s6] ss:$0 sm:$0xff] }
 0xc3b   :  { %v2151_v47 = vpop.eup %2150 }
 0xc3c   :  { %512 = vrot.lane.b32.xlu2 %v2151_v47, %s2497_s0  ;;  %v505_v48 = vmul.f32 0.5, %v2151_v47 }
 0xc3e   :  { %v506_v49 = vadd.f32 0.5, %v505_v48 }
 0xc40   :  { %v510_v53 = vmul.f32 %v508_v52, %v506_v49  ;;  %v698_v43 = vpop.f32.mrf.mxu3 }
 0xc48   :  { %v700_v45 = vpop.f32.mrf.mxu3 }
 0xc96   :  { %v513_v50 = vpop.permute.xlu2 %512 }
 0xc97   :  { %v515_v51 = vmul.f32 %v513_v50, %v506_v49 }
 0xc99   :  { %517 = vrot.lane.b32.xlu0 %v515_v51, %s2497_s0 }
 0xd0b   :  { %v518_v54 = vpop.permute.xlu0 %517 }
 0xd0c   :  { %v520_v55 = vadd.f32 %v518_v54, %v510_v53 }
 0xd0e   :  { %2152 = vtanh.f32 %v520_v55  ;;  %v556_v8 = vrot.slane %v520_v55, 6 }
 0xd14   :  { %v2153_v56 = vpop.eup %2152 }
 0xd15   :  { %523 = vrot.lane.b32.xlu1 %v2153_v56, %s2497_s0 }
 0xd87   :  { %v524_v57 = vpop.permute.xlu1 %523 }
 0xd88   :  { %v526_v58 = vmul.f32 %v524_v57, %v506_v49 }
 0xd8a   :  { %v527_v59 = vpack.c.bf16 %v526_v58, %v526_v58  ;;  %v629_v17 = vsel %vm623_vm2, %v479_v40, %v526_v58 }
 0xd8c   :  { %v529_v60 = vrot.slane %v527_v59, 1 }
 0xd8e   :  { %530 = vrot.lane.b32.xlu2 %v529_v60, %s2487_s26 }
 0xde8   :  { %v531_v61 = vpop.permute.xlu2 %530 }
 0xde9   :  { %2008 = vmatmul.msk.bf16.vlgmr.msrb.gmra.mxu0 %vm254_vm1, %v531_v61 }
 0xdea   :  { %924 = vmatpush.bf16.msrb.mxu0 %v2101_v37 }
 0xdee   :  { %925 = vmatpush.bf16.msrb.mxu0 %v2100_v38 }
 0xe66   :  { %v544_v62 = vpop.f32.mrf.mxu0 }
 0xe67   :  { %v549_v63 = vrot.slane %v544_v62, 4 }
 0xe69   :  { %v551_v0 = vadd.f32 %v549_v63, %v2672_v26 }
 0xe6b   :  { %2154 = vtanh.f32 %v551_v0 }
 0xe6e   :  { %v546_v1 = vpop.f32.mrf.mxu0 }
 0xe71   :  { %v2155_v2 = vpop.eup %2154 }
 0xe72   :  { %560 = vrot.lane.b32.xlu0 %v2155_v2, %s2497_s0  ;;  %v553_v3 = vmul.f32 0.5, %v2155_v2 }
 0xe74   :  { %v554_v4 = vadd.f32 0.5, %v553_v3 }
 0xe76   :  { %v558_v10 = vmul.f32 %v556_v8, %v554_v4 }
 0xee4   :  { %v561_v6 = vpop.permute.xlu0 %560 }
 0xee5   :  { %v563_v7 = vmul.f32 %v561_v6, %v554_v4 }
 0xee7   :  { %565 = vrot.lane.b32.xlu1 %v563_v7, %s2497_s0 }
 0xf59   :  { %v566_v11 = vpop.permute.xlu1 %565 }
 0xf5a   :  { %v568_v13 = vadd.f32 %v566_v11, %v558_v10 }
 0xf5c   :  { %2156 = vtanh.f32 %v568_v13  ;;  %v604_v32 = vrot.slane %v568_v13, 6 }
 0xf62   :  { %v2157_v14 = vpop.eup %2156 }
 0xf63   :  { %571 = vrot.lane.b32.xlu2 %v2157_v14, %s2497_s0 }
 0xfbd   :  { %v572_v15 = vpop.permute.xlu2 %571 }
 0xfbe   :  { %v574_v16 = vmul.f32 %v572_v15, %v554_v4 }
 0xfc0   :  { %v575_v18 = vpack.c.bf16 %v574_v16, %v574_v16  ;;  %v630_v19 = vsel %vm625_vm3, %v629_v17, %v574_v16 }
 0xfc2   :  { %v577_v12 = vrot.slane %v575_v18, 2 }
 0xfc4   :  { %578 = vrot.lane.b32.xlu0 %v577_v12, %s2487_s26 }
0x1036   :  { %v579_v20 = vpop.permute.xlu0 %578 }
0x1037   :  { %2009 = vmatmul.msk.bf16.vlgmr.msra.gmra.mxu1 %vm254_vm1, %v579_v20 }
0x1038   :  { %972 = vmatpush.bf16.msra.mxu1 %v2101_v37 }
0x103c   :  { %973 = vmatpush.bf16.msra.mxu1 %v2100_v38 }
0x10b4   :  { %v592_v21 = vpop.f32.mrf.mxu1 }
0x10b5   :  { %v597_v23 = vrot.slane %v592_v21, 2 }
0x10b7   :  { %v599_v24 = vadd.f32 %v597_v23, %v2672_v26  ;;  %v2099_v26 = vld [vmem:[#allocation7 + $0x8] sm:$0xff] }
0x10b8   :  { %665 = vmatpush.bf16.msra.mxu2 %v2099_v26 }
0x10b9   :  { %2158 = vtanh.f32 %v599_v24 }
0x10bc   :  { %v594_v25 = vpop.f32.mrf.mxu1  ;;  %666 = vmatpush.bf16.msra.mxu2 %v2098_v9 }
0x10bf   :  { %v2159_v27 = vpop.eup %2158 }
0x10c0   :  { %608 = vrot.lane.b32.xlu1 %v2159_v27, %s2497_s0  ;;  %v601_v28 = vmul.f32 0.5, %v2159_v27  ;;  %832 = vmatpush.bf16.msrb.mxu2 %v2101_v37 }
0x10c2   :  { %v602_v29 = vadd.f32 0.5, %v601_v28 }
0x10c4   :  { %v606_v33 = vmul.f32 %v604_v32, %v602_v29  ;;  %833 = vmatpush.bf16.msrb.mxu2 %v2100_v38 }
0x1132   :  { %v609_v30 = vpop.permute.xlu1 %608 }
0x1133   :  { %v611_v31 = vmul.f32 %v609_v30, %v602_v29 }
0x1135   :  { %613 = vrot.lane.b32.xlu2 %v611_v31, %s2497_s0 }
0x118f   :  { %v614_v34 = vpop.permute.xlu2 %613 }
0x1190   :  { %v616_v35 = vadd.f32 %v614_v34, %v606_v33 }
0x1192   :  { %2160 = vtanh.f32 %v616_v35 }
0x1198   :  { %v2161_v36 = vpop.eup %2160 }
0x1199   :  { %619 = vrot.lane.b32.xlu0 %v2161_v36, %s2497_s0 }
0x120b   :  { %v620_v39 = vpop.permute.xlu0 %619 }
0x120c   :  { %v622_v40 = vmul.f32 %v620_v39, %v602_v29 }
0x120e   :  { %v631_v41 = vsel %vm627_vm4, %v630_v19, %v622_v40 }
0x120f   :  { %v632_v42 = vpack.c.bf16 %v631_v41, %v2667_v22 }
0x1211   :  { %642 = vrot.lane.b32.xlu1 %v632_v42, %s2487_s26 }
0x1283   :  { %v643_v44 = vpop.permute.xlu1 %642 }
0x1284   :  { %2018 = vmatmul.msk.bf16.vlgmr.msra.gmra.mxu2 %vm254_vm1, %v643_v44 }
0x1285   :  { %1020 = vmatpush.bf16.msra.mxu2 %v2101_v37 }
0x1289   :  { %1021 = vmatpush.bf16.msra.mxu2 %v2100_v38 }
0x1307   :  { %v668_v47 = vpop.f32.mrf.mxu2 }
0x1308   :  { %v2709_v48 = vadd.f32 %v2706_v46, %v668_v47 }
0x130a   :  { %v702_v22 = vadd.f32 %v698_v43, %v2709_v48 }
0x130c   :  { %2162 = vtanh.f32 %v702_v22 }
0x130f   :  { %v670_v40 = vpop.f32.mrf.mxu2 }
0x1312   :  { %v2163_v49 = vpop.eup %2162 }
0x1313   :  { %708 = vrot.lane.b32.xlu2 %v2163_v49, %s2497_s0  ;;  %v704_v50 = vmul.f32 0.5, %v2163_v49 }
0x1315   :  { %v705_v51 = vadd.f32 0.5, %v704_v50 }
0x1317   :  { %v706_v54 = vmul.f32 0.0, %v705_v51 }
0x136d   :  { %v709_v52 = vpop.permute.xlu2 %708 }
0x136e   :  { %v711_v53 = vmul.f32 %v709_v52, %v705_v51 }
0x1370   :  { %713 = vrot.lane.b32.xlu0 %v711_v53, %s2497_s0 }
0x13e2   :  { %v714_v55 = vpop.permute.xlu0 %713 }
0x13e3   :  { %v716_v56 = vadd.f32 %v714_v55, %v706_v54 }
0x13e5   :  { %2164 = vtanh.f32 %v716_v56  ;;  %v751_v8 = vrot.slane %v716_v56, 6 }
0x13eb   :  { %v2165_v57 = vpop.eup %2164 }
0x13ec   :  { %719 = vrot.lane.b32.xlu1 %v2165_v57, %s2497_s0 }
0x145e   :  { %v720_v58 = vpop.permute.xlu1 %719 }
0x145f   :  { %v722_v59 = vmul.f32 %v720_v58, %v705_v51 }
0x1461   :  { %v723_v60 = vpack.c.bf16 %v722_v59, %v722_v59 }
0x1463   :  { %725 = vrot.lane.b32.xlu2 %v723_v60, %s2487_s26 }
0x14bd   :  { %v726_v61 = vpop.permute.xlu2 %725 }
0x14be   :  { %2027 = vmatmul.msk.bf16.vlgmr.msra.gmra.mxu0 %vm254_vm1, %v726_v61  ;;  %v2741_v61 = vadd.f32 %v2706_v46, %v670_v40 }
0x153b   :  { %v739_v62 = vpop.f32.mrf.mxu0 }
0x153c   :  { %v744_v63 = vrot.slane %v739_v62, 6 }
0x153e   :  { %v746_v0 = vadd.f32 %v744_v63, %v2709_v48 }
0x1540   :  { %2166 = vtanh.f32 %v746_v0 }
0x1543   :  { %v741_v1 = vpop.f32.mrf.mxu0 }
0x1546   :  { %v2167_v2 = vpop.eup %2166 }
0x1547   :  { %755 = vrot.lane.b32.xlu0 %v2167_v2, %s2497_s0  ;;  %v748_v3 = vmul.f32 0.5, %v2167_v2 }
0x1549   :  { %v749_v4 = vadd.f32 0.5, %v748_v3 }
0x154b   :  { %v753_v10 = vmul.f32 %v751_v8, %v749_v4 }
0x15b9   :  { %v756_v6 = vpop.permute.xlu0 %755 }
0x15ba   :  { %v758_v7 = vmul.f32 %v756_v6, %v749_v4 }
0x15bc   :  { %760 = vrot.lane.b32.xlu1 %v758_v7, %s2497_s0 }
0x162e   :  { %v761_v11 = vpop.permute.xlu1 %760 }
0x162f   :  { %v763_v13 = vadd.f32 %v761_v11, %v753_v10 }
0x1631   :  { %2168 = vtanh.f32 %v763_v13  ;;  %v799_v30 = vrot.slane %v763_v13, 6 }
0x1637   :  { %v2169_v14 = vpop.eup %2168 }
0x1638   :  { %766 = vrot.lane.b32.xlu2 %v2169_v14, %s2497_s0 }
0x1692   :  { %v767_v15 = vpop.permute.xlu2 %766 }
0x1693   :  { %v769_v16 = vmul.f32 %v767_v15, %v749_v4 }
0x1695   :  { %v770_v17 = vpack.c.bf16 %v769_v16, %v769_v16  ;;  %v1054_v26 = vsel %vm623_vm2, %v722_v59, %v769_v16 }
0x1697   :  { %v772_v18 = vrot.slane %v770_v17, 1 }
0x1699   :  { %773 = vrot.lane.b32.xlu0 %v772_v18, %s2487_s26 }
0x170b   :  { %v774_v19 = vpop.permute.xlu0 %773 }
0x170c   :  { %2028 = vmatmul.msk.bf16.vlgmr.msrb.gmra.mxu1 %vm254_vm1, %v774_v19 }
0x1789   :  { %v787_v12 = vpop.f32.mrf.mxu1 }
0x178a   :  { %v792_v20 = vrot.slane %v787_v12, 4 }
0x178c   :  { %v794_v21 = vadd.f32 %v792_v20, %v2709_v48 }
0x178e   :  { %2170 = vtanh.f32 %v794_v21 }
0x1791   :  { %v789_v23 = vpop.f32.mrf.mxu1 }
0x1794   :  { %v2171_v24 = vpop.eup %2170 }
0x1795   :  { %803 = vrot.lane.b32.xlu1 %v2171_v24, %s2497_s0  ;;  %v796_v25 = vmul.f32 0.5, %v2171_v24 }
0x1797   :  { %v797_v27 = vadd.f32 0.5, %v796_v25 }
0x1799   :  { %v801_v31 = vmul.f32 %v799_v30, %v797_v27 }
0x1807   :  { %v804_v28 = vpop.permute.xlu1 %803 }
0x1808   :  { %v806_v29 = vmul.f32 %v804_v28, %v797_v27 }
0x180a   :  { %808 = vrot.lane.b32.xlu2 %v806_v29, %s2497_s0 }
0x1864   :  { %v809_v32 = vpop.permute.xlu2 %808 }
0x1865   :  { %v811_v33 = vadd.f32 %v809_v32, %v801_v31 }
0x1867   :  { %2172 = vtanh.f32 %v811_v33  ;;  %v847_v51 = vrot.slane %v811_v33, 6 }
0x186d   :  { %v2173_v34 = vpop.eup %2172 }
0x186e   :  { %814 = vrot.lane.b32.xlu0 %v2173_v34, %s2497_s0 }
0x18e0   :  { %v815_v35 = vpop.permute.xlu0 %814 }
0x18e1   :  { %v817_v36 = vmul.f32 %v815_v35, %v797_v27 }
0x18e3   :  { %v818_v37 = vpack.c.bf16 %v817_v36, %v817_v36  ;;  %v1055_v38 = vsel %vm625_vm3, %v1054_v26, %v817_v36 }
0x18e5   :  { %v820_v9 = vrot.slane %v818_v37, 2 }
0x18e7   :  { %821 = vrot.lane.b32.xlu1 %v820_v9, %s2487_s26 }
0x1959   :  { %v822_v39 = vpop.permute.xlu1 %821 }
0x195a   :  { %2029 = vmatmul.msk.bf16.vlgmr.msrb.gmra.mxu2 %vm254_vm1, %v822_v39 }
0x19dd   :  { %v835_v41 = vpop.f32.mrf.mxu2 }
0x19de   :  { %v840_v42 = vrot.slane %v835_v41, 2 }
0x19e0   :  { %v842_v43 = vadd.f32 %v840_v42, %v2709_v48 }
0x19e2   :  { %2174 = vtanh.f32 %v842_v43 }
0x19e5   :  { %v837_v44 = vpop.f32.mrf.mxu2 }
0x19e8   :  { %v2175_v45 = vpop.eup %2174 }
0x19e9   :  { %851 = vrot.lane.b32.xlu2 %v2175_v45, %s2497_s0  ;;  %v844_v47 = vmul.f32 0.5, %v2175_v45 }
0x19eb   :  { %v845_v22 = vadd.f32 0.5, %v844_v47 }
0x19ed   :  { %v849_v52 = vmul.f32 %v847_v51, %v845_v22 }
0x1a43   :  { %v852_v49 = vpop.permute.xlu2 %851 }
0x1a44   :  { %v854_v50 = vmul.f32 %v852_v49, %v845_v22 }
0x1a46   :  { %856 = vrot.lane.b32.xlu0 %v854_v50, %s2497_s0 }
0x1ab8   :  { %v857_v53 = vpop.permute.xlu0 %856 }
0x1ab9   :  { %v859_v54 = vadd.f32 %v857_v53, %v849_v52 }
0x1abb   :  { %2176 = vtanh.f32 %v859_v54  ;;  %v892_v7 = vrot.slane %v859_v54, 6 }
0x1ac1   :  { %v2177_v55 = vpop.eup %2176 }
0x1ac2   :  { %862 = vrot.lane.b32.xlu1 %v2177_v55, %s2497_s0 }
0x1b34   :  { %v863_v48 = vpop.permute.xlu1 %862 }
0x1b35   :  { %v865_v56 = vmul.f32 %v863_v48, %v845_v22 }
0x1b37   :  { %v866_v57 = vpack.c.bf16 %v865_v56, %v865_v56  ;;  %v2736_v58 = vsel %vm627_vm4, %v1055_v38, %v865_v56 }
0x1b39   :  { %v868_v59 = vrot.slane %v866_v57, 3 }
0x1b3b   :  { %869 = vrot.lane.b32.xlu2 %v868_v59, %s2487_s26 }
0x1b95   :  { %v870_v60 = vpop.permute.xlu2 %869 }
0x1b96   :  { %2030 = vmatmul.msk.bf16.vlgmr.msrb.gmra.mxu3 %vm254_vm1, %v870_v60 }
0x1c19   :  { %v883_v62 = vpop.f32.mrf.mxu3 }
0x1c1a   :  { %v887_v63 = vadd.f32 %v883_v62, %v2741_v61 }
0x1c1c   :  { %2178 = vtanh.f32 %v887_v63 }
0x1c21   :  { %v885_v0 = vpop.f32.mrf.mxu3 }
0x1c22   :  { %v2179_v1 = vpop.eup %2178 }
0x1c23   :  { %896 = vrot.lane.b32.xlu0 %v2179_v1, %s2497_s0  ;;  %v889_v2 = vmul.f32 0.5, %v2179_v1 }
0x1c25   :  { %v890_v3 = vadd.f32 0.5, %v889_v2 }
0x1c27   :  { %v894_v8 = vmul.f32 %v892_v7, %v890_v3 }
0x1c95   :  { %v897_v4 = vpop.permute.xlu0 %896 }
0x1c96   :  { %v899_v6 = vmul.f32 %v897_v4, %v890_v3 }
0x1c98   :  { %901 = vrot.lane.b32.xlu1 %v899_v6, %s2497_s0 }
0x1d0a   :  { %v902_v10 = vpop.permute.xlu1 %901 }
0x1d0b   :  { %v904_v11 = vadd.f32 %v902_v10, %v894_v8  ;;  %v2105_v10 = vld [vmem:[#allocation11 + $0x8] sm:$0xff] }
0x1d0c   :  { %1123 = vmatpush.bf16.msra.mxu0 %v2105_v10  ;;  %1164 = vmatpush.bf16.msrb.mxu1 %v2105_v10 }
0x1d0d   :  { %2180 = vtanh.f32 %v904_v11  ;;  %v939_v27 = vrot.slane %v904_v11, 6  ;;  %v2102_v11 = vld [vmem:[#allocation10] sm:$0xff]  ;;  %1212 = vmatpush.bf16.msrb.mxu2 %v2105_v10 }
0x1d13   :  { %v2181_v46 = vpop.eup %2180 }
0x1d14   :  { %907 = vrot.lane.b32.xlu2 %v2181_v46, %s2497_s0  ;;  %v2104_v46 = vld [vmem:[#allocation11] sm:$0xff] }
0x1d15   :  { %1124 = vmatpush.bf16.msra.mxu0 %v2104_v46  ;;  %1165 = vmatpush.bf16.msrb.mxu1 %v2104_v46 }
0x1d16   :  { %1213 = vmatpush.bf16.msrb.mxu2 %v2104_v46 }
0x1d6e   :  { %v908_v13 = vpop.permute.xlu2 %907 }
0x1d6f   :  { %v910_v14 = vmul.f32 %v908_v13, %v890_v3 }
0x1d71   :  { %v911_v15 = vpack.c.bf16 %v910_v14, %v910_v14 }
0x1d73   :  { %913 = vrot.lane.b32.xlu0 %v911_v15, %s2487_s26 }
0x1de5   :  { %v914_v16 = vpop.permute.xlu0 %913 }
0x1de6   :  { %2031 = vmatmul.msk.bf16.vlgmr.msrb.gmra.mxu0 %vm254_vm1, %v914_v16 }
0x1de7   :  { %1308 = vmatpush.bf16.msrb.mxu0 %v2105_v10 }
0x1deb   :  { %1309 = vmatpush.bf16.msrb.mxu0 %v2104_v46 }
0x1df6   :  { %1125 = vmatmul.bf16.vlgmr.msra.gmra.mxu0 %v2496_v5 }
0x1e63   :  { %v927_v17 = vpop.f32.mrf.mxu0 }
0x1e64   :  { %v932_v18 = vrot.slane %v927_v17, 6 }
0x1e66   :  { %v934_v19 = vadd.f32 %v932_v18, %v2741_v61 }
0x1e68   :  { %2182 = vtanh.f32 %v934_v19 }
0x1e6b   :  { %v929_v12 = vpop.f32.mrf.mxu0 }
0x1e6c   :  { %v2775_v12 = vld [vmem:[%s2921_s9] ss:$0 sm:$0xff] }
0x1e6e   :  { %v2183_v20 = vpop.eup %2182 }
0x1e6f   :  { %943 = vrot.lane.b32.xlu1 %v2183_v20, %s2497_s0  ;;  %v936_v21 = vmul.f32 0.5, %v2183_v20 }
0x1e71   :  { %v937_v23 = vadd.f32 0.5, %v936_v21 }
0x1e73   :  { %v941_v28 = vmul.f32 %v939_v27, %v937_v23  ;;  %v1126_v17 = vpop.f32.mrf.mxu0 }
0x1e7b   :  { %v1128_v18 = vpop.f32.mrf.mxu0 }
0x1ee1   :  { %v944_v24 = vpop.permute.xlu1 %943 }
0x1ee2   :  { %v946_v25 = vmul.f32 %v944_v24, %v937_v23 }
0x1ee4   :  { %948 = vrot.lane.b32.xlu2 %v946_v25, %s2497_s0 }
0x1f3e   :  { %v949_v29 = vpop.permute.xlu2 %948 }
0x1f3f   :  { %v951_v30 = vadd.f32 %v949_v29, %v941_v28 }
0x1f41   :  { %2184 = vtanh.f32 %v951_v30  ;;  %v987_v44 = vrot.slane %v951_v30, 6 }
0x1f47   :  { %v2185_v31 = vpop.eup %2184 }
0x1f48   :  { %954 = vrot.lane.b32.xlu0 %v2185_v31, %s2497_s0 }
0x1fba   :  { %v955_v32 = vpop.permute.xlu0 %954 }
0x1fbb   :  { %v957_v33 = vmul.f32 %v955_v32, %v937_v23 }
0x1fbd   :  { %v958_v34 = vpack.c.bf16 %v957_v33, %v957_v33  ;;  %v1057_v52 = vsel %vm623_vm2, %v910_v14, %v957_v33 }
0x1fbf   :  { %v960_v35 = vrot.slane %v958_v34, 1 }
0x1fc1   :  { %961 = vrot.lane.b32.xlu1 %v960_v35, %s2487_s26 }
0x2033   :  { %v962_v36 = vpop.permute.xlu1 %961 }
0x2034   :  { %2032 = vmatmul.msk.bf16.vlgmr.msra.gmra.mxu1 %vm254_vm1, %v962_v36 }
0x2035   :  { %1352 = vmatpush.bf16.msra.mxu1 %v2105_v10 }
0x2039   :  { %1353 = vmatpush.bf16.msra.mxu1 %v2104_v46 }
0x20b1   :  { %v975_v26 = vpop.f32.mrf.mxu1 }
0x20b2   :  { %v980_v37 = vrot.slane %v975_v26, 4 }
0x20b4   :  { %v982_v38 = vadd.f32 %v980_v37, %v2741_v61 }
0x20b6   :  { %2186 = vtanh.f32 %v982_v38 }
0x20b9   :  { %v977_v9 = vpop.f32.mrf.mxu1 }
0x20bc   :  { %v2187_v39 = vpop.eup %2186 }
0x20bd   :  { %991 = vrot.lane.b32.xlu2 %v2187_v39, %s2497_s0  ;;  %v984_v40 = vmul.f32 0.5, %v2187_v39 }
0x20bf   :  { %v985_v41 = vadd.f32 0.5, %v984_v40 }
0x20c1   :  { %v989_v45 = vmul.f32 %v987_v44, %v985_v41 }
0x2117   :  { %v992_v42 = vpop.permute.xlu2 %991 }
0x2118   :  { %v994_v43 = vmul.f32 %v992_v42, %v985_v41 }
0x211a   :  { %996 = vrot.lane.b32.xlu0 %v994_v43, %s2497_s0 }
0x218c   :  { %v997_v47 = vpop.permute.xlu0 %996 }
0x218d   :  { %v999_v22 = vadd.f32 %v997_v47, %v989_v45 }
0x218f   :  { %2188 = vtanh.f32 %v999_v22  ;;  %v1035_v3 = vrot.slane %v999_v22, 6 }
0x2195   :  { %v2189_v49 = vpop.eup %2188 }
0x2196   :  { %1002 = vrot.lane.b32.xlu1 %v2189_v49, %s2497_s0 }
0x2208   :  { %v1003_v50 = vpop.permute.xlu1 %1002 }
0x2209   :  { %v1005_v51 = vmul.f32 %v1003_v50, %v985_v41 }
0x220b   :  { %v1006_v53 = vpack.c.bf16 %v1005_v51, %v1005_v51  ;;  %v1058_v54 = vsel %vm625_vm3, %v1057_v52, %v1005_v51 }
0x220d   :  { %v1008_v55 = vrot.slane %v1006_v53, 2 }
0x220f   :  { %1009 = vrot.lane.b32.xlu2 %v1008_v55, %s2487_s26 }
0x2269   :  { %v1010_v48 = vpop.permute.xlu2 %1009 }
0x226a   :  { %2033 = vmatmul.msk.bf16.vlgmr.msra.gmra.mxu2 %vm254_vm1, %v1010_v48 }
0x226b   :  { %1400 = vmatpush.bf16.msra.mxu2 %v2105_v10 }
0x226f   :  { %1401 = vmatpush.bf16.msra.mxu2 %v2104_v46 }
0x22ed   :  { %v1023_v56 = vpop.f32.mrf.mxu2 }
0x22ee   :  { %v1028_v57 = vrot.slane %v1023_v56, 2 }
0x22f0   :  { %v1030_v59 = vadd.f32 %v1028_v57, %v2741_v61  ;;  %v2103_v61 = vld [vmem:[#allocation10 + $0x8] sm:$0xff] }
0x22f1   :  { %1093 = vmatpush.bf16.msra.mxu3 %v2103_v61 }
0x22f2   :  { %2190 = vtanh.f32 %v1030_v59 }
0x22f5   :  { %v1025_v60 = vpop.f32.mrf.mxu2  ;;  %1094 = vmatpush.bf16.msra.mxu3 %v2102_v11 }
0x22f8   :  { %v2191_v62 = vpop.eup %2190 }
0x22f9   :  { %1039 = vrot.lane.b32.xlu0 %v2191_v62, %s2497_s0  ;;  %v1032_v63 = vmul.f32 0.5, %v2191_v62  ;;  %1260 = vmatpush.bf16.msrb.mxu3 %v2105_v10 }
0x22fb   :  { %v1033_v0 = vadd.f32 0.5, %v1032_v63 }
0x22fd   :  { %v1037_v4 = vmul.f32 %v1035_v3, %v1033_v0  ;;  %1261 = vmatpush.bf16.msrb.mxu3 %v2104_v46 }
0x236b   :  { %v1040_v1 = vpop.permute.xlu0 %1039 }
0x236c   :  { %v1042_v2 = vmul.f32 %v1040_v1, %v1033_v0 }
0x236e   :  { %1044 = vrot.lane.b32.xlu1 %v1042_v2, %s2497_s0 }
0x23e0   :  { %v1045_v6 = vpop.permute.xlu1 %1044 }
0x23e1   :  { %v1047_v7 = vadd.f32 %v1045_v6, %v1037_v4 }
0x23e3   :  { %2192 = vtanh.f32 %v1047_v7 }
0x23e9   :  { %v2193_v8 = vpop.eup %2192 }
0x23ea   :  { %1050 = vrot.lane.b32.xlu2 %v2193_v8, %s2497_s0 }
0x2444   :  { %v1051_v13 = vpop.permute.xlu2 %1050 }
0x2445   :  { %v1053_v14 = vmul.f32 %v1051_v13, %v1033_v0 }
0x2447   :  { %v1059_v15 = vsel %vm627_vm4, %v1058_v54, %v1053_v14 }
0x2448   :  { %v1060_v16 = vpack.c.bf16 %v1059_v15, %v2736_v58 }
0x244a   :  { %1070 = vrot.lane.b32.xlu0 %v1060_v16, %s2487_s26 }
0x24bc   :  { %v1071_v19 = vpop.permute.xlu0 %1070 }
0x24bd   :  { %2042 = vmatmul.msk.bf16.vlgmr.msra.gmra.mxu3 %vm254_vm1, %v1071_v19 }
0x24be   :  { %1448 = vmatpush.bf16.msra.mxu3 %v2105_v10 }
0x24c2   :  { %1449 = vmatpush.bf16.msra.mxu3 %v2104_v46 }
0x2540   :  { %v1096_v20 = vpop.f32.mrf.mxu3 }
0x2541   :  { %v2778_v21 = vadd.f32 %v2775_v12, %v1096_v20 }
0x2543   :  { %v1130_v58 = vadd.f32 %v1126_v17, %v2778_v21 }
0x2545   :  { %2194 = vtanh.f32 %v1130_v58 }
0x2548   :  { %v1098_v14 = vpop.f32.mrf.mxu3 }
0x254b   :  { %v2195_v23 = vpop.eup %2194 }
0x254c   :  { %1136 = vrot.lane.b32.xlu1 %v2195_v23, %s2497_s0  ;;  %v1132_v24 = vmul.f32 0.5, %v2195_v23 }
0x254e   :  { %v1133_v25 = vadd.f32 0.5, %v1132_v24 }
0x2550   :  { %v1134_v29 = vmul.f32 0.0, %v1133_v25 }
0x25be   :  { %v1137_v27 = vpop.permute.xlu1 %1136 }
0x25bf   :  { %v1139_v28 = vmul.f32 %v1137_v27, %v1133_v25 }
0x25c1   :  { %1141 = vrot.lane.b32.xlu2 %v1139_v28, %s2497_s0 }
0x261b   :  { %v1142_v30 = vpop.permute.xlu2 %1141 }
0x261c   :  { %v1144_v31 = vadd.f32 %v1142_v30, %v1134_v29 }
0x261e   :  { %2196 = vtanh.f32 %v1144_v31  ;;  %v1179_v44 = vrot.slane %v1144_v31, 6 }
0x2624   :  { %v2197_v32 = vpop.eup %2196 }
0x2625   :  { %1147 = vrot.lane.b32.xlu0 %v2197_v32, %s2497_s0 }
0x2697   :  { %v1148_v33 = vpop.permute.xlu0 %1147 }
0x2698   :  { %v1150_v34 = vmul.f32 %v1148_v33, %v1133_v25 }
0x269a   :  { %v1151_v35 = vpack.c.bf16 %v1150_v34, %v1150_v34 }
0x269c   :  { %1153 = vrot.lane.b32.xlu1 %v1151_v35, %s2487_s26 }
0x270e   :  { %v1154_v36 = vpop.permute.xlu1 %1153 }
0x270f   :  { %2051 = vmatmul.msk.bf16.vlgmr.msrb.gmra.mxu1 %vm254_vm1, %v1154_v36  ;;  %v2810_v36 = vadd.f32 %v2775_v12, %v1098_v14 }
0x278c   :  { %v1167_v26 = vpop.f32.mrf.mxu1 }
0x278d   :  { %v1172_v37 = vrot.slane %v1167_v26, 6 }
0x278f   :  { %v1174_v38 = vadd.f32 %v1172_v37, %v2778_v21 }
0x2791   :  { %2198 = vtanh.f32 %v1174_v38 }
0x2794   :  { %v1169_v9 = vpop.f32.mrf.mxu1 }
0x2797   :  { %v2199_v39 = vpop.eup %2198 }
0x2798   :  { %1183 = vrot.lane.b32.xlu2 %v2199_v39, %s2497_s0  ;;  %v1176_v40 = vmul.f32 0.5, %v2199_v39 }
0x279a   :  { %v1177_v41 = vadd.f32 0.5, %v1176_v40 }
0x279c   :  { %v1181_v45 = vmul.f32 %v1179_v44, %v1177_v41 }
0x27f2   :  { %v1184_v42 = vpop.permute.xlu2 %1183 }
0x27f3   :  { %v1186_v43 = vmul.f32 %v1184_v42, %v1177_v41 }
0x27f5   :  { %1188 = vrot.lane.b32.xlu0 %v1186_v43, %s2497_s0 }
0x2867   :  { %v1189_v47 = vpop.permute.xlu0 %1188 }
0x2868   :  { %v1191_v22 = vadd.f32 %v1189_v47, %v1181_v45 }
0x286a   :  { %2200 = vtanh.f32 %v1191_v22  ;;  %v1227_v1 = vrot.slane %v1191_v22, 6 }
0x2870   :  { %v2201_v49 = vpop.eup %2200 }
0x2871   :  { %1194 = vrot.lane.b32.xlu1 %v2201_v49, %s2497_s0 }
0x28e3   :  { %v1195_v50 = vpop.permute.xlu1 %1194 }
0x28e4   :  { %v1197_v51 = vmul.f32 %v1195_v50, %v1177_v41 }
0x28e6   :  { %v1198_v52 = vpack.c.bf16 %v1197_v51, %v1197_v51  ;;  %v1482_v61 = vsel %vm623_vm2, %v1150_v34, %v1197_v51 }
0x28e8   :  { %v1200_v53 = vrot.slane %v1198_v52, 1 }
0x28ea   :  { %1201 = vrot.lane.b32.xlu2 %v1200_v53, %s2487_s26 }
0x2944   :  { %v1202_v54 = vpop.permute.xlu2 %1201 }
0x2945   :  { %2052 = vmatmul.msk.bf16.vlgmr.msrb.gmra.mxu2 %vm254_vm1, %v1202_v54 }
0x29c8   :  { %v1215_v55 = vpop.f32.mrf.mxu2 }
0x29c9   :  { %v1220_v48 = vrot.slane %v1215_v55, 4 }
0x29cb   :  { %v1222_v56 = vadd.f32 %v1220_v48, %v2778_v21 }
0x29cd   :  { %2202 = vtanh.f32 %v1222_v56 }
0x29d0   :  { %v1217_v57 = vpop.f32.mrf.mxu2 }
0x29d3   :  { %v2203_v59 = vpop.eup %2202 }
0x29d4   :  { %1231 = vrot.lane.b32.xlu0 %v2203_v59, %s2497_s0  ;;  %v1224_v60 = vmul.f32 0.5, %v2203_v59 }
0x29d6   :  { %v1225_v62 = vadd.f32 0.5, %v1224_v60 }
0x29d8   :  { %v1229_v2 = vmul.f32 %v1227_v1, %v1225_v62 }
0x2a46   :  { %v1232_v63 = vpop.permute.xlu0 %1231 }
0x2a47   :  { %v1234_v0 = vmul.f32 %v1232_v63, %v1225_v62 }
0x2a49   :  { %1236 = vrot.lane.b32.xlu1 %v1234_v0, %s2497_s0 }
0x2abb   :  { %v1237_v3 = vpop.permute.xlu1 %1236 }
0x2abc   :  { %v1239_v4 = vadd.f32 %v1237_v3, %v1229_v2 }
0x2abe   :  { %2204 = vtanh.f32 %v1239_v4  ;;  %v1275_v25 = vrot.slane %v1239_v4, 6 }
0x2ac4   :  { %v2205_v6 = vpop.eup %2204 }
0x2ac5   :  { %1242 = vrot.lane.b32.xlu2 %v2205_v6, %s2497_s0 }
0x2b1f   :  { %v1243_v7 = vpop.permute.xlu2 %1242 }
0x2b20   :  { %v1245_v8 = vmul.f32 %v1243_v7, %v1225_v62 }
0x2b22   :  { %v1246_v10 = vpack.c.bf16 %v1245_v8, %v1245_v8  ;;  %v1483_v11 = vsel %vm625_vm3, %v1482_v61, %v1245_v8 }
0x2b24   :  { %v1248_v46 = vrot.slane %v1246_v10, 2 }
0x2b26   :  { %1249 = vrot.lane.b32.xlu0 %v1248_v46, %s2487_s26 }
0x2b98   :  { %v1250_v13 = vpop.permute.xlu0 %1249 }
0x2b99   :  { %2053 = vmatmul.msk.bf16.vlgmr.msrb.gmra.mxu3 %vm254_vm1, %v1250_v13 }
0x2c1c   :  { %v1263_v15 = vpop.f32.mrf.mxu3 }
0x2c1d   :  { %v1268_v16 = vrot.slane %v1263_v15, 2 }
0x2c1f   :  { %v1270_v17 = vadd.f32 %v1268_v16, %v2778_v21 }
0x2c21   :  { %2206 = vtanh.f32 %v1270_v17 }
0x2c24   :  { %v1265_v18 = vpop.f32.mrf.mxu3 }
0x2c27   :  { %v2207_v19 = vpop.eup %2206 }
0x2c28   :  { %1279 = vrot.lane.b32.xlu1 %v2207_v19, %s2497_s0  ;;  %v1272_v20 = vmul.f32 0.5, %v2207_v19 }
0x2c2a   :  { %v1273_v58 = vadd.f32 0.5, %v1272_v20 }
0x2c2c   :  { %v1277_v27 = vmul.f32 %v1275_v25, %v1273_v58 }
0x2c9a   :  { %v1280_v23 = vpop.permute.xlu1 %1279 }
0x2c9b   :  { %v1282_v24 = vmul.f32 %v1280_v23, %v1273_v58 }
0x2c9d   :  { %1284 = vrot.lane.b32.xlu2 %v1282_v24, %s2497_s0 }
0x2cf7   :  { %v1285_v28 = vpop.permute.xlu2 %1284 }
0x2cf8   :  { %v1287_v29 = vadd.f32 %v1285_v28, %v1277_v27 }
0x2cfa   :  { %2208 = vtanh.f32 %v1287_v29  ;;  %v1320_v43 = vrot.slane %v1287_v29, 6 }
0x2d00   :  { %v2209_v30 = vpop.eup %2208 }
0x2d01   :  { %1290 = vrot.lane.b32.xlu0 %v2209_v30, %s2497_s0 }
0x2d73   :  { %v1291_v21 = vpop.permute.xlu0 %1290 }
0x2d74   :  { %v1293_v31 = vmul.f32 %v1291_v21, %v1273_v58 }
0x2d76   :  { %v1294_v32 = vpack.c.bf16 %v1293_v31, %v1293_v31  ;;  %v2805_v33 = vsel %vm627_vm4, %v1483_v11, %v1293_v31 }
0x2d78   :  { %v1296_v34 = vrot.slane %v1294_v32, 3 }
0x2d7a   :  { %1297 = vrot.lane.b32.xlu1 %v1296_v34, %s2487_s26 }
0x2dec   :  { %v1298_v35 = vpop.permute.xlu1 %1297 }
0x2ded   :  { %2054 = vmatmul.msk.bf16.vlgmr.msrb.gmra.mxu0 %vm254_vm1, %v1298_v35 }
0x2e6a   :  { %v1311_v26 = vpop.f32.mrf.mxu0 }
0x2e6b   :  { %v1315_v37 = vadd.f32 %v1311_v26, %v2810_v36 }
0x2e6d   :  { %2210 = vtanh.f32 %v1315_v37 }
0x2e72   :  { %v1313_v38 = vpop.f32.mrf.mxu0 }
0x2e73   :  { %v2211_v9 = vpop.eup %2210 }
0x2e74   :  { %1324 = vrot.lane.b32.xlu2 %v2211_v9, %s2497_s0  ;;  %v1317_v39 = vmul.f32 0.5, %v2211_v9 }
0x2e76   :  { %v1318_v40 = vadd.f32 0.5, %v1317_v39 }
0x2e78   :  { %v1322_v44 = vmul.f32 %v1320_v43, %v1318_v40 }
0x2ece   :  { %v1325_v41 = vpop.permute.xlu2 %1324 }
0x2ecf   :  { %v1327_v42 = vmul.f32 %v1325_v41, %v1318_v40 }
0x2ed1   :  { %1329 = vrot.lane.b32.xlu0 %v1327_v42, %s2497_s0 }
0x2f43   :  { %v1330_v45 = vpop.permute.xlu0 %1329 }
0x2f44   :  { %v1332_v47 = vadd.f32 %v1330_v45, %v1322_v44  ;;  %v2109_v45 = vld [vmem:[#allocation14 + $0x8] sm:$0xff] }
0x2f45   :  { %1551 = vmatpush.bf16.msrb.mxu1 %v2109_v45  ;;  %1592 = vmatpush.bf16.msrb.mxu2 %v2109_v45 }
0x2f46   :  { %2212 = vtanh.f32 %v1332_v47  ;;  %v1367_v62 = vrot.slane %v1332_v47, 6  ;;  %v2108_v47 = vld [vmem:[#allocation14] sm:$0xff]  ;;  %1640 = vmatpush.bf16.msrb.mxu3 %v2109_v45 }
0x2f49   :  { %1552 = vmatpush.bf16.msrb.mxu1 %v2108_v47  ;;  %1593 = vmatpush.bf16.msrb.mxu2 %v2108_v47 }
0x2f4a   :  { %1641 = vmatpush.bf16.msrb.mxu3 %v2108_v47 }
0x2f4c   :  { %v2213_v12 = vpop.eup %2212 }
0x2f4d   :  { %1335 = vrot.lane.b32.xlu1 %v2213_v12, %s2497_s0  ;;  %v2106_v12 = vld [vmem:[#allocation13] sm:$0xff] }
0x2fbf   :  { %v1336_v22 = vpop.permute.xlu1 %1335 }
0x2fc0   :  { %v1338_v49 = vmul.f32 %v1336_v22, %v1318_v40 }
0x2fc2   :  { %v1339_v50 = vpack.c.bf16 %v1338_v49, %v1338_v49 }
0x2fc4   :  { %1341 = vrot.lane.b32.xlu2 %v1339_v50, %s2487_s26 }
0x301e   :  { %v1342_v51 = vpop.permute.xlu2 %1341 }
0x301f   :  { %2055 = vmatmul.msk.bf16.vlgmr.msra.gmra.mxu1 %vm254_vm1, %v1342_v51 }
0x3020   :  { %1736 = vmatpush.bf16.msra.mxu1 %v2109_v45 }
0x3024   :  { %1737 = vmatpush.bf16.msra.mxu1 %v2108_v47 }
0x302f   :  { %1553 = vmatmul.bf16.vlgmr.msrb.gmra.mxu1 %v2496_v5 }
0x309c   :  { %v1355_v52 = vpop.f32.mrf.mxu1 }
0x309d   :  { %v1360_v53 = vrot.slane %v1355_v52, 6 }
0x309f   :  { %v1362_v54 = vadd.f32 %v1360_v53, %v2810_v36 }
0x30a1   :  { %2214 = vtanh.f32 %v1362_v54  ;;  %v2844_v54 = vld [vmem:[%s2924_s12] ss:$0 sm:$0xff] }
0x30a4   :  { %v1357_v55 = vpop.f32.mrf.mxu1 }
0x30a7   :  { %v2215_v48 = vpop.eup %2214 }
0x30a8   :  { %1371 = vrot.lane.b32.xlu0 %v2215_v48, %s2497_s0  ;;  %v1364_v56 = vmul.f32 0.5, %v2215_v48 }
0x30aa   :  { %v1365_v57 = vadd.f32 0.5, %v1364_v56 }
0x30ac   :  { %v1369_v63 = vmul.f32 %v1367_v62, %v1365_v57  ;;  %v1554_v5 = vpop.f32.mrf.mxu1 }
0x30b4   :  { %v1556_v53 = vpop.f32.mrf.mxu1 }
0x311a   :  { %v1372_v59 = vpop.permute.xlu0 %1371 }
0x311b   :  { %v1374_v60 = vmul.f32 %v1372_v59, %v1365_v57 }
0x311d   :  { %1376 = vrot.lane.b32.xlu1 %v1374_v60, %s2497_s0 }
0x318f   :  { %v1377_v0 = vpop.permute.xlu1 %1376 }
0x3190   :  { %v1379_v1 = vadd.f32 %v1377_v0, %v1369_v63 }
0x3192   :  { %2216 = vtanh.f32 %v1379_v1  ;;  %v1415_v18 = vrot.slane %v1379_v1, 6 }
0x3198   :  { %v2217_v2 = vpop.eup %2216 }
0x3199   :  { %1382 = vrot.lane.b32.xlu2 %v2217_v2, %s2497_s0 }
0x31f3   :  { %v1383_v3 = vpop.permute.xlu2 %1382 }
0x31f4   :  { %v1385_v4 = vmul.f32 %v1383_v3, %v1365_v57 }
0x31f6   :  { %v1386_v6 = vpack.c.bf16 %v1385_v4, %v1385_v4  ;;  %v1485_v27 = vsel %vm623_vm2, %v1338_v49, %v1385_v4 }
0x31f8   :  { %v1388_v7 = vrot.slane %v1386_v6, 1 }
0x31fa   :  { %1389 = vrot.lane.b32.xlu0 %v1388_v7, %s2487_s26 }
0x326c   :  { %v1390_v8 = vpop.permute.xlu0 %1389 }
0x326d   :  { %2056 = vmatmul.msk.bf16.vlgmr.msra.gmra.mxu2 %vm254_vm1, %v1390_v8 }
0x326e   :  { %1780 = vmatpush.bf16.msra.mxu2 %v2109_v45 }
0x3272   :  { %1781 = vmatpush.bf16.msra.mxu2 %v2108_v47 }
0x32f0   :  { %v1403_v61 = vpop.f32.mrf.mxu2 }
0x32f1   :  { %v1408_v10 = vrot.slane %v1403_v61, 4 }
0x32f3   :  { %v1410_v11 = vadd.f32 %v1408_v10, %v2810_v36 }
0x32f5   :  { %2218 = vtanh.f32 %v1410_v11 }
0x32f8   :  { %v1405_v46 = vpop.f32.mrf.mxu2 }
0x32fb   :  { %v2219_v13 = vpop.eup %2218 }
0x32fc   :  { %1419 = vrot.lane.b32.xlu1 %v2219_v13, %s2497_s0  ;;  %v1412_v14 = vmul.f32 0.5, %v2219_v13 }
0x32fe   :  { %v1413_v15 = vadd.f32 0.5, %v1412_v14 }
0x3300   :  { %v1417_v19 = vmul.f32 %v1415_v18, %v1413_v15 }
0x336e   :  { %v1420_v16 = vpop.permute.xlu1 %1419 }
0x336f   :  { %v1422_v17 = vmul.f32 %v1420_v16, %v1413_v15 }
0x3371   :  { %1424 = vrot.lane.b32.xlu2 %v1422_v17, %s2497_s0 }
0x33cb   :  { %v1425_v20 = vpop.permute.xlu2 %1424 }
0x33cc   :  { %v1427_v58 = vadd.f32 %v1425_v20, %v1417_v19 }
0x33ce   :  { %2220 = vtanh.f32 %v1427_v58  ;;  %v1463_v40 = vrot.slane %v1427_v58, 6 }
0x33d4   :  { %v2221_v23 = vpop.eup %2220 }
0x33d5   :  { %1430 = vrot.lane.b32.xlu0 %v2221_v23, %s2497_s0 }
0x3447   :  { %v1431_v24 = vpop.permute.xlu0 %1430 }
0x3448   :  { %v1433_v25 = vmul.f32 %v1431_v24, %v1413_v15 }
0x344a   :  { %v1434_v28 = vpack.c.bf16 %v1433_v25, %v1433_v25  ;;  %v1486_v29 = vsel %vm625_vm3, %v1485_v27, %v1433_v25 }
0x344c   :  { %v1436_v30 = vrot.slane %v1434_v28, 2 }
0x344e   :  { %1437 = vrot.lane.b32.xlu1 %v1436_v30, %s2487_s26 }
0x34c0   :  { %v1438_v21 = vpop.permute.xlu1 %1437 }
0x34c1   :  { %2057 = vmatmul.msk.bf16.vlgmr.msra.gmra.mxu3 %vm254_vm1, %v1438_v21 }
0x34c2   :  { %1828 = vmatpush.bf16.msra.mxu3 %v2109_v45 }
0x34c6   :  { %1829 = vmatpush.bf16.msra.mxu3 %v2108_v47 }
0x3544   :  { %v1451_v31 = vpop.f32.mrf.mxu3 }
0x3545   :  { %v1456_v32 = vrot.slane %v1451_v31, 2 }
0x3547   :  { %v1458_v34 = vadd.f32 %v1456_v32, %v2810_v36  ;;  %v2107_v36 = vld [vmem:[#allocation13 + $0x8] sm:$0xff] }
0x3548   :  { %1521 = vmatpush.bf16.msra.mxu0 %v2107_v36 }
0x3549   :  { %2222 = vtanh.f32 %v1458_v34 }
0x354c   :  { %v1453_v35 = vpop.f32.mrf.mxu3  ;;  %1522 = vmatpush.bf16.msra.mxu0 %v2106_v12 }
0x354f   :  { %v2223_v26 = vpop.eup %2222 }
0x3550   :  { %1467 = vrot.lane.b32.xlu2 %v2223_v26, %s2497_s0  ;;  %v1460_v37 = vmul.f32 0.5, %v2223_v26  ;;  %1688 = vmatpush.bf16.msrb.mxu0 %v2109_v45 }
0x3552   :  { %v1461_v38 = vadd.f32 0.5, %v1460_v37 }
0x3554   :  { %v1465_v41 = vmul.f32 %v1463_v40, %v1461_v38  ;;  %1689 = vmatpush.bf16.msrb.mxu0 %v2108_v47 }
0x35aa   :  { %v1468_v9 = vpop.permute.xlu2 %1467 }
0x35ab   :  { %v1470_v39 = vmul.f32 %v1468_v9, %v1461_v38 }
0x35ad   :  { %1472 = vrot.lane.b32.xlu0 %v1470_v39, %s2497_s0 }
0x361f   :  { %v1473_v42 = vpop.permute.xlu0 %1472 }
0x3620   :  { %v1475_v43 = vadd.f32 %v1473_v42, %v1465_v41 }
0x3622   :  { %2224 = vtanh.f32 %v1475_v43 }
0x3628   :  { %v2225_v44 = vpop.eup %2224 }
0x3629   :  { %1478 = vrot.lane.b32.xlu1 %v2225_v44, %s2497_s0 }
0x369b   :  { %v1479_v22 = vpop.permute.xlu1 %1478 }
0x369c   :  { %v1481_v49 = vmul.f32 %v1479_v22, %v1461_v38 }
0x369e   :  { %v1487_v50 = vsel %vm627_vm4, %v1486_v29, %v1481_v49 }
0x369f   :  { %v1488_v51 = vpack.c.bf16 %v1487_v50, %v2805_v33 }
0x36a1   :  { %1498 = vrot.lane.b32.xlu2 %v1488_v51, %s2487_s26 }
0x36fb   :  { %v1499_v52 = vpop.permute.xlu2 %1498 }
0x36fc   :  { %2066 = vmatmul.msk.bf16.vlgmr.msra.gmra.mxu0 %vm254_vm1, %v1499_v52 }
0x36fd   :  { %1876 = vmatpush.bf16.msra.mxu0 %v2109_v45 }
0x3701   :  { %1877 = vmatpush.bf16.msra.mxu0 %v2108_v47 }
0x3779   :  { %v1524_v55 = vpop.f32.mrf.mxu0 }
0x377a   :  { %v2847_v48 = vadd.f32 %v2844_v54, %v1524_v55 }
0x377c   :  { %v1558_v33 = vadd.f32 %v1554_v5, %v2847_v48 }
0x377e   :  { %2226 = vtanh.f32 %v1558_v33 }
0x3781   :  { %v1526_v47 = vpop.f32.mrf.mxu0 }
0x3784   :  { %v2227_v56 = vpop.eup %2226 }
0x3785   :  { %1564 = vrot.lane.b32.xlu0 %v2227_v56, %s2497_s0  ;;  %v1560_v57 = vmul.f32 0.5, %v2227_v56 }
0x3787   :  { %v1561_v59 = vadd.f32 0.5, %v1560_v57 }
0x3789   :  { %v1562_v63 = vmul.f32 0.0, %v1561_v59 }
0x37f7   :  { %v1565_v60 = vpop.permute.xlu0 %1564 }
0x37f8   :  { %v1567_v62 = vmul.f32 %v1565_v60, %v1561_v59 }
0x37fa   :  { %1569 = vrot.lane.b32.xlu1 %v1567_v62, %s2497_s0 }
0x386c   :  { %v1570_v0 = vpop.permute.xlu1 %1569 }
0x386d   :  { %v1572_v1 = vadd.f32 %v1570_v0, %v1562_v63 }
0x386f   :  { %2228 = vtanh.f32 %v1572_v1  ;;  %v1607_v17 = vrot.slane %v1572_v1, 6 }
0x3875   :  { %v2229_v2 = vpop.eup %2228 }
0x3876   :  { %1575 = vrot.lane.b32.xlu2 %v2229_v2, %s2497_s0  ;;  %v2874_v2 = vadd.f32 %v2844_v54, %v1526_v47 }
0x38d0   :  { %v1576_v3 = vpop.permute.xlu2 %1575 }
0x38d1   :  { %v1578_v4 = vmul.f32 %v1576_v3, %v1561_v59 }
0x38d3   :  { %v1579_v6 = vpack.c.bf16 %v1578_v4, %v1578_v4 }
0x38d5   :  { %1581 = vrot.lane.b32.xlu0 %v1579_v6, %s2487_s26 }
0x3947   :  { %v1582_v7 = vpop.permute.xlu0 %1581 }
0x3948   :  { %2075 = vmatmul.msk.bf16.vlgmr.msrb.gmra.mxu2 %vm254_vm1, %v1582_v7 }
0x39cb   :  { %v1595_v8 = vpop.f32.mrf.mxu2 }
0x39cc   :  { %v1600_v61 = vrot.slane %v1595_v8, 6 }
0x39ce   :  { %v1602_v10 = vadd.f32 %v1600_v61, %v2847_v48 }
0x39d0   :  { %2230 = vtanh.f32 %v1602_v10 }
0x39d3   :  { %v1597_v11 = vpop.f32.mrf.mxu2 }
0x39d6   :  { %v2231_v46 = vpop.eup %2230 }
0x39d7   :  { %1611 = vrot.lane.b32.xlu1 %v2231_v46, %s2497_s0  ;;  %v1604_v13 = vmul.f32 0.5, %v2231_v46 }
0x39d9   :  { %v1605_v14 = vadd.f32 0.5, %v1604_v13 }
0x39db   :  { %v1609_v18 = vmul.f32 %v1607_v17, %v1605_v14 }
0x3a49   :  { %v1612_v15 = vpop.permute.xlu1 %1611 }
0x3a4a   :  { %v1614_v16 = vmul.f32 %v1612_v15, %v1605_v14 }
0x3a4c   :  { %1616 = vrot.lane.b32.xlu2 %v1614_v16, %s2497_s0 }
0x3aa6   :  { %v1617_v19 = vpop.permute.xlu2 %1616 }
0x3aa7   :  { %v1619_v20 = vadd.f32 %v1617_v19, %v1609_v18 }
0x3aa9   :  { %2232 = vtanh.f32 %v1619_v20  ;;  %v1655_v38 = vrot.slane %v1619_v20, 6 }
0x3aaf   :  { %v2233_v58 = vpop.eup %2232 }
0x3ab0   :  { %1622 = vrot.lane.b32.xlu0 %v2233_v58, %s2497_s0 }
0x3b22   :  { %v1623_v23 = vpop.permute.xlu0 %1622 }
0x3b23   :  { %v1625_v24 = vmul.f32 %v1623_v23, %v1605_v14 }
0x3b25   :  { %v1626_v25 = vpack.c.bf16 %v1625_v24, %v1625_v24 }
0x3b27   :  { %v1628_v27 = vrot.slane %v1626_v25, 1 }
0x3b29   :  { %1629 = vrot.lane.b32.xlu1 %v1628_v27, %s2487_s26 }
0x3b9b   :  { %v1630_v28 = vpop.permute.xlu1 %1629 }
0x3b9c   :  { %2076 = vmatmul.msk.bf16.vlgmr.msrb.gmra.mxu3 %vm254_vm1, %v1630_v28 }
0x3c1f   :  { %v1643_v29 = vpop.f32.mrf.mxu3 }
0x3c20   :  { %v1648_v30 = vrot.slane %v1643_v29, 4 }
0x3c22   :  { %v1650_v21 = vadd.f32 %v1648_v30, %v2847_v48 }
0x3c24   :  { %2234 = vtanh.f32 %v1650_v21 }
0x3c27   :  { %v1645_v31 = vpop.f32.mrf.mxu3 }
0x3c2a   :  { %v2235_v32 = vpop.eup %2234 }
0x3c2b   :  { %1659 = vrot.lane.b32.xlu2 %v2235_v32, %s2497_s0  ;;  %v1652_v34 = vmul.f32 0.5, %v2235_v32 }
0x3c2d   :  { %v1653_v35 = vadd.f32 0.5, %v1652_v34 }
0x3c2f   :  { %v1657_v9 = vmul.f32 %v1655_v38, %v1653_v35 }
0x3c85   :  { %v1660_v26 = vpop.permute.xlu2 %1659 }
0x3c86   :  { %v1662_v37 = vmul.f32 %v1660_v26, %v1653_v35 }
0x3c88   :  { %1664 = vrot.lane.b32.xlu0 %v1662_v37, %s2497_s0 }
0x3cfa   :  { %v1665_v39 = vpop.permute.xlu0 %1664 }
0x3cfb   :  { %v1667_v40 = vadd.f32 %v1665_v39, %v1657_v9 }
0x3cfd   :  { %2236 = vtanh.f32 %v1667_v40  ;;  %v1703_v33 = vrot.slane %v1667_v40, 6 }
0x3d03   :  { %v2237_v41 = vpop.eup %2236 }
0x3d04   :  { %1670 = vrot.lane.b32.xlu1 %v2237_v41, %s2497_s0 }
0x3d76   :  { %v1671_v42 = vpop.permute.xlu1 %1670 }
0x3d77   :  { %v1673_v43 = vmul.f32 %v1671_v42, %v1653_v35 }
0x3d79   :  { %v1674_v44 = vpack.c.bf16 %v1673_v43, %v1673_v43 }
0x3d7b   :  { %v1676_v36 = vrot.slane %v1674_v44, 2 }
0x3d7d   :  { %1677 = vrot.lane.b32.xlu2 %v1676_v36, %s2487_s26 }
0x3dd7   :  { %v1678_v45 = vpop.permute.xlu2 %1677 }
0x3dd8   :  { %2077 = vmatmul.msk.bf16.vlgmr.msrb.gmra.mxu0 %vm254_vm1, %v1678_v45 }
0x3e55   :  { %v1691_v12 = vpop.f32.mrf.mxu0 }
0x3e56   :  { %v1696_v22 = vrot.slane %v1691_v12, 2 }
0x3e58   :  { %v1698_v49 = vadd.f32 %v1696_v22, %v2847_v48 }
0x3e5a   :  { %2238 = vtanh.f32 %v1698_v49 }
0x3e5d   :  { %v1693_v50 = vpop.f32.mrf.mxu0 }
0x3e60   :  { %v2239_v51 = vpop.eup %2238 }
0x3e61   :  { %1707 = vrot.lane.b32.xlu0 %v2239_v51, %s2497_s0  ;;  %v1700_v52 = vmul.f32 0.5, %v2239_v51 }
0x3e63   :  { %v1701_v5 = vadd.f32 0.5, %v1700_v52 }
0x3e65   :  { %v1705_v56 = vmul.f32 %v1703_v33, %v1701_v5 }
0x3ed3   :  { %v1708_v53 = vpop.permute.xlu0 %1707 }
0x3ed4   :  { %v1710_v55 = vmul.f32 %v1708_v53, %v1701_v5 }
0x3ed6   :  { %1712 = vrot.lane.b32.xlu1 %v1710_v55, %s2497_s0 }
0x3f48   :  { %v1713_v57 = vpop.permute.xlu1 %1712 }
0x3f49   :  { %v1715_v59 = vadd.f32 %v1713_v57, %v1705_v56 }
0x3f4b   :  { %2240 = vtanh.f32 %v1715_v59  ;;  %v1748_v46 = vrot.slane %v1715_v59, 6 }
0x3f51   :  { %v2241_v60 = vpop.eup %2240 }
0x3f52   :  { %1718 = vrot.lane.b32.xlu2 %v2241_v60, %s2497_s0 }
0x3fac   :  { %v1719_v48 = vpop.permute.xlu2 %1718 }
0x3fad   :  { %v1721_v62 = vmul.f32 %v1719_v48, %v1701_v5 }
0x3faf   :  { %v1722_v63 = vpack.c.bf16 %v1721_v62, %v1721_v62 }
0x3fb1   :  { %v1724_v0 = vrot.slane %v1722_v63, 3 }
0x3fb3   :  { %1725 = vrot.lane.b32.xlu0 %v1724_v0, %s2487_s26 }
0x4025   :  { %v1726_v1 = vpop.permute.xlu0 %1725 }
0x4026   :  { %2078 = vmatmul.msk.bf16.vlgmr.msra.gmra.mxu1 %vm254_vm1, %v1726_v1 }
0x40a3   :  { %v1739_v3 = vpop.f32.mrf.mxu1 }
0x40a4   :  { %v1743_v4 = vadd.f32 %v1739_v3, %v2874_v2 }
0x40a6   :  { %2242 = vtanh.f32 %v1743_v4 }
0x40ab   :  { %v1741_v6 = vpop.f32.mrf.mxu1 }
0x40ac   :  { %v2243_v7 = vpop.eup %2242 }
0x40ad   :  { %1752 = vrot.lane.b32.xlu1 %v2243_v7, %s2497_s0  ;;  %v1745_v8 = vmul.f32 0.5, %v2243_v7 }
0x40af   :  { %v1746_v61 = vadd.f32 0.5, %v1745_v8 }
0x40b1   :  { %v1750_v13 = vmul.f32 %v1748_v46, %v1746_v61 }
0x411f   :  { %v1753_v10 = vpop.permute.xlu1 %1752 }
0x4120   :  { %v1755_v11 = vmul.f32 %v1753_v10, %v1746_v61  ;;  %v2110_v10 = vld [vmem:[%s2925_s13] sm:$0xff] }
0x4122   :  { %1757 = vrot.lane.b32.xlu2 %v1755_v11, %s2497_s0 }
0x417c   :  { %v1758_v14 = vpop.permute.xlu2 %1757 }
0x417d   :  { %v1760_v15 = vadd.f32 %v1758_v14, %v1750_v13 }
0x417f   :  { %2244 = vtanh.f32 %v1760_v15  ;;  %v1795_v21 = vrot.slane %v1760_v15, 6 }
0x4185   :  { %v2245_v54 = vpop.eup %2244 }
0x4186   :  { %1763 = vrot.lane.b32.xlu0 %v2245_v54, %s2497_s0  ;;  %v2129_v54 = vld [vmem:[%s2926_s14] ss:$0 sm:$0xff] }
0x41f8   :  { %v1764_v16 = vpop.permute.xlu0 %1763 }
0x41f9   :  { %v1766_v17 = vmul.f32 %v1764_v16, %v1746_v61 }
0x41fb   :  { %v1767_v18 = vpack.c.bf16 %v1766_v17, %v1766_v17 }
0x41fd   :  { %1769 = vrot.lane.b32.xlu1 %v1767_v18, %s2487_s26 }
0x426f   :  { %v1770_v19 = vpop.permute.xlu1 %1769 }
0x4270   :  { %2079 = vmatmul.msk.bf16.vlgmr.msra.gmra.mxu2 %vm254_vm1, %v1770_v19 }
0x42f3   :  { %v1783_v20 = vpop.f32.mrf.mxu2 }
0x42f4   :  { %v1788_v58 = vrot.slane %v1783_v20, 6 }
0x42f6   :  { %v1790_v23 = vadd.f32 %v1788_v58, %v2874_v2 }
0x42f8   :  { %2246 = vtanh.f32 %v1790_v23 }
0x42fb   :  { %v1785_v24 = vpop.f32.mrf.mxu2 }
0x42fe   :  { %v2247_v25 = vpop.eup %2246 }
0x42ff   :  { %1799 = vrot.lane.b32.xlu2 %v2247_v25, %s2497_s0  ;;  %v1792_v27 = vmul.f32 0.5, %v2247_v25 }
0x4301   :  { %v1793_v28 = vadd.f32 0.5, %v1792_v27 }
0x4303   :  { %v1797_v31 = vmul.f32 %v1795_v21, %v1793_v28 }
0x4359   :  { %v1800_v29 = vpop.permute.xlu2 %1799 }
0x435a   :  { %v1802_v30 = vmul.f32 %v1800_v29, %v1793_v28 }
0x435c   :  { %1804 = vrot.lane.b32.xlu0 %v1802_v30, %s2497_s0 }
0x43ce   :  { %v1805_v32 = vpop.permute.xlu0 %1804 }
0x43cf   :  { %v1807_v34 = vadd.f32 %v1805_v32, %v1797_v31 }
0x43d1   :  { %2248 = vtanh.f32 %v1807_v34  ;;  %v1843_v22 = vrot.slane %v1807_v34, 6 }
0x43d7   :  { %v2249_v35 = vpop.eup %2248 }
0x43d8   :  { %1810 = vrot.lane.b32.xlu1 %v2249_v35, %s2497_s0 }
0x444a   :  { %v1811_v26 = vpop.permute.xlu1 %1810 }
0x444b   :  { %v1813_v37 = vmul.f32 %v1811_v26, %v1793_v28 }
0x444d   :  { %v1814_v38 = vpack.c.bf16 %v1813_v37, %v1813_v37 }
0x444f   :  { %v1816_v9 = vrot.slane %v1814_v38, 1 }
0x4451   :  { %1817 = vrot.lane.b32.xlu2 %v1816_v9, %s2487_s26 }
0x44ab   :  { %v1818_v39 = vpop.permute.xlu2 %1817 }
0x44ac   :  { %2080 = vmatmul.msk.bf16.vlgmr.msra.gmra.mxu3 %vm254_vm1, %v1818_v39 }
0x452f   :  { %v1831_v40 = vpop.f32.mrf.mxu3 }
0x4530   :  { %v1836_v41 = vrot.slane %v1831_v40, 4 }
0x4532   :  { %v1838_v42 = vadd.f32 %v1836_v41, %v2874_v2 }
0x4534   :  { %2250 = vtanh.f32 %v1838_v42 }
0x4537   :  { %v1833_v43 = vpop.f32.mrf.mxu3 }
0x453a   :  { %v2251_v44 = vpop.eup %2250 }
0x453b   :  { %1847 = vrot.lane.b32.xlu0 %v2251_v44, %s2497_s0  ;;  %v1840_v36 = vmul.f32 0.5, %v2251_v44 }
0x453d   :  { %v1841_v45 = vadd.f32 0.5, %v1840_v36 }
0x453f   :  { %v1845_v49 = vmul.f32 %v1843_v22, %v1841_v45 }
0x45ad   :  { %v1848_v47 = vpop.permute.xlu0 %1847 }
0x45ae   :  { %v1850_v12 = vmul.f32 %v1848_v47, %v1841_v45 }
0x45b0   :  { %1852 = vrot.lane.b32.xlu1 %v1850_v12, %s2497_s0 }
0x4622   :  { %v1853_v50 = vpop.permute.xlu1 %1852 }
0x4623   :  { %v1855_v51 = vadd.f32 %v1853_v50, %v1845_v49 }
0x4625   :  { %2252 = vtanh.f32 %v1855_v51  ;;  %v1891_v4 = vrot.slane %v1855_v51, 6 }
0x462b   :  { %v2253_v52 = vpop.eup %2252 }
0x462c   :  { %1858 = vrot.lane.b32.xlu2 %v2253_v52, %s2497_s0 }
0x4686   :  { %v1859_v5 = vpop.permute.xlu2 %1858 }
0x4687   :  { %v1861_v53 = vmul.f32 %v1859_v5, %v1841_v45 }
0x4689   :  { %v1862_v55 = vpack.c.bf16 %v1861_v53, %v1861_v53 }
0x468b   :  { %v1864_v33 = vrot.slane %v1862_v55, 2 }
0x468d   :  { %1865 = vrot.lane.b32.xlu0 %v1864_v33, %s2487_s26 }
0x46ff   :  { %v1866_v56 = vpop.permute.xlu0 %1865 }
0x4700   :  { %2081 = vmatmul.msk.bf16.vlgmr.msra.gmra.mxu0 %vm254_vm1, %v1866_v56 }
0x477d   :  { %v1879_v57 = vpop.f32.mrf.mxu0 }
0x477e   :  { %v1884_v59 = vrot.slane %v1879_v57, 2 }
0x4780   :  { %v1886_v60 = vadd.f32 %v1884_v59, %v2874_v2  ;;  %v2111_v2 = vld [vmem:[%s2925_s13 + $0x8] sm:$0xff]  ;;  %s1960_s13 = sshll.u32 %s2927_s15, 4  ;;  %s1961_s13 = int_to_ptr.hbm [resolvable:$true] %s1960_s13 }
0x4781   :  { %1944 = vmatpush.bf16.msrb.mxu1 %v2111_v2 }
0x4782   :  { %2254 = vtanh.f32 %v1886_v60 }
0x4785   :  { %v1881_v48 = vpop.f32.mrf.mxu0  ;;  %1945 = vmatpush.bf16.msrb.mxu1 %v2110_v10 }
0x4788   :  { %v2255_v62 = vpop.eup %2254 }
0x4789   :  { %1895 = vrot.lane.b32.xlu1 %v2255_v62, %s2497_s0  ;;  %v1888_v63 = vmul.f32 0.5, %v2255_v62 }
0x478b   :  { %v1889_v0 = vadd.f32 0.5, %v1888_v63 }
0x478d   :  { %v1893_v6 = vmul.f32 %v1891_v4, %v1889_v0 }
0x47fb   :  { %v1896_v1 = vpop.permute.xlu1 %1895 }
0x47fc   :  { %v1898_v3 = vmul.f32 %v1896_v1, %v1889_v0 }
0x47fe   :  { %1900 = vrot.lane.b32.xlu2 %v1898_v3, %s2497_s0 }
0x4858   :  { %v1901_v7 = vpop.permute.xlu2 %1900 }
0x4859   :  { %v1903_v8 = vadd.f32 %v1901_v7, %v1893_v6 }
0x485b   :  { %2256 = vtanh.f32 %v1903_v8 }
0x4861   :  { %v2257_v61 = vpop.eup %2256 }
0x4862   :  { %1906 = vrot.lane.b32.xlu0 %v2257_v61, %s2497_s0 }
0x48d4   :  { %v1907_v11 = vpop.permute.xlu0 %1906 }
0x48d5   :  { %v1909_v46 = vmul.f32 %v1907_v11, %v1889_v0 }
0x48d7   :  { %v1910_v13 = vpack.c.bf16 %v1909_v46, %v1909_v46 }
0x48d9   :  { %v1920_v14 = vrot.slane %v1910_v13, 3 }
0x48db   :  { %1921 = vrot.lane.b32.xlu1 %v1920_v14, %s2487_s26 }
0x494d   :  { %v1922_v15 = vpop.permute.xlu1 %1921 }
0x494e   :  { %2090 = vmatmul.msk.bf16.vlgmr.msrb.gmra.mxu1 %vm254_vm1, %v1922_v15 }
0x49cb   :  { %v1947_v16 = vpop.f32.mrf.mxu1 }
0x49cc   :  { %v1948_v17 = vadd.f32 %v2129_v54, %v1947_v16 }
0x49ce   :  { %1952 = vst.msk [vmem:[#allocation16] sm:$0x3] %vm1951_vm5, %v1948_v17 }
0x49cf   :  { %1963 = dma.vmem_to_hbm [thread:$0]  %s1959_s7, 32, %s1961_s13, [#allocation4]  }
0x49d3   :  { %v1949_v18 = vpop.f32.mrf.mxu1 }
0x49d4   :  { %2484 = dma.done.wait [#allocation4], 32  }
0x49d5   :  { %2485 = vsyncadd [#allocation4], 4294967264 }
0x49d6   :  { %1968 = vsyncpa [#allocation3], 1 }
0x49d7   :  { %1969 = vsyncpa [#allocation6], 1 }
0x49d8   :  { %1970 = vsyncpa [#allocation9], 1 }
0x49d9   :  { %1971 = vsyncpa [#allocation12], 1 }
0x49da   :  { %1972 = vsyncpa [#allocation15], 1 }
0x49db   :  { %1973 = vsyncpa [#allocation4], 1 }

</bundles_post_ra>
